<compile_context>
chip_gen: v7x
topology: tpu7x:2x2x1
jax: 0.10.0
libtpu: 0.0.40
codegen_flags: <defaults>
</compile_context>

<pallas_src>
import jax
import jax.numpy as jnp
from jax import lax
from jax.experimental import pallas as pl
from jax.experimental.pallas import tpu as pltpu


# ----------------------------------------------------------------------------- kernel ---

def _make_kernel(n_real, n_pad, tkv, ci_pad, use_bf16_exp):
    cdt = jnp.bfloat16
    need_mask = n_pad != n_real   # static: masking code is only traced when N was padded

    def kernel(xq_ref, wt_ref, bt_ref, wpg_ref, bpg_ref, ww_ref, bw_ref,
               o_ref, theta_s, acc_s):
        # xq_ref : (1, N_pad, C_pad)  full spatial extent (query side, key source, residual)
        kv = pl.program_id(1)
        n_kv = pl.num_programs(1)

        @pl.when(kv == 0)
        def _():
            # theta projection once per batch element; zero the y accumulator.
            xq = xq_ref[0].astype(cdt)                                           # (N, Cp)
            th = jnp.dot(xq, wt_ref[...], preferred_element_type=jnp.float32) + bt_ref[...]
            theta_s[...] = th.astype(cdt)                                        # (N, Cip)
            acc_s[...] = jnp.zeros_like(acc_s)

        # Key tile sliced from the already-resident x block (no second HBM stream).
        start = pl.multiple_of(kv * tkv, tkv)
        xk = xq_ref[0, pl.ds(start, tkv), :].astype(cdt)                         # (TKV, Cp)

        # Fused phi|g projection for this key tile (one MXU pass over the tile).
        pg = jnp.dot(xk, wpg_ref[...], preferred_element_type=jnp.float32) + bpg_ref[...]
        phi = pg[:, :ci_pad].astype(cdt)                                         # (TKV, Cip)
        g = pg[:, ci_pad:]                                                       # (TKV, Cip) f32

        # f_blk[i, j] = <theta_i, phi_j>; contract channel dims directly (no transpose).
        f_blk = lax.dot_general(theta_s[...], phi,
                                dimension_numbers=(((1,), (1,)), ((), ())),
                                preferred_element_type=jnp.float32)              # (N, TKV)

        if need_mask:
            # Padded query rows must not contribute to the column softmax statistics.
            rows = lax.broadcasted_iota(jnp.int32, (n_pad, tkv), 0)
            f_blk = jnp.where(rows < n_real, f_blk, -jnp.inf)

        # torch F.softmax(f, dim=1): normalize each column over the fully-resident query
        # axis, so per-tile column max/sum are complete (no online carry needed).
        m = jnp.max(f_blk, axis=0, keepdims=True)                                # (1, TKV)
        if use_bf16_exp:
            e = jnp.exp((f_blk - m).astype(cdt))                                 # bf16 EUP
            s = jnp.sum(e.astype(jnp.float32), axis=0, keepdims=True)            # f32 sum
        else:
            e = jnp.exp(f_blk - m)                                               # f32 (v5e)
            s = jnp.sum(e, axis=0, keepdims=True)

        # Fold 1/s into g: y += e @ (g / s)  -- N*Ci multiplies instead of N*N.
        g_scaled = g * pl.reciprocal(s, approx=True).T                           # (TKV, Cip)
        if need_mask:
            # Padded key rows must not contribute anything to y.
            keys = kv * tkv + lax.broadcasted_iota(jnp.int32, (tkv, 1), 0)
            g_scaled = jnp.where(keys < n_real, g_scaled, 0.0)
        acc_s[...] += jnp.dot(e.astype(cdt), g_scaled.astype(cdt),
                              preferred_element_type=jnp.float32)                # (N, Cip)

        @pl.when(kv == n_kv - 1)
        def _():
            # W(y) back-projection + residual, lane-dense store.
            y = acc_s[...].astype(cdt)
            w_y = jnp.dot(y, ww_ref[...], preferred_element_type=jnp.float32) + bw_ref[...]
            o_ref[0] = (w_y + xq_ref[0].astype(jnp.float32)).astype(o_ref.dtype)

    return kernel


# ---------------------------------------------------------------------------- planning --

def _round_up(v, m):
    return ((v + m - 1) // m) * m


def _tpu_info():
    """Best-effort generation / VMEM-capacity detection (guarded; never raises)."""
    kind = ""
    try:
        kind = (jax.devices()[0].device_kind or "").lower()
    except Exception:
        pass
    vmem_cap = None
    try:
        vmem_cap = int(pltpu.get_tpu_info().vmem_capacity_bytes)
    except Exception:
        vmem_cap = None
    if not vmem_cap or vmem_cap <= 0:
        vmem_cap = (64 if "v7" in kind else 128) * 1024 * 1024
    # bf16 EUP only on v6e/v7x; keep f32 exp on v5e and older.
    use_bf16_exp = ("v6" in kind) or ("v7" in kind)
    return vmem_cap, use_bf16_exp


def _vmem_plan(n, c_pad, ci_pad, e_bytes, budget):
    """Pick (TKV, N_pad, single_buffer_x) so the estimated VMEM footprint fits `budget`."""
    n128 = max(128, _round_up(n, 128))
    wbytes = 16 * c_pad * ci_pad + 64 * 1024           # bf16 weights (2-buffered) + biases

    def est(n_pad, tkv, single_x):
        x_in = (1 if single_x else 2) * n_pad * c_pad * 4      # full-N x block
        out = 2 * n_pad * c_pad * 4                            # output block
        scratch = n_pad * ci_pad * 6                           # theta bf16 + acc f32
        temps = n_pad * tkv * (4 + e_bytes)                    # f_blk f32 + e
        temps += tkv * 2 * ci_pad * 4 + n_pad * ci_pad * 4     # pg + matmul result
        return x_in + out + scratch + temps + wbytes

    for single_x in (False, True):
        for tkv in (1024, 512, 256, 128):
            tkv_eff = min(tkv, n128)
            n_pad = _round_up(n128, tkv_eff)
            if est(n_pad, tkv_eff, single_x) <= budget:
                return tkv_eff, n_pad, single_x
    tkv_eff = min(128, n128)
    return tkv_eff, _round_up(n128, tkv_eff), True


# ----------------------------------------------------------------------------- wrapper --

def nonlocal_block_2d(x_nchw, params):
    """x_nchw: (B, C, H, W) float32.  params: dict of weights (see init_params)."""
    B, C, H, W = x_nchw.shape
    N = H * W
    Ci = params["w_theta"].shape[1]

    LANE = 128
    C_pad = max(LANE, _round_up(C, LANE))
    Ci_pad = max(LANE, _round_up(Ci, LANE))
    cdt = jnp.bfloat16

    vmem_cap, use_bf16_exp = _tpu_info()
    vmem_limit = int(min(vmem_cap * 3 // 4, 112 * 1024 * 1024))   # ~48 MiB v7x, ~96 MiB v5e/v6e
    budget = int(vmem_limit * 0.85)                               # leave compiler headroom
    e_bytes = 2 if use_bf16_exp else 4
    TKV, N_pad, single_x = _vmem_plan(N, C_pad, Ci_pad, e_bytes, budget)
    num_kv = N_pad // TKV

    # NCHW -> (B, N, C); zero-pad channels (lane-dense) and spatial rows (key tiling).
    x_flat = jnp.transpose(x_nchw, (0, 2, 3, 1)).reshape(B, N, C)
    x_p = jnp.pad(x_flat, ((0, 0), (0, N_pad - N), (0, C_pad - C)))

    def pad2(a, r, c):
        return jnp.pad(a, ((0, r - a.shape[0]), (0, c - a.shape[1])))

    # Weights pre-cast to bf16 for the MXU; biases stay f32 (added post-matmul).
    w_theta = pad2(params["w_theta"], C_pad, Ci_pad).astype(cdt)
    b_theta = pad2(params["b_theta"], 1, Ci_pad)
    w_pg = jnp.concatenate([pad2(params["w_phi"], C_pad, Ci_pad),
                            pad2(params["w_g"], C_pad, Ci_pad)], axis=1).astype(cdt)
    b_pg = jnp.concatenate([pad2(params["b_phi"], 1, Ci_pad),
                            pad2(params["b_g"], 1, Ci_pad)], axis=1)
    w_w = pad2(params["w_w"], Ci_pad, C_pad).astype(cdt)
    b_w = pad2(params["b_w"], 1, C_pad)

    const = lambda shape: pl.BlockSpec(shape, lambda b, kv: (0,) * len(shape))

    # The x block index only changes with b, so double-buffering only buys cross-batch
    # prefetch; drop to single-buffering when VMEM is tight (v7x at large N).
    if single_x:
        xq_spec = pl.BlockSpec((1, N_pad, C_pad), lambda b, kv: (b, 0, 0),
                               pipeline_mode=pl.Buffered(1))
    else:
        xq_spec = pl.BlockSpec((1, N_pad, C_pad), lambda b, kv: (b, 0, 0))

    kernel = _make_kernel(N, N_pad, TKV, Ci_pad, use_bf16_exp)

    cost = pl.CostEstimate(
        flops=int(B * (4 * N_pad * N_pad * Ci_pad + 8 * N_pad * C_pad * Ci_pad)),
        transcendentals=int(B * N_pad * N_pad),
        bytes_accessed=int(2 * B * N_pad * C_pad * 4))

    z_p = pl.pallas_call(
        kernel,
        out_shape=jax.ShapeDtypeStruct((B, N_pad, C_pad), x_nchw.dtype),
        grid_spec=pltpu.PrefetchScalarGridSpec(
            num_scalar_prefetch=0,
            grid=(B, num_kv),                        # reduction (key-tile) axis last
            in_specs=[
                xq_spec,                                              # x: query/key/residual
                const((C_pad, Ci_pad)), const((1, Ci_pad)),           # theta weight / bias
                const((C_pad, 2 * Ci_pad)), const((1, 2 * Ci_pad)),   # fused phi|g weight / bias
                const((Ci_pad, C_pad)), const((1, C_pad)),            # W weight / bias
            ],
            # NOTE: written only on the last kv step; index map is constant over kv
            # (revisited block) — do not reorder the grid axes.
            out_specs=pl.BlockSpec((1, N_pad, C_pad), lambda b, kv: (b, 0, 0)),
            scratch_shapes=[
                pltpu.VMEM((N_pad, Ci_pad), cdt),          # theta_x (once per batch)
                pltpu.VMEM((N_pad, Ci_pad), jnp.float32),  # y accumulator
            ],
        ),
        compiler_params=pltpu.CompilerParams(
            dimension_semantics=("parallel", "arbitrary"),
            vmem_limit_bytes=vmem_limit,
        ),
        cost_estimate=cost,
    )(x_p, w_theta, b_theta, w_pg, b_pg, w_w, b_w)

    # Drop spatial/channel padding, back to NCHW.
    z_flat = z_p[:, :N, :C]
    return jnp.transpose(z_flat.reshape(B, H, W, C), (0, 3, 1, 2))


# ------------------------------------------------------------------------ params / ref --

def init_params(key, in_channels, inter_channels):
    """Deterministic synthetic init.  Conv2d 1x1 weights (out,in,1,1) are stored
    pre-transposed as (in, out) so the kernel does x @ W directly."""
    ks = jax.random.split(key, 8)
    scale = 0.1
    p = {
        "w_g":     scale * jax.random.normal(ks[0], (in_channels, inter_channels), jnp.float32),
        "b_g":     scale * jax.random.normal(ks[1], (1, inter_channels), jnp.float32),
        "w_theta": scale * jax.random.normal(ks[2], (in_channels, inter_channels), jnp.float32),
        "b_theta": scale * jax.random.normal(ks[3], (1, inter_channels), jnp.float32),
        "w_phi":   scale * jax.random.normal(ks[4], (in_channels, inter_channels), jnp.float32),
        "b_phi":   scale * jax.random.normal(ks[5], (1, inter_channels), jnp.float32),
        # NOTE: the PyTorch module zero-inits W (so W_y == 0 and z == x).  We use nonzero
        # deterministic values so the W-projection + residual path is actually exercised.
        "w_w":     scale * jax.random.normal(ks[6], (inter_channels, in_channels), jnp.float32),
        "b_w":     scale * jax.random.normal(ks[7], (1, in_channels), jnp.float32),
    }
    return p


def nonlocal_block_2d_ref(x, p):
    """Pure-JAX f32 reference mirroring the PyTorch forward exactly (NCHW)."""
    B, C, H, W = x.shape
    N = H * W

    def conv1x1(xf, w, b):          # xf: (B, N, C), w: (C_in, C_out), b: (1, C_out)
        return jnp.einsum("bnc,cd->bnd", xf, w) + b

    x_flat = jnp.transpose(x, (0, 2, 3, 1)).reshape(B, N, C)
    g_x = conv1x1(x_flat, p["w_g"], p["b_g"])          # (B, N, Ci)
    theta_x = conv1x1(x_flat, p["w_theta"], p["b_theta"])
    phi_x = conv1x1(x_flat, p["w_phi"], p["b_phi"])
    f = jnp.einsum("bic,bjc->bij", theta_x, phi_x)     # (B, N, N)
    f_div_c = jax.nn.softmax(f, axis=1)                # torch softmax dim=1
    y = jnp.einsum("bij,bjc->bic", f_div_c, g_x)       # (B, N, Ci)
    w_y = conv1x1(y, p["w_w"], p["b_w"])               # (B, N, C)
    z_flat = w_y + x_flat
    return jnp.transpose(z_flat.reshape(B, H, W, C), (0, 3, 1, 2))


if __name__ == "__main__":
    key = jax.random.PRNGKey(0)
    k_x, k_p = jax.random.split(key)

    B, C, H, W = 2, 4, 16, 16
    inter_channels = 2

    x = jax.random.normal(k_x, (B, C, H, W), jnp.float32)
    params = init_params(k_p, C, inter_channels)

    z = nonlocal_block_2d(x, params)
    z = jax.block_until_ready(z)

    z_ref = nonlocal_block_2d_ref(x, params)
    assert z.shape == (B, C, H, W)
    # bf16 MXU inputs (+ bf16 exp on v6e/v7x) + approx reciprocal => ~1e-3-level differences.
    assert jnp.allclose(z, z_ref, atol=1e-2, rtol=1e-2), "mismatch vs pure-JAX reference"

    print("KERNEL_OK")
</pallas_src>

<mosaic_0001>
module attributes {stable_mosaic.version = 11 : i64} {
  func.func @kernel(%arg0: i32, %arg1: i32, %arg2: memref<1x256x128xf32, #tpu.memory_space<vmem>>, %arg3: memref<128x128xbf16, #tpu.memory_space<vmem>>, %arg4: memref<1x128xf32, #tpu.memory_space<vmem>>, %arg5: memref<128x256xbf16, #tpu.memory_space<vmem>>, %arg6: memref<1x256xf32, #tpu.memory_space<vmem>>, %arg7: memref<128x128xbf16, #tpu.memory_space<vmem>>, %arg8: memref<1x128xf32, #tpu.memory_space<vmem>>, %arg9: memref<1x256x128xf32, #tpu.memory_space<vmem>>, %arg10: memref<256x128xbf16, #tpu.memory_space<vmem>>, %arg11: memref<256x128xf32, #tpu.memory_space<vmem>>) attributes {dimension_semantics = [#tpu.dimension_semantics<parallel>, #tpu.dimension_semantics<arbitrary>], iteration_bounds = array<i64: 2, 1>, scalar_prefetch = 0 : i64, scratch_operands = 2 : i64, tpu.core_type = #tpu.core_type<tc>, window_params = [{transform_indices = @transform_0, window_bounds = array<i64: 1, 256, 128>}, {pipeline_mode = #tpu.pipeline_mode<synchronous>, transform_indices = @transform_1, window_bounds = array<i64: 128, 128>}, {pipeline_mode = #tpu.pipeline_mode<synchronous>, transform_indices = @transform_2, window_bounds = array<i64: 1, 128>}, {pipeline_mode = #tpu.pipeline_mode<synchronous>, transform_indices = @transform_3, window_bounds = array<i64: 128, 256>}, {pipeline_mode = #tpu.pipeline_mode<synchronous>, transform_indices = @transform_4, window_bounds = array<i64: 1, 256>}, {pipeline_mode = #tpu.pipeline_mode<synchronous>, transform_indices = @transform_5, window_bounds = array<i64: 128, 128>}, {pipeline_mode = #tpu.pipeline_mode<synchronous>, transform_indices = @transform_6, window_bounds = array<i64: 1, 128>}, {transform_indices = @transform_7, window_bounds = array<i64: 1, 256, 128>}]} {
    %c0_i32 = arith.constant 0 : i32
    %0 = arith.cmpi eq, %arg1, %c0_i32 : i32
    %1 = arith.extui %0 : i1 to i32
    %c0_i32_0 = arith.constant 0 : i32
    %2 = arith.cmpi ne, %1, %c0_i32_0 : i32
    scf.if %2 {
      %c0_18 = arith.constant 0 : index
      %c0_19 = arith.constant 0 : index
      %c0_20 = arith.constant 0 : index
      %39 = vector.load %arg2[%c0_18, %c0_19, %c0_20] : memref<1x256x128xf32, #tpu.memory_space<vmem>>, vector<1x256x128xf32>
      %40 = vector.shape_cast %39 : vector<1x256x128xf32> to vector<256x128xf32>
      %41 = arith.truncf %40 : vector<256x128xf32> to vector<256x128xbf16>
      %c0_21 = arith.constant 0 : index
      %c0_22 = arith.constant 0 : index
      %42 = vector.load %arg3[%c0_21, %c0_22] : memref<128x128xbf16, #tpu.memory_space<vmem>>, vector<128x128xbf16>
      %cst_23 = arith.constant dense<0.000000e+00> : vector<256x128xf32>
      %43 = tpu.matmul %41, %42, %cst_23 {dimension_numbers = #tpu.dot_dimension_numbers<[1], [0], [0], [1], [0, 0, 1, 1], [], []>} : vector<256x128xbf16>, vector<128x128xbf16>, vector<256x128xf32> -> vector<256x128xf32>
      %c0_24 = arith.constant 0 : index
      %c0_25 = arith.constant 0 : index
      %44 = vector.load %arg4[%c0_24, %c0_25] : memref<1x128xf32, #tpu.memory_space<vmem>>, vector<1x128xf32>
      %45 = vector.broadcast %44 : vector<1x128xf32> to vector<256x128xf32>
      %46 = arith.addf %43, %45 : vector<256x128xf32>
      %47 = arith.truncf %46 : vector<256x128xf32> to vector<256x128xbf16>
      %c0_26 = arith.constant 0 : index
      %c0_27 = arith.constant 0 : index
      %48 = vector.load %arg10[%c0_26, %c0_27] : memref<256x128xbf16, #tpu.memory_space<vmem>>, vector<256x128xbf16>
      tpu.vector_store %arg10[%c0_26, %c0_27], %47 {strides = array<i32>} : memref<256x128xbf16, #tpu.memory_space<vmem>>, vector<256x128xbf16>,
      %cst_28 = arith.constant 0.000000e+00 : f32
      %49 = vector.broadcast %cst_28 : f32 to vector<256x128xf32>
      %c0_29 = arith.constant 0 : index
      %c0_30 = arith.constant 0 : index
      %50 = vector.load %arg11[%c0_29, %c0_30] : memref<256x128xf32, #tpu.memory_space<vmem>>, vector<256x128xf32>
      tpu.vector_store %arg11[%c0_29, %c0_30], %49 {strides = array<i32>} : memref<256x128xf32, #tpu.memory_space<vmem>>, vector<256x128xf32>,
    } else {
    }
    %c256_i32 = arith.constant 256 : i32
    %3 = arith.muli %arg1, %c256_i32 : i32
    %4 = tpu.assume_multiple %3, 256 : i32
    %c0 = arith.constant 0 : index
    %5 = arith.index_cast %4 : i32 to index
    %c0_1 = arith.constant 0 : index
    %6 = vector.load %arg2[%c0, %5, %c0_1] : memref<1x256x128xf32, #tpu.memory_space<vmem>>, vector<1x256x128xf32>
    %7 = vector.shape_cast %6 : vector<1x256x128xf32> to vector<256x128xf32>
    %8 = arith.truncf %7 : vector<256x128xf32> to vector<256x128xbf16>
    %c0_2 = arith.constant 0 : index
    %c0_3 = arith.constant 0 : index
    %9 = vector.load %arg5[%c0_2, %c0_3] : memref<128x256xbf16, #tpu.memory_space<vmem>>, vector<128x256xbf16>
    %cst = arith.constant dense<0.000000e+00> : vector<256x256xf32>
    %10 = tpu.matmul %8, %9, %cst {dimension_numbers = #tpu.dot_dimension_numbers<[1], [0], [0], [1], [0, 0, 1, 1], [], []>} : vector<256x128xbf16>, vector<128x256xbf16>, vector<256x256xf32> -> vector<256x256xf32>
    %c0_4 = arith.constant 0 : index
    %c0_5 = arith.constant 0 : index
    %11 = vector.load %arg6[%c0_4, %c0_5] : memref<1x256xf32, #tpu.memory_space<vmem>>, vector<1x256xf32>
    %12 = vector.broadcast %11 : vector<1x256xf32> to vector<256x256xf32>
    %13 = arith.addf %10, %12 : vector<256x256xf32>
    %14 = vector.extract_strided_slice %13 {offsets = [0, 0], sizes = [256, 128], strides = [1, 1]} : vector<256x256xf32> to vector<256x128xf32>
    %15 = arith.truncf %14 : vector<256x128xf32> to vector<256x128xbf16>
    %16 = vector.extract_strided_slice %13 {offsets = [0, 128], sizes = [256, 128], strides = [1, 1]} : vector<256x256xf32> to vector<256x128xf32>
    %c0_6 = arith.constant 0 : index
    %c0_7 = arith.constant 0 : index
    %17 = vector.load %arg10[%c0_6, %c0_7] : memref<256x128xbf16, #tpu.memory_space<vmem>>, vector<256x128xbf16>
    %cst_8 = arith.constant dense<0.000000e+00> : vector<256x256xf32>
    %18 = tpu.matmul %17, %15, %cst_8 {dimension_numbers = #tpu.dot_dimension_numbers<[1], [1], [0], [0], [0, 0, 1, 0], [], []>} : vector<256x128xbf16>, vector<256x128xbf16>, vector<256x256xf32> -> vector<256x256xf32>
    %cst_9 = arith.constant dense<0xFF800000> : vector<256xf32>
    %19 = vector.multi_reduction <maximumf>, %18, %cst_9 [0] : vector<256x256xf32> to vector<256xf32>
    %20 = vector.shape_cast %19 : vector<256xf32> to vector<1x256xf32>
    %21 = vector.broadcast %20 : vector<1x256xf32> to vector<256x256xf32>
    %22 = arith.subf %18, %21 : vector<256x256xf32>
    %23 = math.exp %22 : vector<256x256xf32>
    %cst_10 = arith.constant dense<0.000000e+00> : vector<256xf32>
    %24 = vector.multi_reduction <add>, %23, %cst_10 [0] : vector<256x256xf32> to vector<256xf32>
    %25 = vector.shape_cast %24 : vector<256xf32> to vector<1x256xf32>
    %26 = tpu.reciprocal %25 {approx = true} : vector<1x256xf32> -> vector<1x256xf32>
    %27 = tpu.transpose %26, [1, 0] : vector<1x256xf32> -> vector<256x1xf32>
    %28 = vector.broadcast %27 : vector<256x1xf32> to vector<256x128xf32>
    %29 = arith.mulf %16, %28 : vector<256x128xf32>
    %c0_11 = arith.constant 0 : index
    %c0_12 = arith.constant 0 : index
    %30 = vector.load %arg11[%c0_11, %c0_12] : memref<256x128xf32, #tpu.memory_space<vmem>>, vector<256x128xf32>
    %31 = arith.truncf %23 : vector<256x256xf32> to vector<256x256xbf16>
    %32 = arith.truncf %29 : vector<256x128xf32> to vector<256x128xbf16>
    %cst_13 = arith.constant dense<0.000000e+00> : vector<256x128xf32>
    %33 = tpu.matmul %31, %32, %cst_13 {dimension_numbers = #tpu.dot_dimension_numbers<[1], [0], [0], [1], [0, 0, 1, 1], [], []>} : vector<256x256xbf16>, vector<256x128xbf16>, vector<256x128xf32> -> vector<256x128xf32>
    %34 = arith.addf %30, %33 : vector<256x128xf32>
    %c0_14 = arith.constant 0 : index
    %c0_15 = arith.constant 0 : index
    %35 = vector.load %arg11[%c0_14, %c0_15] : memref<256x128xf32, #tpu.memory_space<vmem>>, vector<256x128xf32>
    tpu.vector_store %arg11[%c0_14, %c0_15], %34 {strides = array<i32>} : memref<256x128xf32, #tpu.memory_space<vmem>>, vector<256x128xf32>,
    %c0_i32_16 = arith.constant 0 : i32
    %36 = arith.cmpi eq, %arg1, %c0_i32_16 : i32
    %37 = arith.extui %36 : i1 to i32
    %c0_i32_17 = arith.constant 0 : i32
    %38 = arith.cmpi ne, %37, %c0_i32_17 : i32
    scf.if %38 {
      %c0_18 = arith.constant 0 : index
      %c0_19 = arith.constant 0 : index
      %39 = vector.load %arg11[%c0_18, %c0_19] : memref<256x128xf32, #tpu.memory_space<vmem>>, vector<256x128xf32>
      %40 = arith.truncf %39 : vector<256x128xf32> to vector<256x128xbf16>
      %c0_20 = arith.constant 0 : index
      %c0_21 = arith.constant 0 : index
      %41 = vector.load %arg7[%c0_20, %c0_21] : memref<128x128xbf16, #tpu.memory_space<vmem>>, vector<128x128xbf16>
      %cst_22 = arith.constant dense<0.000000e+00> : vector<256x128xf32>
      %42 = tpu.matmul %40, %41, %cst_22 {dimension_numbers = #tpu.dot_dimension_numbers<[1], [0], [0], [1], [0, 0, 1, 1], [], []>} : vector<256x128xbf16>, vector<128x128xbf16>, vector<256x128xf32> -> vector<256x128xf32>
      %c0_23 = arith.constant 0 : index
      %c0_24 = arith.constant 0 : index
      %43 = vector.load %arg8[%c0_23, %c0_24] : memref<1x128xf32, #tpu.memory_space<vmem>>, vector<1x128xf32>
      %44 = vector.broadcast %43 : vector<1x128xf32> to vector<256x128xf32>
      %45 = arith.addf %42, %44 : vector<256x128xf32>
      %c0_25 = arith.constant 0 : index
      %c0_26 = arith.constant 0 : index
      %c0_27 = arith.constant 0 : index
      %46 = vector.load %arg2[%c0_25, %c0_26, %c0_27] : memref<1x256x128xf32, #tpu.memory_space<vmem>>, vector<1x256x128xf32>
      %47 = vector.shape_cast %46 : vector<1x256x128xf32> to vector<256x128xf32>
      %48 = arith.addf %45, %47 : vector<256x128xf32>
      %c0_28 = arith.constant 0 : index
      %c0_29 = arith.constant 0 : index
      %c0_30 = arith.constant 0 : index
      %49 = vector.load %arg9[%c0_28, %c0_29, %c0_30] : memref<1x256x128xf32, #tpu.memory_space<vmem>>, vector<1x256x128xf32>
      %50 = vector.shape_cast %49 : vector<1x256x128xf32> to vector<256x128xf32>
      %51 = vector.shape_cast %48 : vector<256x128xf32> to vector<1x256x128xf32>
      tpu.vector_store %arg9[%c0_28, %c0_29, %c0_30], %51 {strides = array<i32>} : memref<1x256x128xf32, #tpu.memory_space<vmem>>, vector<1x256x128xf32>,
    } else {
    }
    return
  }
  func.func @transform_0(%arg0: i32, %arg1: i32) -> (i32, i32, i32) {
    %c0_i32 = arith.constant 0 : i32
    %c0_i32_0 = arith.constant 0 : i32
    %c0_i32_1 = arith.constant 0 : i32
    return %arg0, %c0_i32, %c0_i32_0 : i32, i32, i32
  }
  func.func @transform_1(%arg0: i32, %arg1: i32) -> (i32, i32) {
    %c0_i32 = arith.constant 0 : i32
    %c0_i32_0 = arith.constant 0 : i32
    %c0_i32_1 = arith.constant 0 : i32
    return %c0_i32, %c0_i32_0 : i32, i32
  }
  func.func @transform_2(%arg0: i32, %arg1: i32) -> (i32, i32) {
    %c0_i32 = arith.constant 0 : i32
    %c0_i32_0 = arith.constant 0 : i32
    %c0_i32_1 = arith.constant 0 : i32
    return %c0_i32, %c0_i32_0 : i32, i32
  }
  func.func @transform_3(%arg0: i32, %arg1: i32) -> (i32, i32) {
    %c0_i32 = arith.constant 0 : i32
    %c0_i32_0 = arith.constant 0 : i32
    %c0_i32_1 = arith.constant 0 : i32
    return %c0_i32, %c0_i32_0 : i32, i32
  }
  func.func @transform_4(%arg0: i32, %arg1: i32) -> (i32, i32) {
    %c0_i32 = arith.constant 0 : i32
    %c0_i32_0 = arith.constant 0 : i32
    %c0_i32_1 = arith.constant 0 : i32
    return %c0_i32, %c0_i32_0 : i32, i32
  }
  func.func @transform_5(%arg0: i32, %arg1: i32) -> (i32, i32) {
    %c0_i32 = arith.constant 0 : i32
    %c0_i32_0 = arith.constant 0 : i32
    %c0_i32_1 = arith.constant 0 : i32
    return %c0_i32, %c0_i32_0 : i32, i32
  }
  func.func @transform_6(%arg0: i32, %arg1: i32) -> (i32, i32) {
    %c0_i32 = arith.constant 0 : i32
    %c0_i32_0 = arith.constant 0 : i32
    %c0_i32_1 = arith.constant 0 : i32
    return %c0_i32, %c0_i32_0 : i32, i32
  }
  func.func @transform_7(%arg0: i32, %arg1: i32) -> (i32, i32, i32) {
    %c0_i32 = arith.constant 0 : i32
    %c0_i32_0 = arith.constant 0 : i32
    %c0_i32_1 = arith.constant 0 : i32
    return %arg0, %c0_i32, %c0_i32_0 : i32, i32, i32
  }
}

</mosaic_0001>

<bundles_post_ra>
// kernel: tpu_custom_call.1
= control target key start
LH: loop header
LB: loop body
LE: loop exit
PB: predicated region body
PF: predicated region fallthrough
CT: control target
= control target key end

     0   :  { %s5409_s0 = inlined_call_operand.hbm [shape: f32[2,256,128], index: 0, kind: input, shape index: {}]   ;;  %s5410_s1 = inlined_call_operand.hbm [shape: bf16[128,128], index: 1, kind: input, shape index: {}]   ;;  %s5411_s2 = inlined_call_operand.hbm [shape: f32[1,128], index: 2, kind: input, shape index: {}]   ;;  %s5412_s3 = inlined_call_operand.hbm [shape: bf16[128,256], index: 3, kind: input, shape index: {}]   ;;  %s5413_s4 = inlined_call_operand.hbm [shape: f32[1,256], index: 4, kind: input, shape index: {}]   ;;  %s5414_s5 = inlined_call_operand.hbm [shape: bf16[128,128], index: 5, kind: input, shape index: {}]   ;;  %s5415_s6 = inlined_call_operand.hbm [shape: f32[1,128], index: 6, kind: input, shape index: {}]   ;;  %s5416_s7 = inlined_call_operand.hbm [shape: f32[2,256,128], index: 7, kind: output, shape index: {}]  }
   0x1   :  { %5494 = sst [smem:[#allocation89_spill]] %s5410_s1 }
   0x2   :  { %12 = vsyncpa [#allocation5], 0 }
   0x3   :  { %14 = vsyncpa [#allocation5 + $0x1], 0 }
   0x4   :  { %15 = vsyncpa [#allocation8], 0 }
   0x5   :  { %16 = vsyncpa [#allocation11], 0 }
   0x6   :  { %17 = vsyncpa [#allocation14], 0 }
   0x7   :  { %18 = vsyncpa [#allocation6], 0 }
   0x8   :  { %20 = vsyncpa [#allocation6 + $0x1], 0  ;;  %s3773_s24 = smov 0   ;;  %s3775_s25 = smov 0  }
   0x9   :  { %s3777_s26 = smov 0   ;;  %s3779_s27 = smov 0  }
   0xa   :  { %s3781_s28 = smov 0   ;;  %s3783_s29 = smov 0  }
   0xb LB: > { %s5417_s30 = sadd.s32 4294967295, %s3716_s29   ;;  %p2753_p0 = scmp.ge.s32.totalorder %s3716_s29, 1  ;;  %s3716_s29 = sphi %s3783_s29, %s26_s29   ;;  %s3712_s28 = sphi %s3781_s28, %s5778_s28   ;;  %s3708_s27 = sphi %s3779_s27, %s5777_s27   ;;  %s3704_s26 = sphi %s3777_s26, %s5776_s26   ;;  %s3700_s25 = sphi %s3775_s25, %s5775_s25   ;;  %s3696_s24 = sphi %s3773_s24, %s5774_s24  }
   0xc   : > { %p3807_p1 = scmp.eq.s32.totalorder %s5417_s30, 0  ;;  %p221_p2 = scmp.lt.s32.totalorder %s3716_s29, 3 }
   0xd   : > { %s3718_s10 = smov [#allocation7]   ;;  %s3719_s13 = smov [#allocation10]  }
   0xe   : > { %s5495_s8 = scalar_select %p3807_p1, 1, 0 }
   0xf   : > { %p3812_p3 = pnand %p2753_p0, %p221_p2  ;;  %s233_s11 = sshll.u32 %s3718_s10, 4  ;;  %s3816_s11 = int_to_ptr.vmem [resolvable:$true] %s233_s11 }
  0x10   : > { %s257_s14 = sshll.u32 %s3719_s13, 4  ;;  %s5498_s1 = sld [smem:[#allocation89_spill]]  ;;  %s3827_s14 = int_to_ptr.vmem [resolvable:$true] %s257_s14 }
  0x11   : > { %s5496_s9 = scalar_select %p3812_p3, 1, 0 }
  0x12   : > { %p3146_p4 = pneg %p3812_p3 }
  0x14   : > { %p3823_p6 = pnand %p3146_p4, %p3807_p1 }
  0x16   : > { %s3424_s17 = scalar_lea.hbm %s5498_s1, 1024  ;;  %p3837_p8 = pneg %p3823_p6 }
  0x17   : > { %p3425_p7 = scmp.ne.s32.totalorder %s5498_s1, %s3424_s17  ;;  %p3431_p11 = scmp.lt.u32.totalorder %s3424_s17, %s5498_s1 }
  0x19   : > { %p3427_p9 = pnand %p3837_p8, %p3425_p7 }
  0x1b   : > { %p3428_p10 = pneg %p3427_p9 }
  0x1d   : > { %p3433_p12 = pnand %p3431_p11, %p3428_p10 }
  0x1f   : > { %3436 = shalt.err (!%p3433_p12)
}
  0x20   : > { %s3437_s23 = scalar_lea.vmem %s3816_s11, 1024  ;;  %p3445_p4 = scmp.lt.s32.totalorder %s3816_s11, %s3816_s11 }
  0x21   : > { %p3438_p13 = scmp.ne.s32.totalorder %s3816_s11, %s3437_s23  ;;  %p3446_p5 = scmp.lt.s32.totalorder %s3437_s23, %s3437_s23 }
  0x23   : > { %p3440_p0 = pnand %p3438_p13, %p3837_p8  ;;  %p3447_p7 = por %p3446_p5, %p3445_p4 }
  0x25   : > { %p3441_p2 = pneg %p3440_p0 }
  0x27   : > { %p3448_p9 = pnand %p3447_p7, %p3441_p2 }
  0x29   : > { %3451 = shalt.err (!%p3448_p9)
}
  0x2a   : > { %s5418_s10 = smov 64   ;;  %s5419_s13 = smov 4  }
  0x2b   : > { %3149 = dma.hbm_to_vmem [thread:$0]  (!%p3823_p6), %s5498_s1, 1024, %s3816_s11, [#allocation8], %s5418_s10, %s5418_s10, %s5419_s13  }
  0x2c   : > { %s3452_s19 = scalar_lea.hbm %s5412_s3, 2048 }
  0x2d   : > { %p3453_p5 = scmp.ne.s32.totalorder %s5412_s3, %s3452_s19  ;;  %p3459_p12 = scmp.lt.u32.totalorder %s3452_s19, %s5412_s3 }
  0x2f   : > { %p3455_p10 = pnand %p3453_p5, %p3837_p8 }
  0x31   : > { %p3456_p11 = pneg %p3455_p10 }
  0x33   : > { %p3461_p13 = pnand %p3459_p12, %p3456_p11 }
  0x35   : > { %3464 = shalt.err (!%p3461_p13)
}
  0x36   : > { %s3465_s11 = scalar_lea.vmem %s3827_s14, 2048  ;;  %p3473_p7 = scmp.lt.s32.totalorder %s3827_s14, %s3827_s14 }
  0x37   : > { %p3466_p0 = scmp.ne.s32.totalorder %s3827_s14, %s3465_s11  ;;  %p3474_p9 = scmp.lt.s32.totalorder %s3465_s11, %s3465_s11 }
  0x39   : > { %p3468_p2 = pnand %p3466_p0, %p3837_p8  ;;  %p3475_p5 = por %p3474_p9, %p3473_p7 }
  0x3b   : > { %p3469_p4 = pneg %p3468_p2 }
  0x3d   : > { %p3476_p10 = pnand %p3475_p5, %p3469_p4 }
  0x3f   : > { %3479 = shalt.err (!%p3476_p10)
}
  0x40   : > { %s5423_s15 = smov 128   ;;  %s5424_s30 = smov 8  }
  0x41   : > { %3155 = dma.hbm_to_vmem [thread:$0]  (!%p3823_p6), %s5412_s3, 2048, %s3827_s14, [#allocation11], %s5423_s15, %s5423_s15, %s5424_s30  }
  0x42   : > { %s3724_s18 = smov [#allocation13]   ;;  %s3725_s21 = smov [#allocation9]  }
  0x43   : > { %s281_s19 = sshll.u32 %s3724_s18, 4  ;;  %s247_s22 = sshll.u32 %s3725_s21, 4  ;;  %s282_s19 = int_to_ptr.vmem [resolvable:$true] %s281_s19  ;;  %s3887_s22 = int_to_ptr.vmem [resolvable:$true] %s247_s22 }
  0x44   : > { %s3480_s10 = scalar_lea.hbm %s5414_s5, 1024 }
  0x45   : > { %p3481_p11 = scmp.ne.s32.totalorder %s5414_s5, %s3480_s10  ;;  %p3487_p0 = scmp.lt.u32.totalorder %s3480_s10, %s5414_s5 }
  0x47   : > { %p3483_p12 = pnand %p3481_p11, %p3837_p8 }
  0x49   : > { %p3484_p13 = pneg %p3483_p12 }
  0x4b   : > { %p3489_p2 = pnand %p3487_p0, %p3484_p13 }
  0x4d   : > { %3492 = shalt.err (!%p3489_p2)
}
  0x4e   : > { %s3493_s17 = scalar_lea.vmem %s282_s19, 1024  ;;  %p3501_p5 = scmp.lt.s32.totalorder %s282_s19, %s282_s19 }
  0x4f   : > { %p3494_p4 = scmp.ne.s32.totalorder %s282_s19, %s3493_s17  ;;  %p3502_p10 = scmp.lt.s32.totalorder %s3493_s17, %s3493_s17 }
  0x51   : > { %p3496_p7 = pnand %p3494_p4, %p3837_p8  ;;  %p3503_p3 = por %p3502_p10, %p3501_p5 }
  0x53   : > { %p3497_p9 = pneg %p3496_p7 }
  0x55   : > { %p3504_p1 = pnand %p3503_p3, %p3497_p9 }
  0x57   : > { %3507 = shalt.err (!%p3504_p1)
}
  0x58   : > { %s5500_s1 = smov 4   ;;  %s5501_s13 = smov 64  }
  0x59   : > { %3161 = dma.hbm_to_vmem [thread:$0]  (!%p3823_p6), %s5414_s5, 1024, %s282_s19, [#allocation14], %s5501_s13, %s5501_s13, %s5500_s1  }
  0x5a   : > { %s3508_s11 = scalar_lea.hbm %s5411_s2, 16 }
  0x5b   : > { %p3509_p11 = scmp.ne.s32.totalorder %s5411_s2, %s3508_s11  ;;  %p3515_p12 = scmp.lt.u32.totalorder %s3508_s11, %s5411_s2 }
  0x5d   : > { %p3511_p1 = pnand %p3509_p11, %p3837_p8 }
  0x5f   : > { %p3512_p3 = pneg %p3511_p1 }
  0x61   : > { %p3517_p13 = pnand %p3515_p12, %p3512_p3 }
  0x63   : > { %3520 = shalt.err (!%p3517_p13)
}
  0x64   : > { %s3521_s19 = scalar_lea.vmem %s3887_s22, 16  ;;  %s3528_s1 = scalar_lea.vmem %s3887_s22, 32 }
  0x65   : > { %p3522_p0 = scmp.ne.s32.totalorder %s3887_s22, %s3521_s19  ;;  %p3529_p7 = scmp.lt.s32.totalorder %s3887_s22, %s3887_s22 }
  0x66   : > { %p3530_p9 = scmp.lt.s32.totalorder %s3528_s1, %s3521_s19 }
  0x67   : > { %p3524_p2 = pnand %p3522_p0, %p3837_p8 }
  0x68   : > { %p3531_p5 = por %p3530_p9, %p3529_p7 }
  0x69   : > { %p3525_p4 = pneg %p3524_p2 }
  0x6b   : > { %p3532_p10 = pnand %p3531_p5, %p3525_p4 }
  0x6d   : > { %3535 = shalt.err (!%p3532_p10)
}
  0x6e   : > { %3152 = dma.hbm_to_vmem [thread:$0]  (!%p3823_p6), %s5411_s2, 16, %s3887_s22, [#allocation8]  }
  0x6f   : > { %s3726_s18 = smov [#allocation12]   ;;  %s3727_s21 = smov [#allocation15]  }
  0x70   : > { %s271_s10 = sshll.u32 %s3726_s18, 4  ;;  %s295_s23 = sshll.u32 %s3727_s21, 4  ;;  %s272_s10 = int_to_ptr.vmem [resolvable:$true] %s271_s10  ;;  %s3934_s23 = int_to_ptr.vmem [resolvable:$true] %s295_s23 }
  0x71   : > { %s3536_s14 = scalar_lea.hbm %s5413_s4, 32 }
  0x72   : > { %p3537_p11 = scmp.ne.s32.totalorder %s5413_s4, %s3536_s14  ;;  %p3543_p12 = scmp.lt.u32.totalorder %s3536_s14, %s5413_s4 }
  0x74   : > { %p3539_p1 = pnand %p3537_p11, %p3837_p8 }
  0x76   : > { %p3540_p3 = pneg %p3539_p1 }
  0x78   : > { %p3545_p13 = pnand %p3543_p12, %p3540_p3 }
  0x7a   : > { %3548 = shalt.err (!%p3545_p13)
}
  0x7b   : > { %s3549_s15 = scalar_lea.vmem %s272_s10, 32  ;;  %p3557_p7 = scmp.lt.s32.totalorder %s272_s10, %s272_s10 }
  0x7c   : > { %p3550_p0 = scmp.ne.s32.totalorder %s272_s10, %s3549_s15  ;;  %p3558_p9 = scmp.lt.s32.totalorder %s3549_s15, %s3549_s15 }
  0x7e   : > { %p3552_p2 = pnand %p3550_p0, %p3837_p8  ;;  %p3559_p5 = por %p3558_p9, %p3557_p7 }
  0x80   : > { %p3553_p4 = pneg %p3552_p2 }
  0x82   : > { %p3560_p10 = pnand %p3559_p5, %p3553_p4 }
  0x84   : > { %3563 = shalt.err (!%p3560_p10)
}
  0x85   : > { %3158 = dma.hbm_to_vmem [thread:$0]  (!%p3823_p6), %s5413_s4, 32, %s272_s10, [#allocation11]  }
  0x86   : > { %s3564_s16 = scalar_lea.hbm %s5415_s6, 16 }
  0x87   : > { %p3565_p11 = scmp.ne.s32.totalorder %s5415_s6, %s3564_s16  ;;  %p3571_p12 = scmp.lt.u32.totalorder %s3564_s16, %s5415_s6 }
  0x89   : > { %p3567_p1 = pnand %p3565_p11, %p3837_p8 }
  0x8b   : > { %p3568_p3 = pneg %p3567_p1 }
  0x8d   : > { %p3573_p13 = pnand %p3571_p12, %p3568_p3 }
  0x8f   : > { %3576 = shalt.err (!%p3573_p13)
}
  0x90   : > { %s3577_s10 = scalar_lea.vmem %s3934_s23, 16  ;;  %s3584_s22 = scalar_lea.vmem %s3934_s23, 32 }
  0x91   : > { %p3578_p0 = scmp.ne.s32.totalorder %s3934_s23, %s3577_s10  ;;  %p3585_p7 = scmp.lt.s32.totalorder %s3934_s23, %s3934_s23 }
  0x92   : > { %p3586_p9 = scmp.lt.s32.totalorder %s3584_s22, %s3577_s10 }
  0x93   : > { %p3580_p2 = pnand %p3578_p0, %p3837_p8 }
  0x94   : > { %p3587_p5 = por %p3586_p9, %p3585_p7 }
  0x95   : > { %p3581_p4 = pneg %p3580_p2 }
  0x97   : > { %p3588_p10 = pnand %p3587_p5, %p3581_p4 }
  0x99   : > { %3591 = shalt.err (!%p3588_p10)
}
  0x9a   : > { %3164 = dma.hbm_to_vmem [thread:$0]  (!%p3823_p6), %s5415_s6, 16, %s3934_s23, [#allocation14]  }
  0x9b   : > { %s2752_s20 = sadd.s32 4294967294, %s3716_s29   ;;  %s38_s18 = sadd.s32 1, %s3712_s28 }
  0x9c   : > { %p40_p8 = scmp.ge.s32.totalorder %s38_s18, 2  ;;  %s45_s12 = sadd.s32 1, %s3704_s26 }
  0x9d   : > { %p52_p11 = scmp.ne.s32.totalorder %s3704_s26, %s3700_s25  ;;  %p53_p1 = scmp.eq.s32.totalorder %s3716_s29, 0 }
  0x9e   : > { %s5780_s18 = smov (%p40_p8, %s38_s18), 0  ;;  %p58_p12 = scmp.ne.s32.totalorder %s3700_s25, %s3696_s24 }
  0x9f   : > { %p3986_p3 = por %p53_p1, %p52_p11  ;;  %s42_s23 = ssub.s32 %s3712_s28, %s5780_s18 }
  0xa0   : > { %s5503_s11 = sadd.s32 4294967295, %s3716_s29   ;;  %p43_p13 = scmp.eq.s32.totalorder %s42_s23, 0 }
  0xa1   : > { %p208_p6 = scmp.eq.s32.totalorder %s5503_s11, 1  ;;  %p5504_p0 = scmp.ne.s32.totalorder %s5495_s8, 0 }
  0xa2   : > { %p214_p7 = scmp.eq.s32.totalorder %s2752_s20, 1  ;;  %p3179_p5 = scmp.lt.s32.totalorder %s3716_s29, 2 }
  0xa3   : > { %p3998_p2 = por %p5504_p0, %p58_p12  ;;  %p4002_p4 = por %p208_p6, %p52_p11 }
  0xa4   : > { %s4007_s17 = scalar_select %p43_p13, %s3704_s26, %s45_s12  }
  0xa5   : > { %s5506_s14 = scalar_select %p4002_p4, 1, 0 }
  0xa6   : > { %p4009_p9 = por %p214_p7, %p58_p12  ;;  %s306_s1 = sand.u32 1, %s3704_s26  }
  0xa7   : > { %s2812_s10 = sshll.u32 %s3712_s28, 12  ;;  %s2761_s22 = sshll.u32 %s306_s1, 8 }
  0xa8   : > { %s5507_s19 = scalar_select %p4009_p9, 1, 0 }
  0xa9   : > { %s4019_s23 = scalar_lea.hbm %s5409_s0, %s2812_s10  ;;  %s310_s20 = scalar_lea.vmem [#allocation4], %s2761_s22 }
  0xaa   : > { %s317_s12 = sshll.u32 %s310_s20, 4  ;;  %p4023_p10 = pnand %p3179_p5, %p3986_p3  ;;  %s4027_s12 = int_to_ptr.vmem [resolvable:$true] %s317_s12 }
  0xab   : > { %s4029_s30 = scalar_lea.sflag [#allocation5], %s306_s1  ;;  %s3592_s15 = scalar_lea.hbm %s4019_s23, 4096 }
  0xac   : > { %p3593_p8 = scmp.ne.s32.totalorder %s4019_s23, %s3592_s15  ;;  %p3594_p11 = pneg %p4023_p10 }
  0xad   : > { %s3597_s22 = scalar_lea.hbm %s5409_s0, 8192  ;;  %p3598_p3 = scmp.lt.u32.totalorder %s4019_s23, %s5409_s0 }
  0xae   : > { %p3595_p1 = pnand %p3594_p11, %p3593_p8  ;;  %p3599_p6 = scmp.lt.u32.totalorder %s3597_s22, %s3592_s15 }
  0xaf   : > { %p3601_p0 = scmp.lt.u32.totalorder %s3592_s15, %s4019_s23 }
  0xb0   : > { %p3596_p12 = pneg %p3595_p1  ;;  %p3600_p13 = por %p3599_p6, %p3598_p3 }
  0xb2   : > { %p3602_p7 = por %p3601_p0, %p3600_p13 }
  0xb4   : > { %p3603_p5 = pnand %p3602_p7, %p3596_p12 }
  0xb6   : > { %3606 = shalt.err (!%p3603_p5)
}
  0xb7   : > { %s3607_s1 = scalar_lea.vmem %s4027_s12, 4096  ;;  %s3728_s10 = smov [#allocation4]  }
  0xb8   : > { %p3608_p8 = scmp.ne.s32.totalorder %s4027_s12, %s3607_s1  ;;  %s3612_s21 = sshll.u32 %s3728_s10, 4  ;;  %s3613_s21 = int_to_ptr.vmem [resolvable:$false] %s3612_s21 }
  0xb9   : > { %s3614_s13 = scalar_lea.vmem %s3613_s21, 8192  ;;  %p3615_p4 = scmp.lt.s32.totalorder %s4027_s12, %s3613_s21 }
  0xba   : > { %p3610_p1 = pnand %p3608_p8, %p3594_p11  ;;  %p3616_p3 = scmp.lt.s32.totalorder %s3614_s13, %s3607_s1 }
  0xbc   : > { %p3611_p9 = pneg %p3610_p1  ;;  %p3617_p6 = por %p3616_p3, %p3615_p4 }
  0xbe   : > { %p3618_p13 = pnand %p3617_p6, %p3611_p9 }
  0xc0   : > { %3621 = shalt.err (!%p3618_p13)
}
  0xc1   : > { %s5509_s15 = smov 8   ;;  %s5510_s22 = smov 128  }
  0xc2   : > { %3168 = dma.hbm_to_vmem [thread:$0]  (!%p4023_p10), %s4019_s23, 4096, %s4027_s12, %s4029_s30, %s5510_s22, %s5510_s22, %s5509_s15  }
  0xc3   : > { %p5511_p11 = scmp.ne.s32.totalorder %s5496_s9, 0 }
  0xc5   : > { %329 = sbr.rel (%p5511_p11) target bundleno = 2099 (0x833), region = 48 }
  0xcc   : > { %s4063_s20 = sand.u32 1, %s3700_s25  }
  0xcd   : > { %s2765_s1 = sshll.u32 %s4063_s20, 8  ;;  %s332_s10 = scalar_lea.sflag [#allocation5], %s4063_s20 }
  0xce   : > { %s4069_s11 = scalar_lea.vmem [#allocation4], %s2765_s1 }
  0xcf   : > { %3675 = dma.done.wait (%p3998_p2), %s332_s10, 4096  }
  0xd0   : > { %3677 = vsyncadd (%p3998_p2), %s332_s10, 4294963200  ;;  %p5512_p4 = scmp.ne.s32.totalorder %s5495_s8, 0 }
  0xd2   : > { %3679 = dma.done.wait (%p5512_p4), [#allocation8], 1040  }
  0xd3   : > { %3681 = vsyncadd (%p5512_p4), [#allocation8], 4294966256 }
  0xd4   : > { %3683 = dma.done.wait (%p5512_p4), [#allocation11], 2080  }
  0xd5   : > { %3685 = vsyncadd (%p5512_p4), [#allocation11], 4294965216 }
  0xd6   : > { %3687 = dma.done.wait (%p5512_p4), [#allocation14], 1040  }
  0xd7   : > { %3689 = vsyncadd (%p5512_p4), [#allocation14], 4294966256  ;;  %v5426_v0 = vmov 0   ;;  %v3251_v1 = vld [vmem:[#allocation10 + $0x4] ss:$8 sps:$4 sm:$0xff]   ;;  %v3278_v23 = vld [vmem:[#allocation7 + $0x18] sm:$0xff]  }
  0xd8   : > { %929 = vmatprep.mubr.bf16.mxu1 %v5426_v0  ;;  %3249 = vset.pattern.permute.xlu1 %v5426_v0  ;;  %v3253_v2 = vld [vmem:[#allocation10] ss:$8 sps:$4 sm:$0xff]   ;;  %v3254_v3 = vld [vmem:[#allocation10 + $0x14] ss:$8 sps:$4 sm:$0xff]   ;;  %v3256_v4 = vld [vmem:[#allocation10 + $0x10] ss:$8 sps:$4 sm:$0xff]  }
  0xd9   : > { %897 = vmatprep.subr.bf16.mxu1 %v3251_v1  ;;  %v3257_v5 = vld [vmem:[#allocation10 + $0x24] ss:$8 sps:$4 sm:$0xff]   ;;  %v3259_v6 = vld [vmem:[#allocation10 + $0x20] ss:$8 sps:$4 sm:$0xff]   ;;  %v3260_v7 = vld [vmem:[#allocation10 + $0x34] ss:$8 sps:$4 sm:$0xff]  }
  0xda   : > { %898 = vmatpush1.bf16.msra.mxu1 %v3253_v2  ;;  %v741_v8 = vld [vmem:[%s4069_s11] sm:$0xff]  ;;  %v3262_v9 = vld [vmem:[#allocation10 + $0x30] ss:$8 sps:$4 sm:$0xff]   ;;  %v742_v10 = vld [vmem:[%s4069_s11 + $0x8] sm:$0xff]  ;;  %s5263_s8 = scalar_lea.vmem [#allocation16], %s2765_s1  ;;  %s2813_s9 = sshll.u32 %s3708_s27, 12 }
  0xdb   : > { %899 = vmatprep.subr.bf16.mxu1 %v3254_v3  ;;  %v3263_v11 = vld [vmem:[#allocation10 + $0x44] ss:$8 sps:$4 sm:$0xff]   ;;  %v773_v12 = vpack.c.bf16 %v742_v10, %v741_v8  ;;  %v3265_v13 = vld [vmem:[#allocation10 + $0x40] ss:$8 sps:$4 sm:$0xff]   ;;  %v3266_v14 = vld [vmem:[#allocation10 + $0x54] ss:$8 sps:$4 sm:$0xff]   ;;  %v807_v10 = vlaneseq  ;;  %s5355_s12 = scalar_lea.hbm %s5416_s7, %s2813_s9 }
  0xdc   : > { %v3268_v15 = vld [vmem:[#allocation10 + $0x50] ss:$8 sps:$4 sm:$0xff]   ;;  %v3275_v16 = vld [vmem:[#allocation7] sm:$0xff]   ;;  %v3276_v18 = vld [vmem:[#allocation7 + $0x8] sm:$0xff]   ;;  %s2611_s30 = sshll.u32 %s5263_s8, 4  ;;  %s2598_s27 = scalar_lea.sflag [#allocation6], %s4063_s20  ;;  %s5357_s30 = int_to_ptr.vmem [resolvable:$true] %s2611_s30 }
  0xdd   : > { %3038 = vmatprep.mubr.bf16.mxu0 %v773_v12  ;;  %v3269_v17 = vld [vmem:[#allocation10 + $0x64] ss:$8 sps:$4 sm:$0xff]   ;;  %3022 = vmatprep.subr.bf16.mxu0 %v3275_v16  ;;  %v3271_v19 = vld [vmem:[#allocation10 + $0x60] ss:$8 sps:$4 sm:$0xff]   ;;  %v3272_v21 = vld [vmem:[#allocation10 + $0x74] ss:$8 sps:$4 sm:$0xff]  }
  0xde   : > { %900 = vmatpush1.bf16.msra.mxu1 %v3256_v4  ;;  %3023 = vmatpush3.bf16.msra.mxu0 %v3275_v16  ;;  %v3277_v20 = vld [vmem:[#allocation7 + $0x10] sm:$0xff]   ;;  %v3279_v24 = vld [vmem:[#allocation7 + $0x20] sm:$0xff]   ;;  %v744_v26 = vld [vmem:[%s4069_s11 + $0x18] sm:$0xff]  ;;  %s3622_s21 = scalar_lea.vmem %s5357_s30, 4096  ;;  %p5771_p9 = scmp.ne.s32.totalorder %s5506_s14, 0 }
  0xdf   : > { %901 = vmatprep.subr.bf16.mxu1 %v3257_v5  ;;  %3024 = vmatprep.subr.bf16.mxu0 %v3276_v18  ;;  %v3274_v22 = vld [vmem:[#allocation10 + $0x70] ss:$8 sps:$4 sm:$0xff]   ;;  %v3280_v27 = vld [vmem:[#allocation7 + $0x28] sm:$0xff]   ;;  %v745_v30 = vld [vmem:[%s4069_s11 + $0x20] sm:$0xff]  ;;  %p3623_p2 = scmp.ne.s32.totalorder %s5357_s30, %s3622_s21  ;;  %s3730_s13 = smov [#allocation16]  }
  0xe0   : > { %v743_v25 = vld [vmem:[%s4069_s11 + $0x10] sm:$0xff]  ;;  %v746_v31 = vld [vmem:[%s4069_s11 + $0x28] sm:$0xff]  ;;  %v3282_v32 = vld [vmem:[#allocation7 + $0x38] sm:$0xff]   ;;  %s3626_s15 = sshll.u32 %s3730_s13, 4  ;;  %s3627_s15 = int_to_ptr.vmem [resolvable:$false] %s3626_s15 }
  0xe1   : > { %v774_v28 = vpack.c.bf16 %v744_v26, %v743_v25  ;;  %v3281_v29 = vld [vmem:[#allocation7 + $0x30] sm:$0xff]   ;;  %v775_v33 = vpack.c.bf16 %v746_v31, %v745_v30  ;;  %v748_v35 = vld [vmem:[%s4069_s11 + $0x38] sm:$0xff]  ;;  %v749_v37 = vld [vmem:[%s4069_s11 + $0x40] sm:$0xff]  ;;  %p3624_p10 = pnand %p3623_p2, %p5771_p9  ;;  %s3628_s22 = scalar_lea.vmem %s3627_s15, 8192 }
  0xe2   : > { %902 = vmatpush1.bf16.msra.mxu1 %v3259_v6  ;;  %3025 = vmatpush3.bf16.msra.mxu0 %v3276_v18  ;;  %v747_v34 = vld [vmem:[%s4069_s11 + $0x30] sm:$0xff]  ;;  %v750_v38 = vld [vmem:[%s4069_s11 + $0x48] sm:$0xff]  ;;  %v752_v41 = vld [vmem:[%s4069_s11 + $0x58] sm:$0xff]  ;;  %p3629_p0 = scmp.lt.s32.totalorder %s5357_s30, %s3627_s15  ;;  %p3630_p7 = scmp.lt.s32.totalorder %s3628_s22, %s3622_s21 }
  0xe3   : > { %903 = vmatprep.subr.bf16.mxu1 %v3260_v7  ;;  %3026 = vmatprep.subr.bf16.mxu0 %v3277_v20  ;;  %v776_v36 = vpack.c.bf16 %v748_v35, %v747_v34  ;;  %v777_v39 = vpack.c.bf16 %v750_v38, %v749_v37  ;;  %v751_v40 = vld [vmem:[%s4069_s11 + $0x50] sm:$0xff]  ;;  %v753_v42 = vld [vmem:[%s4069_s11 + $0x60] sm:$0xff]  ;;  %v754_v43 = vld [vmem:[%s4069_s11 + $0x68] sm:$0xff]  ;;  %p3625_p12 = pneg %p3624_p10 }
  0xe4   : > { %v778_v44 = vpack.c.bf16 %v752_v41, %v751_v40  ;;  %v779_v45 = vpack.c.bf16 %v754_v43, %v753_v42  ;;  %v755_v46 = vld [vmem:[%s4069_s11 + $0x70] sm:$0xff]  ;;  %v756_v47 = vld [vmem:[%s4069_s11 + $0x78] sm:$0xff]  ;;  %v757_v48 = vld [vmem:[%s4069_s11 + $0x80] sm:$0xff]  ;;  %p3631_p5 = por %p3630_p7, %p3629_p0 }
  0xe5   : > { %v758_v49 = vld [vmem:[%s4069_s11 + $0x88] sm:$0xff]  ;;  %v780_v50 = vpack.c.bf16 %v756_v47, %v755_v46  ;;  %v759_v52 = vld [vmem:[%s4069_s11 + $0x90] sm:$0xff]  ;;  %v760_v53 = vld [vmem:[%s4069_s11 + $0x98] sm:$0xff] }
  0xe6   : > { %904 = vmatpush1.bf16.msra.mxu1 %v3262_v9  ;;  %3027 = vmatpush3.bf16.msra.mxu0 %v3277_v20  ;;  %v781_v51 = vpack.c.bf16 %v758_v49, %v757_v48  ;;  %v761_v54 = vld [vmem:[%s4069_s11 + $0xa0] sm:$0xff]  ;;  %v762_v55 = vld [vmem:[%s4069_s11 + $0xa8] sm:$0xff]  ;;  %v782_v56 = vpack.c.bf16 %v760_v53, %v759_v52  ;;  %v763_v58 = vld [vmem:[%s4069_s11 + $0xb0] sm:$0xff]  ;;  %p3632_p8 = pnand %p3631_p5, %p3625_p12 }
  0xe7   : > { %905 = vmatprep.subr.bf16.mxu1 %v3263_v11  ;;  %3028 = vmatprep.subr.bf16.mxu0 %v3278_v23  ;;  %v783_v57 = vpack.c.bf16 %v762_v55, %v761_v54  ;;  %v764_v59 = vld [vmem:[%s4069_s11 + $0xb8] sm:$0xff]  ;;  %v765_v60 = vld [vmem:[%s4069_s11 + $0xc0] sm:$0xff]  ;;  %v766_v61 = vld [vmem:[%s4069_s11 + $0xc8] sm:$0xff]  ;;  %v4136_v11 = vshrl.u32 %v807_v10, 7 }
  0xe8   : > { %v784_v62 = vpack.c.bf16 %v764_v59, %v763_v58  ;;  %v785_v63 = vpack.c.bf16 %v766_v61, %v765_v60  ;;  %v767_v1 = vld [vmem:[%s4069_s11 + $0xd0] sm:$0xff]  ;;  %v768_v2 = vld [vmem:[%s4069_s11 + $0xd8] sm:$0xff]  ;;  %v769_v3 = vld [vmem:[%s4069_s11 + $0xe0] sm:$0xff] }
  0xe9   : > { %v770_v4 = vld [vmem:[%s4069_s11 + $0xe8] sm:$0xff]  ;;  %v786_v5 = vpack.c.bf16 %v768_v2, %v767_v1  ;;  %v771_v7 = vld [vmem:[%s4069_s11 + $0xf0] sm:$0xff]  ;;  %v772_v8 = vld [vmem:[%s4069_s11 + $0xf8] sm:$0xff]  ;;  %5513 = vst [vmem:[#allocation22_spill] sm:$0xff] %v4136_v11 }
  0xea   : > { %906 = vmatpush1.bf16.msra.mxu1 %v3265_v13  ;;  %3029 = vmatpush3.bf16.msra.mxu0 %v3278_v23  ;;  %v787_v6 = vpack.c.bf16 %v770_v4, %v769_v3  ;;  %v788_v9 = vpack.c.bf16 %v772_v8, %v771_v7  ;;  %v805_v13 = vld [vmem:[#allocation12] sm:$0x3]  ;;  %v4167_v31 = vld [vmem:[#allocation9] ss:$0 sm:$0xff] }
  0xeb   : > { %907 = vmatprep.subr.bf16.mxu1 %v3266_v14  ;;  %3030 = vmatprep.subr.bf16.mxu0 %v3279_v24 }
  0xee   : > { %908 = vmatpush1.bf16.msra.mxu1 %v3268_v15  ;;  %3031 = vmatpush3.bf16.msra.mxu0 %v3279_v24 }
  0xef   : > { %909 = vmatprep.subr.bf16.mxu1 %v3269_v17  ;;  %3032 = vmatprep.subr.bf16.mxu0 %v3280_v27 }
  0xf2   : > { %910 = vmatpush1.bf16.msra.mxu1 %v3271_v19  ;;  %3033 = vmatpush3.bf16.msra.mxu0 %v3280_v27 }
  0xf3   : > { %911 = vmatprep.subr.bf16.mxu1 %v3272_v21  ;;  %3034 = vmatprep.subr.bf16.mxu0 %v3281_v29 }
  0xf6   : > { %912 = vmatpush1.bf16.msra.mxu1 %v3274_v22  ;;  %3035 = vmatpush3.bf16.msra.mxu0 %v3281_v29 }
  0xf7   : > { %3036 = vmatprep.subr.bf16.mxu0 %v3282_v32 }
  0xf9   : > { %930 = vmatmul.mubr.bf16.vlgmr.msra.gmra.mrb[0].mxu1 %v773_v12  ;;  %v809_v12 = vsub.s32 0, %v4136_v11 }
  0xfa   : > { %939 = vmatprep.mubr.bf16.mxu1 %v5426_v0  ;;  %3037 = vmatpush3.bf16.msra.mxu0 %v3282_v32 }
  0xfb   : > { %v4139_v14 = vrot.slane %v805_v13, %v809_v12 }
  0xfd   : > { %3039 = vmatmul.mubr.bf16.vlgmr.msra.gmra.mrb[0].mxu0 %v774_v28 }
  0xfe   : > { %3042 = vmatprep.mubr.bf16.mxu0 %v775_v33 }
 0x101   : > { %940 = vmatmul.mubr.bf16.gmra.mrb[4].mxu1 %v774_v28 }
 0x102   : > { %949 = vmatprep.mubr.bf16.mxu1 %v5426_v0 }
 0x105   : > { %3043 = vmatmul.mubr.bf16.gmra.mrb[4].mxu0 %v776_v36 }
 0x106   : > { %3046 = vmatprep.mubr.bf16.mxu0 %v777_v39 }
 0x109   : > { %950 = vmatmul.mubr.bf16.gmra.mrb[8].mxu1 %v775_v33 }
 0x10a   : > { %959 = vmatprep.mubr.bf16.mxu1 %v5426_v0 }
 0x10d   : > { %3047 = vmatmul.mubr.bf16.gmra.mrb[8].mxu0 %v778_v44 }
 0x10e   : > { %3050 = vmatprep.mubr.bf16.mxu0 %v779_v45 }
 0x111   : > { %960 = vmatmul.mubr.bf16.gmra.mrb[12].mxu1 %v776_v36 }
 0x112   : > { %969 = vmatprep.mubr.bf16.mxu1 %v5426_v0 }
 0x115   : > { %3051 = vmatmul.mubr.bf16.gmra.mrb[12].mxu0 %v780_v50 }
 0x116   : > { %3054 = vmatprep.mubr.bf16.mxu0 %v781_v51 }
 0x119   : > { %970 = vmatmul.mubr.bf16.gmra.mrb[16].mxu1 %v777_v39 }
 0x11a   : > { %979 = vmatprep.mubr.bf16.mxu1 %v5426_v0 }
 0x11d   : > { %3055 = vmatmul.mubr.bf16.gmra.mrb[16].mxu0 %v782_v56 }
 0x11e   : > { %3058 = vmatprep.mubr.bf16.mxu0 %v783_v57 }
 0x121   : > { %980 = vmatmul.mubr.bf16.gmra.mrb[20].mxu1 %v778_v44 }
 0x122   : > { %989 = vmatprep.mubr.bf16.mxu1 %v5426_v0 }
 0x125   : > { %3059 = vmatmul.mubr.bf16.gmra.mrb[20].mxu0 %v784_v62 }
 0x126   : > { %3062 = vmatprep.mubr.bf16.mxu0 %v785_v63 }
 0x129   : > { %990 = vmatmul.mubr.bf16.gmra.mrb[24].mxu1 %v779_v45 }
 0x12a   : > { %999 = vmatprep.mubr.bf16.mxu1 %v5426_v0 }
 0x12d   : > { %3063 = vmatmul.mubr.bf16.gmra.mrb[24].mxu0 %v786_v5 }
 0x12e   : > { %3066 = vmatprep.mubr.bf16.mxu0 %v787_v6 }
 0x131   : > { %1000 = vmatmul.mubr.bf16.gmra.mrb[28].mxu1 %v780_v50 }
 0x132   : > { %1009 = vmatprep.mubr.bf16.mxu1 %v5426_v0 }
 0x135   : > { %3067 = vmatmul.mubr.bf16.gmra.mrb[28].mxu0 %v788_v9 }
 0x139   : > { %1010 = vmatmul.mubr.bf16.gmra.mrb[32].mxu1 %v781_v51 }
 0x13a   : > { %1019 = vmatprep.mubr.bf16.mxu1 %v5426_v0 }
 0x141   : > { %1020 = vmatmul.mubr.bf16.gmra.mrb[36].mxu1 %v782_v56 }
 0x142   : > { %1029 = vmatprep.mubr.bf16.mxu1 %v5426_v0 }
 0x149   : > { %1030 = vmatmul.mubr.bf16.gmra.mrb[40].mxu1 %v783_v57 }
 0x14a   : > { %1039 = vmatprep.mubr.bf16.mxu1 %v5426_v0 }
 0x151   : > { %1040 = vmatmul.mubr.bf16.gmra.mrb[44].mxu1 %v784_v62 }
 0x152   : > { %1049 = vmatprep.mubr.bf16.mxu1 %v5426_v0 }
 0x159   : > { %1050 = vmatmul.mubr.bf16.gmra.mrb[48].mxu1 %v785_v63 }
 0x15a   : > { %1059 = vmatprep.mubr.bf16.mxu1 %v5426_v0 }
 0x161   : > { %1060 = vmatmul.mubr.bf16.gmra.mrb[52].mxu1 %v786_v5 }
 0x162   : > { %1069 = vmatprep.mubr.bf16.mxu1 %v5426_v0 }
 0x169   : > { %1070 = vmatmul.mubr.bf16.gmra.mrb[56].mxu1 %v787_v6 }
 0x16a   : > { %1079 = vmatprep.mubr.bf16.mxu1 %v5426_v0 }
 0x171   : > { %1080 = vmatmul.mubr.bf16.gmra.mrb[60].mxu1 %v788_v9 }
 0x1cc   : > { %v931_v15 = vpop.f32.mrb[0].mxu1 }
 0x1cd   : > { %v4141_v16 = vpop.f32.mrb[1].mxu1  ;;  %v4144_v18 = vadd.f32 %v931_v15, %v4139_v14 }
 0x1ce   : > { %5514 = vst [vmem:[#allocation23_spill] sm:$0xff] %v4141_v16  ;;  %v935_v17 = vpop.f32.mrb[2].mxu1 }
 0x1cf   : > { %v4147_v19 = vadd.f32 %v935_v17, %v4139_v14  ;;  %v4149_v20 = vpop.f32.mrb[3].mxu1 }
 0x1d0   : > { %5515 = vst [vmem:[#allocation24_spill] sm:$0xff] %v4149_v20  ;;  %v3040_v36 = vpop.f32.mrb[0].mxu0 }
 0x1d1   : > { %v1090_v21 = vpack.c.bf16 %v4147_v19, %v4144_v18  ;;  %v557_v37 = vadd.f32 %v3040_v36, %v4167_v31  ;;  %v548_v38 = vpop.f32.mrb[1].mxu0 }
 0x1d2   : > { %v549_v40 = vadd.f32 %v4167_v31, %v548_v38  ;;  %v3041_v41 = vpop.f32.mrb[2].mxu0 }
 0x1d3   : > { %v560_v42 = vadd.f32 %v3041_v41, %v4167_v31  ;;  %v551_v43 = vpop.f32.mrb[3].mxu0 }
 0x1d4   : > { %v941_v22 = vpop.f32.mrb[4].mxu1  ;;  %v552_v44 = vadd.f32 %v4167_v31, %v551_v43 }
 0x1d5   : > { %v4153_v23 = vpop.f32.mrb[5].mxu1  ;;  %v4156_v25 = vadd.f32 %v941_v22, %v4139_v14  ;;  %v4183_v46 = vpack.c.bf16 %v560_v42, %v557_v37 }
 0x1d6   : > { %5516 = vst [vmem:[#allocation25_spill] sm:$0xff] %v4153_v23  ;;  %v945_v24 = vpop.f32.mrb[6].mxu1  ;;  %v4187_v48 = vpack.c.bf16 %v552_v44, %v549_v40 }
 0x1d7   : > { %v4159_v26 = vadd.f32 %v945_v24, %v4139_v14  ;;  %v4161_v27 = vpop.f32.mrb[7].mxu1 }
 0x1d8   : > { %5517 = vst [vmem:[#allocation26_spill] sm:$0xff] %v4161_v27  ;;  %2854 = vmatprep.mubr.bf16.mxu0 %v4187_v48  ;;  %v3044_v53 = vpop.f32.mrb[4].mxu0 }
 0x1d9   : > { %v1091_v28 = vpack.c.bf16 %v4159_v26, %v4156_v25  ;;  %v573_v54 = vadd.f32 %v3044_v53, %v4167_v31  ;;  %v564_v55 = vpop.f32.mrb[5].mxu0 }
 0x1da   : > { %v565_v57 = vadd.f32 %v4167_v31, %v564_v55  ;;  %v3045_v58 = vpop.f32.mrb[6].mxu0 }
 0x1db   : > { %v576_v59 = vadd.f32 %v3045_v58, %v4167_v31  ;;  %v567_v60 = vpop.f32.mrb[7].mxu0 }
 0x1dc   : > { %v951_v29 = vpop.f32.mrb[8].mxu1  ;;  %v568_v61 = vadd.f32 %v4167_v31, %v567_v60 }
 0x1dd   : > { %v4165_v30 = vpop.f32.mrb[9].mxu1  ;;  %v4170_v33 = vadd.f32 %v951_v29, %v4139_v14  ;;  %v4204_v63 = vpack.c.bf16 %v576_v59, %v573_v54 }
 0x1de   : > { %5518 = vst [vmem:[#allocation27_spill] sm:$0xff] %v4165_v30  ;;  %v955_v32 = vpop.f32.mrb[10].mxu1  ;;  %v4208_v2 = vpack.c.bf16 %v568_v61, %v565_v57 }
 0x1df   : > { %v4173_v34 = vadd.f32 %v955_v32, %v4139_v14  ;;  %v4175_v35 = vpop.f32.mrb[11].mxu1 }
 0x1e0   : > { %5519 = vst [vmem:[#allocation28_spill] sm:$0xff] %v4175_v35  ;;  %v3048_v7 = vpop.f32.mrb[8].mxu0 }
 0x1e1   : > { %v589_v8 = vadd.f32 %v3048_v7, %v4167_v31  ;;  %v580_v9 = vpop.f32.mrb[9].mxu0 }
 0x1e2   : > { %v581_v12 = vadd.f32 %v4167_v31, %v580_v9  ;;  %v3049_v13 = vpop.f32.mrb[10].mxu0 }
 0x1e3   : > { %v592_v15 = vadd.f32 %v3049_v13, %v4167_v31  ;;  %v583_v17 = vpop.f32.mrb[11].mxu0 }
 0x1e4   : > { %v961_v45 = vpop.f32.mrb[12].mxu1  ;;  %v584_v22 = vadd.f32 %v4167_v31, %v583_v17 }
 0x1e5   : > { %v4185_v47 = vpop.f32.mrb[13].mxu1  ;;  %v4190_v50 = vadd.f32 %v961_v45, %v4139_v14  ;;  %v4224_v29 = vpack.c.bf16 %v592_v15, %v589_v8 }
 0x1e6   : > { %5520 = vst [vmem:[#allocation29_spill] sm:$0xff] %v4185_v47  ;;  %v965_v49 = vpop.f32.mrb[14].mxu1  ;;  %v4228_v36 = vpack.c.bf16 %v584_v22, %v581_v12 }
 0x1e7   : > { %v4193_v51 = vadd.f32 %v965_v49, %v4139_v14  ;;  %v4195_v52 = vpop.f32.mrb[15].mxu1 }
 0x1e8   : > { %5521 = vst [vmem:[#allocation30_spill] sm:$0xff] %v4195_v52  ;;  %v3052_v42 = vpop.f32.mrb[12].mxu0 }
 0x1e9   : > { %v605_v43 = vadd.f32 %v3052_v42, %v4167_v31  ;;  %v596_v44 = vpop.f32.mrb[13].mxu0 }
 0x1ea   : > { %v597_v49 = vadd.f32 %v4167_v31, %v596_v44  ;;  %v3053_v53 = vpop.f32.mrb[14].mxu0 }
 0x1eb   : > { %v608_v54 = vadd.f32 %v3053_v53, %v4167_v31  ;;  %v599_v55 = vpop.f32.mrb[15].mxu0 }
 0x1ec   : > { %v971_v62 = vpop.f32.mrb[16].mxu1  ;;  %v600_v57 = vadd.f32 %v4167_v31, %v599_v55 }
 0x1ed   : > { %v4206_v1 = vpop.f32.mrb[17].mxu1  ;;  %v4211_v4 = vadd.f32 %v971_v62, %v4139_v14  ;;  %v4244_v59 = vpack.c.bf16 %v608_v54, %v605_v43 }
 0x1ee   : > { %5522 = vst [vmem:[#allocation31_spill] sm:$0xff] %v4206_v1  ;;  %v975_v3 = vpop.f32.mrb[18].mxu1  ;;  %v4248_v61 = vpack.c.bf16 %v600_v57, %v597_v49 }
 0x1ef   : > { %v4214_v5 = vadd.f32 %v975_v3, %v4139_v14  ;;  %v4216_v6 = vpop.f32.mrb[19].mxu1 }
 0x1f0   : > { %5523 = vst [vmem:[#allocation32_spill] sm:$0xff] %v4216_v6  ;;  %v3056_v13 = vpop.f32.mrb[16].mxu0 }
 0x1f1   : > { %v621_v17 = vadd.f32 %v3056_v13, %v4167_v31  ;;  %v612_v22 = vpop.f32.mrb[17].mxu0 }
 0x1f2   : > { %v3057_v42 = vpop.f32.mrb[18].mxu0 }
 0x1f3   : > { %v624_v53 = vadd.f32 %v3057_v42, %v4167_v31  ;;  %v615_v54 = vpop.f32.mrb[19].mxu0 }
 0x1f4   : > { %v981_v24 = vpop.f32.mrb[20].mxu1  ;;  %v616_v55 = vadd.f32 %v4167_v31, %v615_v54 }
 0x1f5   : > { %v4226_v32 = vpop.f32.mrb[21].mxu1  ;;  %v4231_v38 = vadd.f32 %v981_v24, %v4139_v14 }
 0x1f6   : > { %5524 = vst [vmem:[#allocation33_spill] sm:$0xff] %v4226_v32  ;;  %v985_v37 = vpop.f32.mrb[22].mxu1 }
 0x1f7   : > { %v4234_v40 = vadd.f32 %v985_v37, %v4139_v14  ;;  %v4236_v41 = vpop.f32.mrb[23].mxu1  ;;  %v613_v37 = vadd.f32 %v4167_v31, %v612_v22 }
 0x1f8   : > { %5525 = vst [vmem:[#allocation34_spill] sm:$0xff] %v4236_v41 }
 0x1fc   : > { %v991_v58 = vpop.f32.mrb[24].mxu1 }
 0x1fd   : > { %v4246_v60 = vpop.f32.mrb[25].mxu1  ;;  %v4251_v3 = vadd.f32 %v991_v58, %v4139_v14  ;;  %v4276_v58 = vpack.c.bf16 %v624_v53, %v621_v17  ;;  %v3060_v17 = vpop.f32.mrb[20].mxu0 }
 0x1fe   : > { %5526 = vst [vmem:[#allocation35_spill] sm:$0xff] %v4246_v60  ;;  %v995_v62 = vpop.f32.mrb[26].mxu1  ;;  %v637_v53 = vadd.f32 %v3060_v17, %v4167_v31 }
 0x1ff   : > { %v4254_v7 = vadd.f32 %v995_v62, %v4139_v14  ;;  %v4256_v8 = vpop.f32.mrb[27].mxu1  ;;  %v4278_v62 = vpack.c.bf16 %v616_v55, %v613_v37  ;;  %v628_v55 = vpop.f32.mrb[21].mxu0 }
 0x200   : > { %5527 = vst [vmem:[#allocation36_spill] sm:$0xff] %v4256_v8  ;;  %v3061_v45 = vpop.f32.mrb[22].mxu0 }
 0x201   : > { %v631_v18 = vpop.f32.mrb[23].mxu0 }
 0x202   : > { %v632_v19 = vadd.f32 %v4167_v31, %v631_v18 }
 0x204   : > { %v1001_v12 = vpop.f32.mrb[28].mxu1 }
 0x205   : > { %v4260_v15 = vpop.f32.mrb[29].mxu1  ;;  %v4265_v43 = vadd.f32 %v1001_v12, %v4139_v14 }
 0x206   : > { %5528 = vst [vmem:[#allocation37_spill] sm:$0xff] %v4260_v15  ;;  %v1005_v24 = vpop.f32.mrb[30].mxu1 }
 0x207   : > { %v4268_v44 = vadd.f32 %v1005_v24, %v4139_v14  ;;  %v4270_v49 = vpop.f32.mrb[31].mxu1 }
 0x208   : > { %5529 = vst [vmem:[#allocation38_spill] sm:$0xff] %v4270_v49 }
 0x20c   : > { %v1011_v13 = vpop.f32.mrb[32].mxu1 }
 0x20d   : > { %v4280_v12 = vpop.f32.mrb[33].mxu1  ;;  %v1012_v24 = vadd.f32 %v1011_v13, %v4139_v14  ;;  %v629_v13 = vadd.f32 %v4167_v31, %v628_v55 }
 0x20e   : > { %5530 = vst [vmem:[#allocation39_spill] sm:$0xff] %v4280_v12  ;;  %v1015_v22 = vpop.f32.mrb[34].mxu1 }
 0x20f   : > { %v1016_v0 = vadd.f32 %v1015_v22, %v4139_v14  ;;  %v4284_v9 = vpop.f32.mrb[35].mxu1  ;;  %v4301_v17 = vpack.c.bf16 %v632_v19, %v629_v13  ;;  %v5536_v13 = vpack.c.bf16 %v4173_v34, %v4170_v33 }
 0x210   : > { %5531 = vst [vmem:[#allocation40_spill] sm:$0xff] %v4284_v9 }
 0x211   : > { %v1098_v42 = vpack.c.bf16 %v1016_v0, %v1012_v24 }
 0x213   : > { %2838 = vmatprep.subr.bf16.mxu0 %v1098_v42  ;;  %v640_v42 = vadd.f32 %v3061_v45, %v4167_v31 }
 0x214   : > { %v1021_v54 = vpop.f32.mrb[36].mxu1  ;;  %2839 = vmatpush3.bf16.xpose.msra.mxu0 %v1090_v21 }
 0x215   : > { %v4289_v37 = vpop.f32.mrb[37].mxu1  ;;  %v1022_v22 = vadd.f32 %v1021_v54, %v4139_v14  ;;  %v4299_v10 = vpack.c.bf16 %v640_v42, %v637_v53 }
 0x216   : > { %5532 = vst [vmem:[#allocation41_spill] sm:$0xff] %v4289_v37  ;;  %v1025_v57 = vpop.f32.mrb[38].mxu1 }
 0x217   : > { %v1026_v0 = vadd.f32 %v1025_v57, %v4139_v14  ;;  %v4295_v24 = vpop.f32.mrb[39].mxu1 }
 0x218   : > { %5533 = vst [vmem:[#allocation42_spill] sm:$0xff] %v4295_v24 }
 0x219   : > { %v1099_v21 = vpack.c.bf16 %v1026_v0, %v1022_v22  ;;  %v3064_v0 = vpop.f32.mrb[24].mxu0 }
 0x21a   : > { %v653_v25 = vadd.f32 %v3064_v0, %v4167_v31  ;;  %v644_v26 = vpop.f32.mrb[25].mxu0 }
 0x21b   : > { %2840 = vmatprep.subr.bf16.mxu0 %v1099_v21  ;;  %v3065_v18 = vpop.f32.mrb[26].mxu0 }
 0x21c   : > { %v1031_v56 = vpop.f32.mrb[40].mxu1  ;;  %2841 = vmatpush3.bf16.xpose.msra.mxu0 %v1091_v28  ;;  %v647_v33 = vpop.f32.mrb[27].mxu0 }
 0x21d   : > { %v4306_v54 = vpop.f32.mrb[41].mxu1  ;;  %v1032_v55 = vadd.f32 %v1031_v56, %v4139_v14  ;;  %v645_v56 = vadd.f32 %v4167_v31, %v644_v26  ;;  %v648_v34 = vadd.f32 %v4167_v31, %v647_v33  ;;  %v5539_v26 = vpack.c.bf16 %v4193_v51, %v4190_v50 }
 0x21e   : > { %5534 = vst [vmem:[#allocation43_spill] sm:$0xff] %v4306_v54  ;;  %v1035_v57 = vpop.f32.mrb[42].mxu1 }
 0x21f   : > { %v1036_v45 = vadd.f32 %v1035_v57, %v4139_v14  ;;  %v4310_v39 = vpop.f32.mrb[43].mxu1 }
 0x220   : > { %5535 = vst [vmem:[#allocation44_spill] sm:$0xff] %v4310_v39 }
 0x221   : > { %v1100_v22 = vpack.c.bf16 %v1036_v45, %v1032_v55  ;;  %v656_v55 = vadd.f32 %v3065_v18, %v4167_v31 }
 0x223   : > { %2842 = vmatprep.subr.bf16.mxu0 %v1100_v22  ;;  %v4325_v22 = vpack.c.bf16 %v656_v55, %v653_v25 }
 0x224   : > { %v1041_v53 = vpop.f32.mrb[44].mxu1  ;;  %2843 = vmatpush3.bf16.xpose.msra.mxu0 %v5536_v13  ;;  %v4327_v13 = vpack.c.bf16 %v648_v34, %v645_v56  ;;  %v5542_v56 = vpack.c.bf16 %v4214_v5, %v4211_v4 }
 0x225   : > { %v4315_v42 = vpop.f32.mrb[45].mxu1  ;;  %v1042_v19 = vadd.f32 %v1041_v53, %v4139_v14 }
 0x226   : > { %5537 = vst [vmem:[#allocation45_spill] sm:$0xff] %v4315_v42  ;;  %v1045_v28 = vpop.f32.mrb[46].mxu1 }
 0x227   : > { %v1046_v21 = vadd.f32 %v1045_v28, %v4139_v14  ;;  %v4321_v57 = vpop.f32.mrb[47].mxu1 }
 0x228   : > { %5538 = vst [vmem:[#allocation46_spill] sm:$0xff] %v4321_v57 }
 0x229   : > { %v1101_v45 = vpack.c.bf16 %v1046_v21, %v1042_v19  ;;  %v3068_v21 = vpop.f32.mrb[28].mxu0 }
 0x22a   : > { %v669_v50 = vadd.f32 %v3068_v21, %v4167_v31  ;;  %v660_v51 = vpop.f32.mrb[29].mxu0 }
 0x22b   : > { %2844 = vmatprep.subr.bf16.mxu0 %v1101_v45  ;;  %v661_v34 = vadd.f32 %v4167_v31, %v660_v51  ;;  %v3069_v45 = vpop.f32.mrb[30].mxu0  ;;  %v5545_v51 = vpack.c.bf16 %v4234_v40, %v4231_v38 }
 0x22c   : > { %v1051_v0 = vpop.f32.mrb[48].mxu1  ;;  %2845 = vmatpush3.bf16.xpose.msra.mxu0 %v5539_v26  ;;  %v663_v4 = vpop.f32.mrb[31].mxu0 }
 0x22d   : > { %v4332_v53 = vpop.f32.mrb[49].mxu1  ;;  %v1052_v49 = vadd.f32 %v1051_v0, %v4139_v14  ;;  %v664_v5 = vadd.f32 %v4167_v31, %v663_v4 }
 0x22e   : > { %5540 = vst [vmem:[#allocation47_spill] sm:$0xff] %v4332_v53  ;;  %v1055_v28 = vpop.f32.mrb[50].mxu1 }
 0x22f   : > { %v1056_v18 = vadd.f32 %v1055_v28, %v4139_v14  ;;  %v4336_v15 = vpop.f32.mrb[51].mxu1  ;;  %v672_v28 = vadd.f32 %v3069_v45, %v4167_v31 }
 0x230   : > { %5541 = vst [vmem:[#allocation48_spill] sm:$0xff] %v4336_v15 }
 0x231   : > { %v1102_v19 = vpack.c.bf16 %v1056_v18, %v1052_v49 }
 0x233   : > { %2846 = vmatprep.subr.bf16.mxu0 %v1102_v19  ;;  %v690_v19 = vpack.c.bf16 %v672_v28, %v669_v50  ;;  %v5548_v50 = vpack.c.bf16 %v4254_v7, %v4251_v3 }
 0x234   : > { %v1061_v25 = vpop.f32.mrb[52].mxu1  ;;  %2847 = vmatpush3.bf16.xpose.msra.mxu0 %v5542_v56  ;;  %v689_v56 = vpack.c.bf16 %v664_v5, %v661_v34 }
 0x235   : > { %v4341_v55 = vpop.f32.mrb[53].mxu1  ;;  %v1062_v0 = vadd.f32 %v1061_v25, %v4139_v14 }
 0x236   : > { %5543 = vst [vmem:[#allocation49_spill] sm:$0xff] %v4341_v55  ;;  %v1065_v33 = vpop.f32.mrb[54].mxu1 }
 0x237   : > { %v1066_v49 = vadd.f32 %v1065_v33, %v4139_v14  ;;  %v4347_v26 = vpop.f32.mrb[55].mxu1 }
 0x238   : > { %5544 = vst [vmem:[#allocation50_spill] sm:$0xff] %v4347_v26 }
 0x239   : > { %v1103_v18 = vpack.c.bf16 %v1066_v49, %v1062_v0 }
 0x23b   : > { %2848 = vmatprep.subr.bf16.mxu0 %v1103_v18 }
 0x23c   : > { %v1071_v21 = vpop.f32.mrb[56].mxu1  ;;  %2849 = vmatpush3.bf16.xpose.msra.mxu0 %v5545_v51 }
 0x23d   : > { %v4354_v8 = vpop.f32.mrb[57].mxu1  ;;  %v1072_v33 = vadd.f32 %v1071_v21, %v4139_v14 }
 0x23e   : > { %5546 = vst [vmem:[#allocation51_spill] sm:$0xff] %v4354_v8  ;;  %v1075_v25 = vpop.f32.mrb[58].mxu1 }
 0x23f   : > { %v1076_v60 = vadd.f32 %v1075_v25, %v4139_v14  ;;  %v4358_v45 = vpop.f32.mrb[59].mxu1 }
 0x240   : > { %5547 = vst [vmem:[#allocation52_spill] sm:$0xff] %v4358_v45 }
 0x241   : > { %v1104_v26 = vpack.c.bf16 %v1076_v60, %v1072_v33  ;;  %v5551_v60 = vpack.c.bf16 %v4268_v44, %v4265_v43 }
 0x243   : > { %2850 = vmatprep.subr.bf16.mxu0 %v1104_v26 }
 0x244   : > { %v1081_v31 = vpop.f32.mrb[60].mxu1  ;;  %2851 = vmatpush3.bf16.xpose.msra.mxu0 %v5548_v50 }
 0x245   : > { %v4363_v34 = vpop.f32.mrb[61].mxu1  ;;  %v1082_v40 = vadd.f32 %v1081_v31, %v4139_v14 }
 0x246   : > { %5549 = vst [vmem:[#allocation53_spill] sm:$0xff] %v4363_v34  ;;  %v1085_v38 = vpop.f32.mrb[62].mxu1 }
 0x247   : > { %v1086_v0 = vadd.f32 %v1085_v38, %v4139_v14  ;;  %v4367_v49 = vpop.f32.mrb[63].mxu1 }
 0x248   : > { %5550 = vst [vmem:[#allocation54_spill] sm:$0xff] %v4367_v49 }
 0x249   : > { %v1105_v28 = vpack.c.bf16 %v1086_v0, %v1082_v40 }
 0x24b   : > { %2852 = vmatprep.subr.bf16.mxu0 %v1105_v28 }
 0x24c   : > { %2853 = vmatpush3.bf16.xpose.msra.mxu0 %v5551_v60 }
 0x253   : > { %2855 = vmatmul.mubr.bf16.vlgmr.msra.gmra.mrb[32].mxu0 %v4187_v48 }
 0x254   : > { %2856 = vmatprep.mubr.bf16.mxu0 %v4183_v46 }
 0x25b   : > { %2857 = vmatmul.mubr.bf16.gmra.mrb[36].mxu0 %v4183_v46 }
 0x25c   : > { %2858 = vmatprep.mubr.bf16.mxu0 %v4208_v2 }
 0x263   : > { %2859 = vmatmul.mubr.bf16.gmra.mrb[40].mxu0 %v4208_v2 }
 0x264   : > { %2860 = vmatprep.mubr.bf16.mxu0 %v4204_v63 }
 0x26b   : > { %2861 = vmatmul.mubr.bf16.gmra.mrb[44].mxu0 %v4204_v63 }
 0x26c   : > { %2862 = vmatprep.mubr.bf16.mxu0 %v4228_v36 }
 0x273   : > { %2863 = vmatmul.mubr.bf16.gmra.mrb[48].mxu0 %v4228_v36 }
 0x274   : > { %2864 = vmatprep.mubr.bf16.mxu0 %v4224_v29 }
 0x27b   : > { %2865 = vmatmul.mubr.bf16.gmra.mrb[52].mxu0 %v4224_v29 }
 0x27c   : > { %2866 = vmatprep.mubr.bf16.mxu0 %v4248_v61 }
 0x283   : > { %2867 = vmatmul.mubr.bf16.gmra.mrb[56].mxu0 %v4248_v61 }
 0x284   : > { %2868 = vmatprep.mubr.bf16.mxu0 %v4244_v59 }
 0x28b   : > { %2869 = vmatmul.mubr.bf16.gmra.mrb[60].mxu0 %v4244_v59 }
 0x28c   : > { %2870 = vmatprep.mubr.bf16.mxu0 %v4278_v62 }
 0x293   : > { %2871 = vmatmul.mubr.bf16.gmra.mrb[64].mxu0 %v4278_v62 }
 0x294   : > { %2872 = vmatprep.mubr.bf16.mxu0 %v4276_v58 }
 0x29b   : > { %2873 = vmatmul.mubr.bf16.gmra.mrb[68].mxu0 %v4276_v58 }
 0x29c   : > { %2874 = vmatprep.mubr.bf16.mxu0 %v4301_v17 }
 0x2a3   : > { %2875 = vmatmul.mubr.bf16.gmra.mrb[72].mxu0 %v4301_v17 }
 0x2a4   : > { %2876 = vmatprep.mubr.bf16.mxu0 %v4299_v10 }
 0x2ab   : > { %2877 = vmatmul.mubr.bf16.gmra.mrb[76].mxu0 %v4299_v10 }
 0x2ac   : > { %2878 = vmatprep.mubr.bf16.mxu0 %v4327_v13 }
 0x2b3   : > { %2879 = vmatmul.mubr.bf16.gmra.mrb[80].mxu0 %v4327_v13 }
 0x2b4   : > { %2880 = vmatprep.mubr.bf16.mxu0 %v4325_v22 }
 0x2bb   : > { %2881 = vmatmul.mubr.bf16.gmra.mrb[84].mxu0 %v4325_v22 }
 0x2bc   : > { %2882 = vmatprep.mubr.bf16.mxu0 %v689_v56 }
 0x2c3   : > { %2883 = vmatmul.mubr.bf16.gmra.mrb[88].mxu0 %v689_v56 }
 0x2c4   : > { %2884 = vmatprep.mubr.bf16.mxu0 %v690_v19 }
 0x2cb   : > { %2885 = vmatmul.mubr.bf16.gmra.mrb[92].mxu0 %v690_v19 }
 0x326   : > { %v4399_v14 = vpop.f32.mrb[32].mxu0 }
 0x327   : > { %v4401_v46 = vpop.f32.mrb[33].mxu0 }
 0x328   : > { %v4403_v48 = vpop.f32.mrb[34].mxu0 }
 0x329   : > { %v4405_v63 = vpop.f32.mrb[35].mxu0 }
 0x32e   : > { %v4407_v2 = vpop.f32.mrb[36].mxu0 }
 0x32f   : > { %v1315_v10 = vmax.f32 %v4399_v14, %v4407_v2  ;;  %v4411_v29 = vpop.f32.mrb[37].mxu0 }
 0x330   : > { %v1352_v36 = vmax.f32 %v4401_v46, %v4411_v29  ;;  %v4415_v59 = vpop.f32.mrb[38].mxu0 }
 0x331   : > { %v1316_v61 = vmax.f32 %v4403_v48, %v4415_v59  ;;  %v4419_v3 = vpop.f32.mrb[39].mxu0 }
 0x332   : > { %v1353_v7 = vmax.f32 %v4405_v63, %v4419_v3 }
 0x336   : > { %v4423_v43 = vpop.f32.mrb[40].mxu0 }
 0x337   : > { %v1317_v44 = vmax.f32 %v1315_v10, %v4423_v43  ;;  %v4426_v58 = vpop.f32.mrb[41].mxu0 }
 0x338   : > { %v1354_v62 = vmax.f32 %v1352_v36, %v4426_v58  ;;  %v4429_v17 = vpop.f32.mrb[42].mxu0 }
 0x339   : > { %v1318_v22 = vmax.f32 %v1316_v61, %v4429_v17  ;;  %v4432_v13 = vpop.f32.mrb[43].mxu0 }
 0x33a   : > { %v1355_v26 = vmax.f32 %v1353_v7, %v4432_v13 }
 0x33e   : > { %v4435_v4 = vpop.f32.mrb[44].mxu0 }
 0x33f   : > { %v1319_v5 = vmax.f32 %v1317_v44, %v4435_v4  ;;  %v4438_v18 = vpop.f32.mrb[45].mxu0 }
 0x340   : > { %v1356_v19 = vmax.f32 %v1354_v62, %v4438_v18  ;;  %v4441_v56 = vpop.f32.mrb[46].mxu0 }
 0x341   : > { %v1320_v21 = vmax.f32 %v1318_v22, %v4441_v56  ;;  %v4444_v51 = vpop.f32.mrb[47].mxu0 }
 0x342   : > { %v1357_v25 = vmax.f32 %v1355_v26, %v4444_v51 }
 0x346   : > { %v4447_v33 = vpop.f32.mrb[48].mxu0 }
 0x347   : > { %v1321_v31 = vmax.f32 %v1319_v5, %v4447_v33  ;;  %v4450_v50 = vpop.f32.mrb[49].mxu0 }
 0x348   : > { %v1358_v38 = vmax.f32 %v1356_v19, %v4450_v50  ;;  %v4453_v40 = vpop.f32.mrb[50].mxu0 }
 0x349   : > { %v1322_v0 = vmax.f32 %v1320_v21, %v4453_v40  ;;  %v4456_v28 = vpop.f32.mrb[51].mxu0 }
 0x34a   : > { %v1359_v60 = vmax.f32 %v1357_v25, %v4456_v28 }
 0x34e   : > { %v4459_v10 = vpop.f32.mrb[52].mxu0 }
 0x34f   : > { %v1323_v36 = vmax.f32 %v1321_v31, %v4459_v10  ;;  %v4462_v61 = vpop.f32.mrb[53].mxu0 }
 0x350   : > { %v1360_v7 = vmax.f32 %v1358_v38, %v4462_v61  ;;  %v4465_v44 = vpop.f32.mrb[54].mxu0 }
 0x351   : > { %v1324_v62 = vmax.f32 %v1322_v0, %v4465_v44  ;;  %v4468_v22 = vpop.f32.mrb[55].mxu0 }
 0x352   : > { %5552 = vst [vmem:[#allocation55_spill] sm:$0xff] %v4468_v22  ;;  %v1361_v26 = vmax.f32 %v1359_v60, %v4468_v22 }
 0x356   : > { %v4471_v5 = vpop.f32.mrb[56].mxu0 }
 0x357   : > { %v1325_v19 = vmax.f32 %v1323_v36, %v4471_v5  ;;  %v4474_v21 = vpop.f32.mrb[57].mxu0 }
 0x358   : > { %5553 = vst [vmem:[#allocation56_spill] sm:$0xff] %v4474_v21  ;;  %v1362_v25 = vmax.f32 %v1360_v7, %v4474_v21  ;;  %v4477_v31 = vpop.f32.mrb[58].mxu0 }
 0x359   : > { %v1326_v38 = vmax.f32 %v1324_v62, %v4477_v31  ;;  %v4480_v49 = vpop.f32.mrb[59].mxu0 }
 0x35a   : > { %5554 = vst [vmem:[#allocation57_spill] sm:$0xff] %v4480_v49  ;;  %v1363_v0 = vmax.f32 %v1361_v26, %v4480_v49 }
 0x35e   : > { %v4483_v34 = vpop.f32.mrb[60].mxu0 }
 0x35f   : > { %v1327_v60 = vmax.f32 %v1325_v19, %v4483_v34  ;;  %v4486_v45 = vpop.f32.mrb[61].mxu0 }
 0x360   : > { %5555 = vst [vmem:[#allocation58_spill] sm:$0xff] %v4486_v45  ;;  %v1364_v36 = vmax.f32 %v1362_v25, %v4486_v45  ;;  %v4489_v8 = vpop.f32.mrb[62].mxu0 }
 0x361   : > { %v1328_v7 = vmax.f32 %v1326_v38, %v4489_v8  ;;  %v4492_v55 = vpop.f32.mrb[63].mxu0 }
 0x362   : > { %5556 = vst [vmem:[#allocation59_spill] sm:$0xff] %v4492_v55  ;;  %v1365_v62 = vmax.f32 %v1363_v0, %v4492_v55 }
 0x366   : > { %v4495_v41 = vpop.f32.mrb[64].mxu0 }
 0x367   : > { %v1329_v26 = vmax.f32 %v1327_v60, %v4495_v41  ;;  %v4498_v32 = vpop.f32.mrb[65].mxu0 }
 0x368   : > { %5557 = vst [vmem:[#allocation60_spill] sm:$0xff] %v4498_v32  ;;  %v1366_v19 = vmax.f32 %v1364_v36, %v4498_v32  ;;  %v4501_v6 = vpop.f32.mrb[66].mxu0 }
 0x369   : > { %5558 = vst [vmem:[#allocation61_spill] sm:$0xff] %v4501_v6  ;;  %v1330_v25 = vmax.f32 %v1328_v7, %v4501_v6  ;;  %v4504_v1 = vpop.f32.mrb[67].mxu0 }
 0x36a   : > { %5559 = vst [vmem:[#allocation62_spill] sm:$0xff] %v4504_v1  ;;  %v1367_v38 = vmax.f32 %v1365_v62, %v4504_v1 }
 0x36e   : > { %v4507_v15 = vpop.f32.mrb[68].mxu0 }
 0x36f   : > { %5560 = vst [vmem:[#allocation63_spill] sm:$0xff] %v4507_v15  ;;  %v1331_v0 = vmax.f32 %v1329_v26, %v4507_v15  ;;  %v4510_v53 = vpop.f32.mrb[69].mxu0 }
 0x370   : > { %5561 = vst [vmem:[#allocation64_spill] sm:$0xff] %v4510_v53  ;;  %v1368_v60 = vmax.f32 %v1366_v19, %v4510_v53  ;;  %v4513_v57 = vpop.f32.mrb[70].mxu0 }
 0x371   : > { %5562 = vst [vmem:[#allocation65_spill] sm:$0xff] %v4513_v57  ;;  %v1332_v36 = vmax.f32 %v1330_v25, %v4513_v57  ;;  %v4516_v42 = vpop.f32.mrb[71].mxu0 }
 0x372   : > { %5563 = vst [vmem:[#allocation66_spill] sm:$0xff] %v4516_v42  ;;  %v1369_v7 = vmax.f32 %v1367_v38, %v4516_v42 }
 0x376   : > { %v4519_v52 = vpop.f32.mrb[72].mxu0 }
 0x377   : > { %5564 = vst [vmem:[#allocation67_spill] sm:$0xff] %v4519_v52  ;;  %v1333_v62 = vmax.f32 %v1331_v0, %v4519_v52  ;;  %v4522_v47 = vpop.f32.mrb[73].mxu0 }
 0x378   : > { %5565 = vst [vmem:[#allocation68_spill] sm:$0xff] %v4522_v47  ;;  %v1370_v26 = vmax.f32 %v1368_v60, %v4522_v47  ;;  %v4525_v39 = vpop.f32.mrb[74].mxu0 }
 0x379   : > { %5566 = vst [vmem:[#allocation69_spill] sm:$0xff] %v4525_v39  ;;  %v1334_v19 = vmax.f32 %v1332_v36, %v4525_v39  ;;  %v4528_v54 = vpop.f32.mrb[75].mxu0 }
 0x37a   : > { %5567 = vst [vmem:[#allocation70_spill] sm:$0xff] %v4528_v54  ;;  %v1371_v25 = vmax.f32 %v1369_v7, %v4528_v54 }
 0x37e   : > { %v4531_v35 = vpop.f32.mrb[76].mxu0 }
 0x37f   : > { %5568 = vst [vmem:[#allocation71_spill] sm:$0xff] %v4531_v35  ;;  %v1335_v38 = vmax.f32 %v1333_v62, %v4531_v35  ;;  %v4534_v30 = vpop.f32.mrb[77].mxu0 }
 0x380   : > { %5569 = vst [vmem:[#allocation72_spill] sm:$0xff] %v4534_v30  ;;  %v1372_v0 = vmax.f32 %v1370_v26, %v4534_v30  ;;  %v4537_v24 = vpop.f32.mrb[78].mxu0 }
 0x381   : > { %5570 = vst [vmem:[#allocation73_spill] sm:$0xff] %v4537_v24  ;;  %v1336_v60 = vmax.f32 %v1334_v19, %v4537_v24  ;;  %v4540_v37 = vpop.f32.mrb[79].mxu0 }
 0x382   : > { %5571 = vst [vmem:[#allocation74_spill] sm:$0xff] %v4540_v37  ;;  %v1373_v36 = vmax.f32 %v1371_v25, %v4540_v37 }
 0x386   : > { %v4543_v27 = vpop.f32.mrb[80].mxu0 }
 0x387   : > { %5572 = vst [vmem:[#allocation75_spill] sm:$0xff] %v4543_v27  ;;  %v1337_v7 = vmax.f32 %v1335_v38, %v4543_v27  ;;  %v4546_v23 = vpop.f32.mrb[81].mxu0 }
 0x388   : > { %5573 = vst [vmem:[#allocation76_spill] sm:$0xff] %v4546_v23  ;;  %v1374_v62 = vmax.f32 %v1372_v0, %v4546_v23  ;;  %v4549_v9 = vpop.f32.mrb[82].mxu0 }
 0x389   : > { %5574 = vst [vmem:[#allocation77_spill] sm:$0xff] %v4549_v9  ;;  %v1338_v26 = vmax.f32 %v1336_v60, %v4549_v9  ;;  %v4552_v12 = vpop.f32.mrb[83].mxu0 }
 0x38a   : > { %5575 = vst [vmem:[#allocation78_spill] sm:$0xff] %v4552_v12  ;;  %v1375_v19 = vmax.f32 %v1373_v36, %v4552_v12 }
 0x38e   : > { %v4555_v20 = vpop.f32.mrb[84].mxu0 }
 0x38f   : > { %5576 = vst [vmem:[#allocation79_spill] sm:$0xff] %v4555_v20  ;;  %v1339_v25 = vmax.f32 %v1337_v7, %v4555_v20  ;;  %v4558_v16 = vpop.f32.mrb[85].mxu0 }
 0x390   : > { %5577 = vst [vmem:[#allocation80_spill] sm:$0xff] %v4558_v16  ;;  %v1376_v38 = vmax.f32 %v1374_v62, %v4558_v16  ;;  %v4561_v11 = vpop.f32.mrb[86].mxu0 }
 0x391   : > { %5578 = vst [vmem:[#allocation81_spill] sm:$0xff] %v4561_v11  ;;  %v1340_v0 = vmax.f32 %v1338_v26, %v4561_v11  ;;  %v4564_v23 = vpop.f32.mrb[87].mxu0 }
 0x392   : > { %5579 = vst [vmem:[#allocation82_spill] sm:$0xff] %v4564_v23  ;;  %v1377_v60 = vmax.f32 %v1375_v19, %v4564_v23 }
 0x396   : > { %v4567_v37 = vpop.f32.mrb[88].mxu0 }
 0x397   : > { %5580 = vst [vmem:[#allocation83_spill] sm:$0xff] %v4567_v37  ;;  %v1341_v36 = vmax.f32 %v1339_v25, %v4567_v37  ;;  %v4570_v12 = vpop.f32.mrb[89].mxu0 }
 0x398   : > { %5581 = vst [vmem:[#allocation84_spill] sm:$0xff] %v4570_v12  ;;  %v1378_v7 = vmax.f32 %v1376_v38, %v4570_v12  ;;  %v4573_v30 = vpop.f32.mrb[90].mxu0 }
 0x399   : > { %5582 = vst [vmem:[#allocation85_spill] sm:$0xff] %v4573_v30  ;;  %v1342_v62 = vmax.f32 %v1340_v0, %v4573_v30  ;;  %v4576_v16 = vpop.f32.mrb[91].mxu0 }
 0x39a   : > { %5583 = vst [vmem:[#allocation86_spill] sm:$0xff] %v4576_v16  ;;  %v1379_v26 = vmax.f32 %v1377_v60, %v4576_v16 }
 0x39e   : > { %v4579_v54 = vpop.f32.mrb[92].mxu0 }
 0x39f   : > { %5584 = vst [vmem:[#allocation87_spill] sm:$0xff] %v4579_v54  ;;  %v1343_v19 = vmax.f32 %v1341_v36, %v4579_v54  ;;  %v4582_v23 = vpop.f32.mrb[93].mxu0 }
 0x3a0   : > { %5585 = vst [vmem:[#allocation88_spill] sm:$0xff] %v4582_v23  ;;  %v1380_v25 = vmax.f32 %v1378_v7, %v4582_v23  ;;  %v1310_v47 = vpop.f32.mrb[94].mxu0 }
 0x3a1   : > { %v1344_v42 = vmax.f32 %v1342_v62, %v1310_v47  ;;  %v4585_v53 = vpop.f32.mrb[95].mxu0  ;;  %v5604_v54 = vld [vmem:[#allocation86_spill] sm:$0xff] }
 0x3a2   : > { %v1381_v38 = vmax.f32 %v1379_v26, %v4585_v53 }
 0x3a3   : > { %v1345_v12 = vmax.f32 %v1343_v19, %v1344_v42 }
 0x3a4   : > { %v1382_v0 = vmax.f32 %v1380_v25, %v1381_v38 }
 0x3a5   : > { %v1346_v1 = vrot.slane %v1345_v12, 4 }
 0x3a6   : > { %v1383_v32 = vrot.slane %v1382_v0, 4 }
 0x3a7   : > { %v1347_v55 = vmax.f32 %v1345_v12, %v1346_v1  ;;  %v5605_v30 = vld [vmem:[#allocation88_spill] sm:$0xff] }
 0x3a8   : > { %v1384_v60 = vmax.f32 %v1382_v0, %v1383_v32 }
 0x3a9   : > { %v1348_v16 = vrot.slane %v1347_v55, 2 }
 0x3aa   : > { %v1385_v45 = vrot.slane %v1384_v60, 2 }
 0x3ab   : > { %v1349_v49 = vmax.f32 %v1347_v55, %v1348_v16 }
 0x3ac   : > { %v1386_v36 = vmax.f32 %v1384_v60, %v1385_v45 }
 0x3ad   : > { %v1350_v21 = vrot.slane %v1349_v49, 1 }
 0x3ae   : > { %v1387_v7 = vrot.slane %v1386_v36, 1 }
 0x3af   : > { %v4588_v22 = vmax.f32 %v1349_v49, %v1350_v21 }
 0x3b0   : > { %v4611_v21 = vmax.f32 %v1386_v36, %v1387_v7 }
 0x3b1   : > { %v1451_v62 = vsub.f32 %v1310_v47, %v4588_v22 }
 0x3b2   : > { %v1390_v26 = vsub.f32 %v4401_v46, %v4611_v21  ;;  %v1392_v19 = vsub.f32 %v4405_v63, %v4611_v21  ;;  %v1394_v25 = vsub.f32 %v4411_v29, %v4611_v21  ;;  %v1398_v60 = vsub.f32 %v4426_v58, %v4611_v21  ;;  %v5586_v58 = vld [vmem:[#allocation55_spill] sm:$0xff] }
 0x3b3   : > { %v1577_v0 = vmul.f32 1.442695, %v1451_v62  ;;  %v1396_v62 = vsub.f32 %v4419_v3, %v4611_v21  ;;  %v1400_v36 = vsub.f32 %v4432_v13, %v4611_v21  ;;  %v1402_v7 = vsub.f32 %v4438_v18, %v4611_v21  ;;  %v5587_v13 = vld [vmem:[#allocation56_spill] sm:$0xff]  ;;  %v5588_v18 = vld [vmem:[#allocation57_spill] sm:$0xff] }
 0x3b4   : > { %v1404_v46 = vsub.f32 %v4444_v51, %v4611_v21  ;;  %v1406_v63 = vsub.f32 %v4450_v50, %v4611_v21  ;;  %v1408_v29 = vsub.f32 %v4456_v28, %v4611_v21  ;;  %v1410_v3 = vsub.f32 %v4462_v61, %v4611_v21  ;;  %v5589_v51 = vld [vmem:[#allocation58_spill] sm:$0xff]  ;;  %v5590_v50 = vld [vmem:[#allocation59_spill] sm:$0xff]  ;;  %v5591_v28 = vld [vmem:[#allocation60_spill] sm:$0xff] }
 0x3b5   : > { %v1412_v38 = vsub.f32 %v5586_v58, %v4611_v21  ;;  %v1414_v49 = vsub.f32 %v5587_v13, %v4611_v21  ;;  %v1416_v45 = vsub.f32 %v5588_v18, %v4611_v21  ;;  %v1418_v55 = vsub.f32 %v5589_v51, %v4611_v21  ;;  %v5592_v61 = vld [vmem:[#allocation62_spill] sm:$0xff]  ;;  %v5593_v58 = vld [vmem:[#allocation64_spill] sm:$0xff] }
 0x3b6   : > { %v1420_v47 = vsub.f32 %v5590_v50, %v4611_v21  ;;  %v1422_v12 = vsub.f32 %v5591_v28, %v4611_v21  ;;  %v1424_v16 = vsub.f32 %v5592_v61, %v4611_v21  ;;  %v1426_v32 = vsub.f32 %v5593_v58, %v4611_v21  ;;  %v5594_v13 = vld [vmem:[#allocation66_spill] sm:$0xff]  ;;  %v5595_v18 = vld [vmem:[#allocation68_spill] sm:$0xff] }
 0x3b7   : > { %v1428_v1 = vsub.f32 %v5594_v13, %v4611_v21  ;;  %v1430_v42 = vsub.f32 %v5595_v18, %v4611_v21  ;;  %v5596_v51 = vld [vmem:[#allocation70_spill] sm:$0xff]  ;;  %v5597_v50 = vld [vmem:[#allocation72_spill] sm:$0xff]  ;;  %v1452_v37 = vsub.f32 %v4585_v53, %v4611_v21  ;;  %v1455_v39 = vmul.f32 1.442695, %v1390_v26 }
 0x3b8   : > { %v1432_v23 = vsub.f32 %v5596_v51, %v4611_v21  ;;  %v5598_v28 = vld [vmem:[#allocation74_spill] sm:$0xff]  ;;  %v5599_v61 = vld [vmem:[#allocation76_spill] sm:$0xff]  ;;  %v1459_v11 = vmul.f32 1.442695, %v1392_v19  ;;  %3291 = vpow2.f32 %v1577_v0  ;;  %v1463_v52 = vmul.f32 1.442695, %v1394_v25 }
 0x3b9   : > { %v5600_v58 = vld [vmem:[#allocation78_spill] sm:$0xff]  ;;  %v5601_v13 = vld [vmem:[#allocation80_spill] sm:$0xff]  ;;  %v1467_v20 = vmul.f32 1.442695, %v1396_v62  ;;  %3293 = vpow2.f32 %v1455_v39  ;;  %v1471_v57 = vmul.f32 1.442695, %v1398_v60 }
 0x3ba   : > { %v5602_v18 = vld [vmem:[#allocation82_spill] sm:$0xff]  ;;  %v5603_v51 = vld [vmem:[#allocation84_spill] sm:$0xff]  ;;  %3295 = vpow2.f32 %v1459_v11  ;;  %v1475_v9 = vmul.f32 1.442695, %v1400_v36  ;;  %v1479_v27 = vmul.f32 1.442695, %v1402_v7 }
 0x3bb   : > { %3297 = vpow2.f32 %v1463_v52  ;;  %v1483_v15 = vmul.f32 1.442695, %v1404_v46  ;;  %v1487_v24 = vmul.f32 1.442695, %v1406_v63  ;;  %v1491_v35 = vmul.f32 1.442695, %v1408_v29 }
 0x3bc   : > { %3299 = vpow2.f32 %v1467_v20  ;;  %v1495_v6 = vmul.f32 1.442695, %v1410_v3  ;;  %v1499_v26 = vmul.f32 1.442695, %v1412_v38  ;;  %v1503_v19 = vmul.f32 1.442695, %v1414_v49 }
 0x3bd   : > { %3301 = vpow2.f32 %v1471_v57  ;;  %v1507_v39 = vmul.f32 1.442695, %v1416_v45  ;;  %v1511_v52 = vmul.f32 1.442695, %v1418_v55  ;;  %v1515_v20 = vmul.f32 1.442695, %v1420_v47 }
 0x3be   : > { %3303 = vpow2.f32 %v1475_v9  ;;  %v1519_v9 = vmul.f32 1.442695, %v1422_v12  ;;  %v1531_v55 = vmul.f32 1.442695, %v1428_v1  ;;  %v1535_v49 = vmul.f32 1.442695, %v1430_v42 }
 0x3bf   : > { %3305 = vpow2.f32 %v1479_v27  ;;  %v5608_v42 = vsub.f32 %v5598_v28, %v4611_v21  ;;  %v5609_v63 = vsub.f32 %v5599_v61, %v4611_v21  ;;  %v5610_v3 = vsub.f32 %v5600_v58, %v4611_v21  ;;  %v5666_v61 = vld [vmem:[#allocation83_spill] sm:$0xff] }
 0x3c0   : > { %3307 = vpow2.f32 %v1483_v15  ;;  %v1523_v15 = vmul.f32 1.442695, %v1424_v16  ;;  %v1539_v16 = vmul.f32 1.442695, %v1432_v23 }
 0x3c1   : > { %3309 = vpow2.f32 %v1487_v24  ;;  %v1547_v46 = vmul.f32 1.442695, %v5608_v42  ;;  %v1551_v23 = vmul.f32 1.442695, %v5609_v63  ;;  %v5615_v42 = vsub.f32 %v5605_v30, %v4611_v21  ;;  %v5652_v63 = vld [vmem:[#allocation69_spill] sm:$0xff] }
 0x3c2   : > { %v4719_v25 = vpop.eup %3291  ;;  %3311 = vpow2.f32 %v1491_v35  ;;  %v1527_v35 = vmul.f32 1.442695, %v1426_v32  ;;  %v5607_v32 = vsub.f32 %v5597_v50, %v4611_v21  ;;  %v1555_v50 = vmul.f32 1.442695, %v5610_v3 }
 0x3c3   : > { %5606 = vst [vmem:[#allocation55_spill] sm:$0xff] %v4719_v25  ;;  %v3294_v11 = vpop.eup %3293  ;;  %3313 = vpow2.f32 %v1495_v6  ;;  %v5616_v30 = vsub.f32 %v4399_v14, %v4588_v22 }
 0x3c4   : > { %v3296_v0 = vpop.eup %3295  ;;  %3315 = vpow2.f32 %v1499_v26  ;;  %v1543_v7 = vmul.f32 1.442695, %v5607_v32  ;;  %v5611_v26 = vsub.f32 %v5601_v13, %v4611_v21  ;;  %v5658_v13 = vld [vmem:[#allocation75_spill] sm:$0xff] }
 0x3c5   : > { %v4721_v57 = vpop.eup %3297  ;;  %3317 = vpow2.f32 %v1503_v19  ;;  %v1618_v27 = vadd.f32 %v3296_v0, %v3294_v11  ;;  %v1946_v28 = vpack.c.bf16 %v3296_v0, %v3294_v11  ;;  %v5612_v11 = vsub.f32 %v5602_v18, %v4611_v21 }
 0x3c6   : > { %v4723_v60 = vpop.eup %3299  ;;  %3319 = vpow2.f32 %v1507_v39  ;;  %v1559_v19 = vmul.f32 1.442695, %v5611_v26  ;;  %v5614_v18 = vsub.f32 %v5604_v54, %v4611_v21  ;;  %v1579_v54 = vmul.f32 1.442695, %v1452_v37 }
 0x3c7   : > { %v4725_v24 = vpop.eup %3301  ;;  %3321 = vpow2.f32 %v1511_v52  ;;  %v1619_v45 = vadd.f32 %v4721_v57, %v1618_v27  ;;  %v1563_v0 = vmul.f32 1.442695, %v5612_v11  ;;  %2025 = vmatprep.mubr.bf16.mxu1 %v1946_v28  ;;  %v1453_v26 = vmul.f32 1.442695, %v5616_v30  ;;  %v5650_v11 = vld [vmem:[#allocation67_spill] sm:$0xff]  ;;  %v5656_v27 = vld [vmem:[#allocation73_spill] sm:$0xff] }
 0x3c8   : > { %v4728_v6 = vpop.eup %3303  ;;  %3323 = vpow2.f32 %v1515_v20  ;;  %v5617_v28 = vsub.f32 %v4403_v48, %v4588_v22  ;;  %v5662_v20 = vld [vmem:[#allocation79_spill] sm:$0xff] }
 0x3c9   : > { %v4730_v47 = vpop.eup %3305  ;;  %3325 = vpow2.f32 %v1519_v9  ;;  %v1620_v12 = vadd.f32 %v4723_v60, %v1619_v45 }
 0x3ca   : > { %v4733_v38 = vpop.eup %3307  ;;  %3327 = vpow2.f32 %v1523_v15  ;;  %v1457_v53 = vmul.f32 1.442695, %v5617_v28  ;;  %v5628_v28 = vsub.f32 %v4441_v56, %v4588_v22 }
 0x3cb   : > { %v4735_v36 = vpop.eup %3309  ;;  %3329 = vpow2.f32 %v1527_v35  ;;  %v1621_v62 = vadd.f32 %v4725_v24, %v1620_v12 }
 0x3cc   : > { %v4741_v1 = vpop.eup %3311  ;;  %3331 = vpow2.f32 %v1531_v55  ;;  %v5613_v55 = vsub.f32 %v5603_v51, %v4611_v21  ;;  %v1575_v51 = vmul.f32 1.442695, %v5615_v42 }
 0x3cd   : > { %v4749_v29 = vpop.eup %3313  ;;  %3333 = vpow2.f32 %v1535_v49  ;;  %v1622_v39 = vadd.f32 %v4728_v6, %v1621_v62 }
 0x3ce   : > { %v4758_v52 = vpop.eup %3315  ;;  %3335 = vpow2.f32 %v1539_v16  ;;  %v1567_v49 = vmul.f32 1.442695, %v5613_v55  ;;  %v5620_v55 = vsub.f32 %v4415_v59, %v4588_v22  ;;  %v5654_v16 = vld [vmem:[#allocation71_spill] sm:$0xff] }
 0x3cf   : > { %v4764_v9 = vpop.eup %3317  ;;  %3337 = vpow2.f32 %v1543_v7  ;;  %v1623_v58 = vadd.f32 %v4730_v47, %v1622_v39  ;;  %v1571_v7 = vmul.f32 1.442695, %v5614_v18  ;;  %v5622_v18 = vsub.f32 %v4423_v43, %v4588_v22 }
 0x3d0   : > { %v4771_v15 = vpop.eup %3319  ;;  %3339 = vpow2.f32 %v1547_v46  ;;  %v1465_v48 = vmul.f32 1.442695, %v5620_v55 }
 0x3d1   : > { %v4778_v45 = vpop.eup %3321  ;;  %3341 = vpow2.f32 %v1551_v23  ;;  %v1624_v12 = vadd.f32 %v4733_v38, %v1623_v58  ;;  %v5619_v58 = vsub.f32 %v4407_v2, %v4588_v22  ;;  %v5648_v2 = vld [vmem:[#allocation65_spill] sm:$0xff] }
 0x3d2   : > { %v4786_v32 = vpop.eup %3323  ;;  %3343 = vpow2.f32 %v1555_v50 }
 0x3d3   : > { %v4791_v62 = vpop.eup %3325  ;;  %3345 = vpow2.f32 %v1559_v19  ;;  %v1625_v46 = vadd.f32 %v4735_v36, %v1624_v12  ;;  %v1461_v14 = vmul.f32 1.442695, %v5619_v58  ;;  %v5630_v58 = vsub.f32 %v4447_v33, %v4588_v22 }
 0x3d4   : > { %v4799_v23 = vpop.eup %3327  ;;  %3347 = vpow2.f32 %v1563_v0 }
 0x3d5   : > { %v4804_v3 = vpop.eup %3329  ;;  %3349 = vpow2.f32 %v1567_v49  ;;  %v1626_v50 = vadd.f32 %v4741_v1, %v1625_v46 }
 0x3d6   : > { %v4812_v39 = vpop.eup %3331  ;;  %3351 = vpow2.f32 %v1571_v7  ;;  %v1469_v7 = vmul.f32 1.442695, %v5622_v18 }
 0x3d7   : > { %v4817_v37 = vpop.eup %3333  ;;  %3353 = vpow2.f32 %v1575_v51  ;;  %v1627_v21 = vadd.f32 %v4749_v29, %v1626_v50  ;;  %v5624_v51 = vsub.f32 %v4429_v17, %v4588_v22  ;;  %v5626_v50 = vsub.f32 %v4435_v4, %v4588_v22 }
 0x3d8   : > { %5618 = vst [vmem:[#allocation56_spill] sm:$0xff] %v4817_v37  ;;  %v4825_v0 = vpop.eup %3335  ;;  %3355 = vpow2.f32 %v1579_v54  ;;  %v1481_v17 = vmul.f32 1.442695, %v5628_v28  ;;  %v1485_v4 = vmul.f32 1.442695, %v5630_v58 }
 0x3d9   : > { %v4830_v49 = vpop.eup %3337  ;;  %v1628_v12 = vadd.f32 %v4758_v52, %v1627_v21  ;;  %3357 = vpow2.f32 %v1453_v26  ;;  %v1473_v46 = vmul.f32 1.442695, %v5624_v51  ;;  %v1477_v43 = vmul.f32 1.442695, %v5626_v50 }
 0x3da   : > { %5621 = vst [vmem:[#allocation57_spill] sm:$0xff] %v4830_v49  ;;  %v4838_v42 = vpop.eup %3339  ;;  %3359 = vpow2.f32 %v1457_v53  ;;  %v5634_v51 = vsub.f32 %v4459_v10, %v4588_v22  ;;  %v5636_v50 = vsub.f32 %v4465_v44, %v4588_v22 }
 0x3db   : > { %5623 = vst [vmem:[#allocation58_spill] sm:$0xff] %v4838_v42  ;;  %v4843_v59 = vpop.eup %3341  ;;  %v1629_v54 = vadd.f32 %v4764_v9, %v1628_v12  ;;  %3361 = vpow2.f32 %v1461_v14  ;;  %v5632_v12 = vsub.f32 %v4453_v40, %v4588_v22  ;;  %v5664_v14 = vld [vmem:[#allocation81_spill] sm:$0xff] }
 0x3dc   : > { %5625 = vst [vmem:[#allocation59_spill] sm:$0xff] %v4843_v59  ;;  %v4851_v26 = vpop.eup %3343  ;;  %3363 = vpow2.f32 %v1465_v48  ;;  %v1493_v33 = vmul.f32 1.442695, %v5634_v51  ;;  %v1497_v40 = vmul.f32 1.442695, %v5636_v50 }
 0x3dd   : > { %5627 = vst [vmem:[#allocation60_spill] sm:$0xff] %v4851_v26  ;;  %v4856_v53 = vpop.eup %3345  ;;  %v1630_v21 = vadd.f32 %v4771_v15, %v1629_v54  ;;  %3365 = vpow2.f32 %v1469_v7  ;;  %v1489_v56 = vmul.f32 1.442695, %v5632_v12  ;;  %v5640_v12 = vsub.f32 %v4477_v31, %v4588_v22 }
 0x3de   : > { %5629 = vst [vmem:[#allocation62_spill] sm:$0xff] %v4856_v53  ;;  %v4864_v55 = vpop.eup %3347  ;;  %3367 = vpow2.f32 %v1473_v46 }
 0x3df   : > { %5631 = vst [vmem:[#allocation64_spill] sm:$0xff] %v4864_v55  ;;  %v4869_v48 = vpop.eup %3349  ;;  %v1631_v18 = vadd.f32 %v4778_v45, %v1630_v21  ;;  %3369 = vpow2.f32 %v1477_v43  ;;  %v5638_v21 = vsub.f32 %v4471_v5, %v4588_v22  ;;  %v1505_v44 = vmul.f32 1.442695, %v5640_v12 }
 0x3e0   : > { %5633 = vst [vmem:[#allocation66_spill] sm:$0xff] %v4869_v48  ;;  %v4877_v54 = vpop.eup %3351  ;;  %3371 = vpow2.f32 %v1481_v17 }
 0x3e1   : > { %5635 = vst [vmem:[#allocation68_spill] sm:$0xff] %v4877_v54  ;;  %v4882_v46 = vpop.eup %3353  ;;  %v1632_v28 = vadd.f32 %v4786_v32, %v1631_v18  ;;  %v1501_v10 = vmul.f32 1.442695, %v5638_v21  ;;  %3373 = vpow2.f32 %v1485_v4  ;;  %v5641_v18 = vsub.f32 %v4483_v34, %v4588_v22 }
 0x3e2   : > { %5637 = vst [vmem:[#allocation70_spill] sm:$0xff] %v4882_v46  ;;  %v4890_v58 = vpop.eup %3355  ;;  %3375 = vpow2.f32 %v1489_v56  ;;  %v5642_v21 = vsub.f32 %v4489_v8, %v4588_v22  ;;  %v5643_v56 = vsub.f32 %v4495_v41, %v4588_v22  ;;  %v5644_v8 = vld [vmem:[#allocation61_spill] sm:$0xff]  ;;  %v5646_v41 = vld [vmem:[#allocation63_spill] sm:$0xff] }
 0x3e3   : > { %5639 = vst [vmem:[#allocation72_spill] sm:$0xff] %v4890_v58  ;;  %v4895_v17 = vpop.eup %3357  ;;  %v1633_v51 = vadd.f32 %v4791_v62, %v1632_v28  ;;  %v1509_v5 = vmul.f32 1.442695, %v5641_v18  ;;  %3377 = vpow2.f32 %v1493_v33  ;;  %v5668_v18 = vld [vmem:[#allocation85_spill] sm:$0xff] }
 0x3e4   : > { %v4903_v50 = vpop.eup %3359  ;;  %v1513_v31 = vmul.f32 1.442695, %v5642_v21  ;;  %v1517_v12 = vmul.f32 1.442695, %v5643_v56  ;;  %3379 = vpow2.f32 %v1497_v40  ;;  %v5645_v21 = vsub.f32 %v5644_v8, %v4588_v22 }
 0x3e5   : > { %v4911_v28 = vpop.eup %3361  ;;  %v1634_v34 = vadd.f32 %v4799_v23, %v1633_v51  ;;  %3381 = vpow2.f32 %v1501_v10  ;;  %v1581_v33 = vadd.f32 %v4903_v50, %v4895_v17  ;;  %v5647_v40 = vsub.f32 %v5646_v41, %v4588_v22 }
 0x3e6   : > { %v4918_v4 = vpop.eup %3363  ;;  %v1521_v43 = vmul.f32 1.442695, %v5645_v21  ;;  %3383 = vpow2.f32 %v1505_v44  ;;  %v5649_v8 = vsub.f32 %v5648_v2, %v4588_v22  ;;  %v5651_v41 = vsub.f32 %v5650_v11, %v4588_v22 }
 0x3e7   : > { %v1525_v56 = vmul.f32 1.442695, %v5647_v40  ;;  %v4926_v7 = vpop.eup %3365  ;;  %v1635_v10 = vadd.f32 %v4804_v3, %v1634_v34  ;;  %3385 = vpow2.f32 %v1509_v5  ;;  %v1582_v51 = vadd.f32 %v4911_v28, %v1581_v33  ;;  %v5660_v33 = vld [vmem:[#allocation77_spill] sm:$0xff] }
 0x3e8   : > { %v4932_v30 = vpop.eup %3367  ;;  %v1529_v21 = vmul.f32 1.442695, %v5649_v8  ;;  %v1533_v44 = vmul.f32 1.442695, %v5651_v41  ;;  %3387 = vpow2.f32 %v1513_v31  ;;  %v5653_v2 = vsub.f32 %v5652_v63, %v4588_v22 }
 0x3e9   : > { %v4940_v40 = vpop.eup %3369  ;;  %v1636_v5 = vadd.f32 %v4812_v39, %v1635_v10  ;;  %3389 = vpow2.f32 %v1517_v12  ;;  %v1583_v34 = vadd.f32 %v4918_v4, %v1582_v51  ;;  %v5655_v11 = vsub.f32 %v5654_v16, %v4588_v22 }
 0x3ea   : > { %v4946_v19 = vpop.eup %3371  ;;  %v1537_v8 = vmul.f32 1.442695, %v5653_v2  ;;  %3391 = vpow2.f32 %v1521_v43  ;;  %v5657_v63 = vsub.f32 %v5656_v27, %v4588_v22  ;;  %v5659_v16 = vsub.f32 %v5658_v13, %v4588_v22 }
 0x3eb   : > { %v1541_v31 = vmul.f32 1.442695, %v5655_v11  ;;  %v4954_v41 = vpop.eup %3373  ;;  %v1637_v12 = vadd.f32 %v4817_v37, %v1636_v5  ;;  %3393 = vpow2.f32 %v1525_v56  ;;  %v1584_v10 = vadd.f32 %v4926_v7, %v1583_v34 }
 0x3ec   : > { %v4960_v35 = vpop.eup %3375  ;;  %v1545_v2 = vmul.f32 1.442695, %v5657_v63  ;;  %v1549_v43 = vmul.f32 1.442695, %v5659_v16  ;;  %3395 = vpow2.f32 %v1529_v21  ;;  %v5661_v27 = vsub.f32 %v5660_v33, %v4588_v22 }
 0x3ed   : > { %v4968_v11 = vpop.eup %3377  ;;  %v1638_v56 = vadd.f32 %v4825_v0, %v1637_v12  ;;  %3397 = vpow2.f32 %v1533_v44  ;;  %v1585_v5 = vadd.f32 %v4932_v30, %v1584_v10  ;;  %v5663_v13 = vsub.f32 %v5662_v20, %v4588_v22 }
 0x3ee   : > { %v4974_v51 = vpop.eup %3379  ;;  %v1553_v63 = vmul.f32 1.442695, %v5661_v27  ;;  %3399 = vpow2.f32 %v1537_v8  ;;  %v5665_v33 = vsub.f32 %v5664_v14, %v4588_v22  ;;  %v5667_v20 = vsub.f32 %v5666_v61, %v4588_v22 }
 0x3ef   : > { %v1557_v21 = vmul.f32 1.442695, %v5663_v13  ;;  %v4982_v16 = vpop.eup %3381  ;;  %v1639_v44 = vadd.f32 %v4830_v49, %v1638_v56  ;;  %3401 = vpow2.f32 %v1541_v31  ;;  %v1586_v12 = vadd.f32 %v4940_v40, %v1585_v5  ;;  %v5670_v49 = vld [vmem:[#allocation87_spill] sm:$0xff] }
 0x3f0   : > { %v4988_v34 = vpop.eup %3383  ;;  %v1561_v27 = vmul.f32 1.442695, %v5665_v33  ;;  %v1565_v8 = vmul.f32 1.442695, %v5667_v20  ;;  %3403 = vpow2.f32 %v1545_v2  ;;  %v5669_v14 = vsub.f32 %v5668_v18, %v4588_v22 }
 0x3f1   : > { %v4996_v13 = vpop.eup %3385  ;;  %v1640_v31 = vadd.f32 %v4838_v42, %v1639_v44  ;;  %3405 = vpow2.f32 %v1549_v43  ;;  %v1587_v56 = vadd.f32 %v4946_v19, %v1586_v12  ;;  %v5671_v61 = vsub.f32 %v5670_v49, %v4588_v22 }
 0x3f2   : > { %v5002_v10 = vpop.eup %3387  ;;  %v1569_v33 = vmul.f32 1.442695, %v5669_v14  ;;  %3407 = vpow2.f32 %v1553_v63 }
 0x3f3   : > { %v1573_v2 = vmul.f32 1.442695, %v5671_v61  ;;  %v5010_v20 = vpop.eup %3389  ;;  %v1641_v43 = vadd.f32 %v4843_v59, %v1640_v31  ;;  %3409 = vpow2.f32 %v1557_v21  ;;  %v1588_v44 = vadd.f32 %v4954_v41, %v1587_v56 }
 0x3f4   : > { %v5016_v5 = vpop.eup %3391  ;;  %3411 = vpow2.f32 %v1561_v27 }
 0x3f5   : > { %v5018_v18 = vpop.eup %3393  ;;  %v1642_v14 = vadd.f32 %v4851_v26, %v1641_v43  ;;  %3413 = vpow2.f32 %v1565_v8  ;;  %v1589_v22 = vadd.f32 %v4960_v35, %v1588_v44 }
 0x3f6   : > { %v5024_v63 = vpop.eup %3395  ;;  %3415 = vpow2.f32 %v1569_v33 }
 0x3f7   : > { %v5026_v21 = vpop.eup %3397  ;;  %v1643_v31 = vadd.f32 %v4856_v53, %v1642_v14  ;;  %3417 = vpow2.f32 %v1573_v2  ;;  %v1590_v27 = vadd.f32 %v4968_v11, %v1589_v22 }
 0x3f8   : > { %5672 = vst [vmem:[#allocation74_spill] sm:$0xff] %v5026_v21  ;;  %v5032_v61 = vpop.eup %3399 }
 0x3f9   : > { %5673 = vst [vmem:[#allocation76_spill] sm:$0xff] %v5032_v61  ;;  %v5034_v8 = vpop.eup %3401  ;;  %v1644_v43 = vadd.f32 %v4864_v55, %v1643_v31  ;;  %v1591_v44 = vadd.f32 %v4974_v51, %v1590_v27 }
 0x3fa   : > { %5674 = vst [vmem:[#allocation78_spill] sm:$0xff] %v5034_v8  ;;  %v5040_v49 = vpop.eup %3403 }
 0x3fb   : > { %5675 = vst [vmem:[#allocation80_spill] sm:$0xff] %v5040_v49  ;;  %v5042_v14 = vpop.eup %3405  ;;  %v1645_v2 = vadd.f32 %v4869_v48, %v1644_v43  ;;  %v1592_v22 = vadd.f32 %v4982_v16, %v1591_v44 }
 0x3fc   : > { %5676 = vst [vmem:[#allocation82_spill] sm:$0xff] %v5042_v14  ;;  %v5048_v12 = vpop.eup %3407 }
 0x3fd   : > { %5677 = vst [vmem:[#allocation84_spill] sm:$0xff] %v5048_v12  ;;  %v5050_v53 = vpop.eup %3409  ;;  %v1646_v31 = vadd.f32 %v4877_v54, %v1645_v2  ;;  %v1593_v27 = vadd.f32 %v4988_v34, %v1592_v22 }
 0x3fe   : > { %5678 = vst [vmem:[#allocation86_spill] sm:$0xff] %v5050_v53  ;;  %v5056_v55 = vpop.eup %3411 }
 0x3ff   : > { %5679 = vst [vmem:[#allocation88_spill] sm:$0xff] %v5056_v55  ;;  %v5058_v59 = vpop.eup %3413  ;;  %v1647_v43 = vadd.f32 %v4882_v46, %v1646_v31  ;;  %v1594_v44 = vadd.f32 %v4996_v13, %v1593_v27 }
 0x400   : > { %5680 = vst [vmem:[#allocation61_spill] sm:$0xff] %v5058_v59  ;;  %v5064_v48 = vpop.eup %3415 }
 0x401   : > { %5681 = vst [vmem:[#allocation63_spill] sm:$0xff] %v5064_v48  ;;  %v5066_v26 = vpop.eup %3417  ;;  %v1648_v2 = vadd.f32 %v4890_v58, %v1647_v43  ;;  %v1595_v22 = vadd.f32 %v5002_v10, %v1594_v44 }
 0x402   : > { %5682 = vst [vmem:[#allocation65_spill] sm:$0xff] %v5066_v26 }
 0x403   : > { %v1596_v31 = vadd.f32 %v5010_v20, %v1595_v22 }
 0x405   : > { %v1597_v27 = vadd.f32 %v5016_v5, %v1596_v31 }
 0x407   : > { %v1598_v56 = vadd.f32 %v5018_v18, %v1597_v27 }
 0x409   : > { %v1599_v46 = vadd.f32 %v5024_v63, %v1598_v56 }
 0x40b   : > { %v1600_v42 = vadd.f32 %v5026_v21, %v1599_v46 }
 0x40d   : > { %v1601_v43 = vadd.f32 %v5032_v61, %v1600_v42 }
 0x40f   : > { %v1602_v44 = vadd.f32 %v5034_v8, %v1601_v43 }
 0x411   : > { %v1603_v58 = vadd.f32 %v5040_v49, %v1602_v44 }
 0x413   : > { %v1604_v33 = vadd.f32 %v5042_v14, %v1603_v58 }
 0x415   : > { %v1605_v54 = vadd.f32 %v5048_v12, %v1604_v33 }
 0x417   : > { %v1606_v22 = vadd.f32 %v5050_v53, %v1605_v54  ;;  %v1649_v54 = vrot.slane %v1648_v2, 4 }
 0x419   : > { %v1607_v31 = vadd.f32 %v5056_v55, %v1606_v22  ;;  %v1650_v53 = vadd.f32 %v1649_v54, %v1648_v2 }
 0x41b   : > { %v1608_v27 = vadd.f32 %v5058_v59, %v1607_v31  ;;  %v1651_v22 = vrot.slane %v1650_v53, 2 }
 0x41d   : > { %v1609_v56 = vadd.f32 %v5064_v48, %v1608_v27  ;;  %v1652_v55 = vadd.f32 %v1651_v22, %v1650_v53 }
 0x41f   : > { %v1610_v46 = vadd.f32 %v5066_v26, %v1609_v56  ;;  %v1653_v31 = vrot.slane %v1652_v55, 1  ;;  %v5683_v56 = vmov 0  }
 0x421   : > { %v1611_v42 = vadd.f32 %v4719_v25, %v1610_v46  ;;  %v1654_v59 = vadd.f32 %v1653_v31, %v1652_v55 }
 0x423   : > { %v1612_v21 = vrot.slane %v1611_v42, 4 }
 0x425   : > { %v1613_v43 = vadd.f32 %v1612_v21, %v1611_v42 }
 0x427   : > { %v1614_v8 = vrot.slane %v1613_v43, 2 }
 0x429   : > { %v1615_v44 = vadd.f32 %v1614_v8, %v1613_v43 }
 0x42b   : > { %v1616_v49 = vrot.slane %v1615_v44, 1 }
 0x42d   : > { %v1617_v58 = vadd.f32 %v1616_v49, %v1615_v44 }
 0x42f   : > { %3419 = vrcp.f32 %v1617_v58 }
 0x430   : > { %3421 = vrcp.f32 %v1654_v59 }
 0x439   : > { %v3420_v33 = vpop.eup %3419 }
 0x43a   : > { %1657 = vxpose.xlu0.b32.start.end [1/1] (short) %v3420_v33, 128  ;;  %v3422_v27 = vpop.eup %3421 }
 0x477   : > { %1689 = vxpose.xlu0.b32.start.end [1/1] (short) %v3422_v27, 128 }
 0x4a0   : > { %3250 = vset.pattern.permute.xlu0 %v5683_v56 }
 0x4ba   : > { %v1673_v46 = vpop.trf.xlu0 }
 0x4bb   : > { %1723 = vperm.xlu1 %3249, %v1673_v46  }
 0x4be   : > { %v1674_v21 = vpop.trf.xlu0 }
 0x4c2   : > { %v1675_v8 = vpop.trf.xlu0 }
 0x4c6   : > { %v1676_v42 = vpop.trf.xlu0 }
 0x4ca   : > { %v1677_v49 = vpop.trf.xlu0 }
 0x4ce   : > { %v1678_v43 = vpop.trf.xlu0 }
 0x4d2   : > { %v1679_v44 = vpop.trf.xlu0 }
 0x4d6   : > { %v1680_v58 = vpop.trf.xlu0 }
 0x4da   : > { %v1681_v33 = vpop.trf.xlu0 }
 0x4de   : > { %v1682_v2 = vpop.trf.xlu0 }
 0x4e2   : > { %v1683_v54 = vpop.trf.xlu0 }
 0x4e6   : > { %v1684_v53 = vpop.trf.xlu0 }
 0x4ea   : > { %v1685_v22 = vpop.trf.xlu0 }
 0x4ee   : > { %v1686_v55 = vpop.trf.xlu0 }
 0x4f2   : > { %v1687_v59 = vpop.trf.xlu0 }
 0x4f6   : > { %v1688_v31 = vpop.trf.xlu0 }
 0x4fa   : > { %v1705_v27 = vpop.trf.xlu0 }
 0x4fb   : > { %1803 = vperm.xlu1 %3249, %v1705_v27  }
 0x4fe   : > { %v1706_v56 = vpop.trf.xlu0 }
 0x4ff   : > { %1728 = vperm.xlu1 %3249, %v1674_v21  }
 0x502   : > { %v1707_v46 = vpop.trf.xlu0 }
 0x503   : > { %1808 = vperm.xlu1 %3249, %v1706_v56  }
 0x506   : > { %v1708_v26 = vpop.trf.xlu0 }
 0x507   : > { %1733 = vperm.xlu1 %3249, %v1675_v8  }
 0x50a   : > { %v1709_v25 = vpop.trf.xlu0 }
 0x50b   : > { %1813 = vperm.xlu1 %3249, %v1707_v46  }
 0x50e   : > { %v1710_v48 = vpop.trf.xlu0 }
 0x50f   : > { %1738 = vperm.xlu1 %3249, %v1676_v42   ;;  %v3423_v42 = vld [vmem:[#allocation12] sm:$0x3] }
 0x512   : > { %v1711_v14 = vpop.trf.xlu0 }
 0x513   : > { %1818 = vperm.xlu1 %3249, %v1708_v26  }
 0x516   : > { %v1712_v12 = vpop.trf.xlu0 }
 0x517   : > { %1743 = vperm.xlu1 %3249, %v1677_v49  }
 0x51a   : > { %v1713_v61 = vpop.trf.xlu0 }
 0x51b   : > { %1823 = vperm.xlu1 %3249, %v1709_v25  }
 0x51e   : > { %v1714_v37 = vpop.trf.xlu0 }
 0x51f   : > { %1748 = vperm.xlu1 %3249, %v1678_v43   ;;  %1848 = vperm.xlu0 %3250, %v1714_v37  }
 0x522   : > { %v1715_v21 = vpop.trf.xlu0 }
 0x523   : > { %1828 = vperm.xlu1 %3249, %v1710_v48  }
 0x526   : > { %v1716_v26 = vpop.trf.xlu0 }
 0x527   : > { %1753 = vperm.xlu1 %3249, %v1679_v44   ;;  %v5685_v44 = vld [vmem:[#allocation23_spill] sm:$0xff] }
 0x52a   : > { %v1717_v8 = vpop.trf.xlu0 }
 0x52b   : > { %1833 = vperm.xlu1 %3249, %v1711_v14  }
 0x52e   : > { %v1718_v25 = vpop.trf.xlu0 }
 0x52f   : > { %1758 = vperm.xlu1 %3249, %v1680_v58  }
 0x532   : > { %v1719_v37 = vpop.trf.xlu0 }
 0x533   : > { %1838 = vperm.xlu1 %3249, %v1712_v12   ;;  %v5684_v12 = vld [vmem:[#allocation22_spill] sm:$0xff] }
 0x536   : > { %v1720_v48 = vpop.trf.xlu0 }
 0x537   : > { %1843 = vperm.xlu1 %3249, %v1713_v61   ;;  %v813_v61 = vsub.s32 1, %v5684_v12 }
 0x539   : > { %v5092_v49 = vrot.slane %v3423_v42, %v813_v61  ;;  %v5690_v61 = vld [vmem:[#allocation26_spill] sm:$0xff] }
 0x53a   : > { %v1724_v14 = vpop.permute.xlu1 %1723 }
 0x53b   : > { %1763 = vperm.xlu1 %3249, %v1681_v33   ;;  %v934_v58 = vadd.f32 %v5685_v44, %v5092_v49  ;;  %v5686_v33 = vld [vmem:[#allocation24_spill] sm:$0xff] }
 0x53f   : > { %1768 = vperm.xlu1 %3249, %v1682_v2   ;;  %v938_v2 = vadd.f32 %v5686_v33, %v5092_v49  ;;  %v5691_v33 = vld [vmem:[#allocation41_spill] sm:$0xff] }
 0x543   : > { %1773 = vperm.xlu1 %3249, %v1683_v54  }
 0x547   : > { %1853 = vperm.xlu1 %3249, %v1715_v21  }
 0x54b   : > { %1778 = vperm.xlu1 %3249, %v1684_v53   ;;  %v1881_v53 = vmul.f32 %v1724_v14, %v934_v58  ;;  %v948_v14 = vadd.f32 %v5690_v61, %v5092_v49  ;;  %v5695_v61 = vld [vmem:[#allocation43_spill] sm:$0xff] }
 0x54f   : > { %1858 = vperm.xlu1 %3249, %v1716_v26  }
 0x553   : > { %1783 = vperm.xlu1 %3249, %v1685_v22  }
 0x557   : > { %1863 = vperm.xlu1 %3249, %v1717_v8  }
 0x55b   : > { %1788 = vperm.xlu1 %3249, %v1686_v55   ;;  %v5687_v55 = vld [vmem:[#allocation39_spill] sm:$0xff] }
 0x55f   : > { %1868 = vperm.xlu1 %3249, %v1718_v25  }
 0x563   : > { %1793 = vperm.xlu1 %3249, %v1687_v59   ;;  %v1014_v59 = vadd.f32 %v5687_v55, %v5092_v49 }
 0x567   : > { %1873 = vperm.xlu1 %3249, %v1719_v37  }
 0x56b   : > { %1878 = vperm.xlu1 %3249, %v1720_v48   ;;  %v5689_v48 = vld [vmem:[#allocation25_spill] sm:$0xff] }
 0x56c   : > { %v944_v12 = vadd.f32 %v5689_v48, %v5092_v49 }
 0x56f   : > { %1798 = vperm.xlu1 %3249, %v1688_v31   ;;  %v5688_v31 = vld [vmem:[#allocation40_spill] sm:$0xff] }
 0x570   : > { %v1018_v27 = vadd.f32 %v5688_v31, %v5092_v49 }
 0x57a   : > { %v1804_v43 = vpop.permute.xlu1 %1803 }
 0x57b   : > { %v1897_v21 = vmul.f32 %v1804_v43, %v1014_v59  ;;  %v5692_v43 = vld [vmem:[#allocation42_spill] sm:$0xff] }
 0x57e   : > { %v1729_v54 = vpop.permute.xlu1 %1728 }
 0x57f   : > { %v1882_v22 = vmul.f32 %v1729_v54, %v938_v2  ;;  %v1024_v2 = vadd.f32 %v5691_v33, %v5092_v49  ;;  %v1028_v54 = vadd.f32 %v5692_v43, %v5092_v49 }
 0x581   : > { %v1977_v56 = vpack.c.bf16 %v1882_v22, %v1881_v53 }
 0x582   : > { %v1809_v46 = vpop.permute.xlu1 %1808 }
 0x583   : > { %v1898_v26 = vmul.f32 %v1809_v46, %v1018_v27  ;;  %v5693_v46 = vld [vmem:[#allocation27_spill] sm:$0xff] }
 0x585   : > { %v1985_v8 = vpack.c.bf16 %v1898_v26, %v1897_v21  ;;  %v954_v21 = vadd.f32 %v5693_v46, %v5092_v49  ;;  %v5694_v26 = vld [vmem:[#allocation28_spill] sm:$0xff] }
 0x586   : > { %v1734_v25 = vpop.permute.xlu1 %1733 }
 0x587   : > { %2886 = vmatprep.subr.bf16.mxu1 %v1985_v8  ;;  %v1883_v44 = vmul.f32 %v1734_v25, %v944_v12  ;;  %v958_v8 = vadd.f32 %v5694_v26, %v5092_v49  ;;  %v5699_v26 = vld [vmem:[#allocation45_spill] sm:$0xff] }
 0x588   : > { %2887 = vmatpush3.bf16.msra.mxu1 %v1977_v56 }
 0x58a   : > { %v1814_v37 = vpop.permute.xlu1 %1813 }
 0x58b   : > { %v1899_v55 = vmul.f32 %v1814_v37, %v1024_v2  ;;  %v5696_v37 = vld [vmem:[#allocation44_spill] sm:$0xff] }
 0x58e   : > { %v1739_v42 = vpop.permute.xlu1 %1738 }
 0x58f   : > { %v1884_v58 = vmul.f32 %v1739_v42, %v948_v14  ;;  %v1034_v14 = vadd.f32 %v5695_v61, %v5092_v49  ;;  %v1038_v42 = vadd.f32 %v5696_v37, %v5092_v49 }
 0x591   : > { %v1978_v53 = vpack.c.bf16 %v1884_v58, %v1883_v44 }
 0x592   : > { %v1819_v22 = vpop.permute.xlu1 %1818 }
 0x593   : > { %v1900_v59 = vmul.f32 %v1819_v22, %v1028_v54  ;;  %v5697_v22 = vld [vmem:[#allocation29_spill] sm:$0xff] }
 0x595   : > { %v1986_v31 = vpack.c.bf16 %v1900_v59, %v1899_v55  ;;  %v964_v55 = vadd.f32 %v5697_v22, %v5092_v49  ;;  %v5698_v59 = vld [vmem:[#allocation30_spill] sm:$0xff] }
 0x596   : > { %v1744_v27 = vpop.permute.xlu1 %1743 }
 0x597   : > { %2888 = vmatprep.subr.bf16.mxu1 %v1986_v31  ;;  %v1885_v48 = vmul.f32 %v1744_v27, %v954_v21  ;;  %v968_v31 = vadd.f32 %v5698_v59, %v5092_v49 }
 0x598   : > { %2889 = vmatpush3.bf16.msra.mxu1 %v1978_v53 }
 0x59a   : > { %v1824_v56 = vpop.permute.xlu1 %1823 }
 0x59b   : > { %v1901_v33 = vmul.f32 %v1824_v56, %v1034_v14  ;;  %v5700_v56 = vld [vmem:[#allocation46_spill] sm:$0xff] }
 0x59e   : > { %v1749_v25 = vpop.permute.xlu1 %1748  ;;  %v1849_v37 = vpop.permute.xlu0 %1848 }
 0x59f   : > { %v1886_v12 = vmul.f32 %v1749_v25, %v958_v8  ;;  %v1044_v8 = vadd.f32 %v5699_v26, %v5092_v49  ;;  %v1048_v25 = vadd.f32 %v5700_v56, %v5092_v49 }
 0x5a1   : > { %v1979_v44 = vpack.c.bf16 %v1886_v12, %v1885_v48 }
 0x5a2   : > { %v1829_v58 = vpop.permute.xlu1 %1828 }
 0x5a3   : > { %v1902_v2 = vmul.f32 %v1829_v58, %v1038_v42  ;;  %v5701_v42 = vld [vmem:[#allocation47_spill] sm:$0xff]  ;;  %v5702_v58 = vld [vmem:[#allocation48_spill] sm:$0xff] }
 0x5a5   : > { %v1987_v43 = vpack.c.bf16 %v1902_v2, %v1901_v33  ;;  %v1058_v33 = vadd.f32 %v5702_v58, %v5092_v49 }
 0x5a6   : > { %v1754_v54 = vpop.permute.xlu1 %1753 }
 0x5a7   : > { %2890 = vmatprep.subr.bf16.mxu1 %v1987_v43  ;;  %v1887_v46 = vmul.f32 %v1754_v54, %v964_v55  ;;  %v1906_v54 = vmul.f32 %v1849_v37, %v1058_v33  ;;  %v5707_v33 = vld [vmem:[#allocation49_spill] sm:$0xff] }
 0x5a8   : > { %2891 = vmatpush3.bf16.msra.mxu1 %v1979_v44  ;;  %v1054_v44 = vadd.f32 %v5701_v42, %v5092_v49 }
 0x5aa   : > { %v1834_v53 = vpop.permute.xlu1 %1833 }
 0x5ab   : > { %v1903_v61 = vmul.f32 %v1834_v53, %v1044_v8 }
 0x5ae   : > { %v1759_v27 = vpop.permute.xlu1 %1758 }
 0x5af   : > { %v1888_v21 = vmul.f32 %v1759_v27, %v968_v31  ;;  %v5703_v31 = vld [vmem:[#allocation31_spill] sm:$0xff]  ;;  %v5704_v27 = vld [vmem:[#allocation32_spill] sm:$0xff] }
 0x5b0   : > { %v974_v53 = vadd.f32 %v5703_v31, %v5092_v49 }
 0x5b1   : > { %v1980_v48 = vpack.c.bf16 %v1888_v21, %v1887_v46  ;;  %v978_v46 = vadd.f32 %v5704_v27, %v5092_v49 }
 0x5b2   : > { %v1839_v12 = vpop.permute.xlu1 %1838 }
 0x5b3   : > { %v1904_v14 = vmul.f32 %v1839_v12, %v1048_v25 }
 0x5b5   : > { %v1988_v2 = vpack.c.bf16 %v1904_v14, %v1903_v61  ;;  %v5705_v61 = vld [vmem:[#allocation33_spill] sm:$0xff] }
 0x5b6   : > { %v1844_v43 = vpop.permute.xlu1 %1843  ;;  %v984_v14 = vadd.f32 %v5705_v61, %v5092_v49 }
 0x5b7   : > { %v1905_v22 = vmul.f32 %v1844_v43, %v1054_v44  ;;  %2892 = vmatprep.subr.bf16.mxu1 %v1988_v2  ;;  %v1064_v2 = vadd.f32 %v5707_v33, %v5092_v49  ;;  %v5708_v43 = vld [vmem:[#allocation50_spill] sm:$0xff] }
 0x5b8   : > { %2893 = vmatpush3.bf16.msra.mxu1 %v1980_v48  ;;  %v5706_v48 = vld [vmem:[#allocation34_spill] sm:$0xff] }
 0x5b9   : > { %v1989_v55 = vpack.c.bf16 %v1906_v54, %v1905_v22  ;;  %v988_v37 = vadd.f32 %v5706_v48, %v5092_v49  ;;  %v1068_v54 = vadd.f32 %v5708_v43, %v5092_v49  ;;  %v5711_v48 = vld [vmem:[#allocation51_spill] sm:$0xff] }
 0x5ba   : > { %v1764_v59 = vpop.permute.xlu1 %1763 }
 0x5bb   : > { %2894 = vmatprep.subr.bf16.mxu1 %v1989_v55  ;;  %v1889_v26 = vmul.f32 %v1764_v59, %v974_v53 }
 0x5be   : > { %v1769_v21 = vpop.permute.xlu1 %1768 }
 0x5bf   : > { %v1890_v8 = vmul.f32 %v1769_v21, %v978_v46  ;;  %v5709_v21 = vld [vmem:[#allocation35_spill] sm:$0xff] }
 0x5c1   : > { %v1981_v56 = vpack.c.bf16 %v1890_v8, %v1889_v26  ;;  %v994_v26 = vadd.f32 %v5709_v21, %v5092_v49  ;;  %v5710_v8 = vld [vmem:[#allocation36_spill] sm:$0xff] }
 0x5c2   : > { %v1774_v25 = vpop.permute.xlu1 %1773 }
 0x5c3   : > { %2895 = vmatpush3.bf16.msra.mxu1 %v1981_v56  ;;  %v1891_v44 = vmul.f32 %v1774_v25, %v984_v14  ;;  %v998_v56 = vadd.f32 %v5710_v8, %v5092_v49  ;;  %v5715_v8 = vld [vmem:[#allocation37_spill] sm:$0xff] }
 0x5c6   : > { %v1854_v12 = vpop.permute.xlu1 %1853 }
 0x5c7   : > { %v1907_v59 = vmul.f32 %v1854_v12, %v1064_v2  ;;  %v5712_v12 = vld [vmem:[#allocation52_spill] sm:$0xff] }
 0x5ca   : > { %v1779_v42 = vpop.permute.xlu1 %1778 }
 0x5cb   : > { %v1892_v58 = vmul.f32 %v1779_v42, %v988_v37  ;;  %v1074_v37 = vadd.f32 %v5711_v48, %v5092_v49  ;;  %v1078_v42 = vadd.f32 %v5712_v12, %v5092_v49  ;;  %v3283_v48 = vld [vmem:[#allocation13] sm:$0xff]  }
 0x5cc   : > { %3070 = vmatprep.subr.bf16.mxu0 %v3283_v48 }
 0x5cd   : > { %v1982_v22 = vpack.c.bf16 %v1892_v58, %v1891_v44  ;;  %3071 = vmatpush3.bf16.msra.mxu0 %v3283_v48 }
 0x5ce   : > { %v1859_v55 = vpop.permute.xlu1 %1858 }
 0x5cf   : > { %v1908_v31 = vmul.f32 %v1859_v55, %v1068_v54  ;;  %v5713_v55 = vld [vmem:[#allocation53_spill] sm:$0xff] }
 0x5d1   : > { %v1990_v53 = vpack.c.bf16 %v1908_v31, %v1907_v59  ;;  %v1084_v59 = vadd.f32 %v5713_v55, %v5092_v49  ;;  %v5714_v31 = vld [vmem:[#allocation54_spill] sm:$0xff] }
 0x5d2   : > { %v1784_v27 = vpop.permute.xlu1 %1783  ;;  %v5757_v55 = vld [vmem:[#allocation86_spill] sm:$0xff] }
 0x5d3   : > { %2896 = vmatprep.subr.bf16.mxu1 %v1990_v53  ;;  %v1893_v61 = vmul.f32 %v1784_v27, %v994_v26  ;;  %v1088_v53 = vadd.f32 %v5714_v31, %v5092_v49  ;;  %v5759_v31 = vld [vmem:[#allocation68_spill] sm:$0xff] }
 0x5d4   : > { %2897 = vmatpush3.bf16.msra.mxu1 %v1982_v22 }
 0x5d6   : > { %v1864_v46 = vpop.permute.xlu1 %1863 }
 0x5d7   : > { %v1909_v33 = vmul.f32 %v1864_v46, %v1074_v37  ;;  %v5716_v46 = vld [vmem:[#allocation38_spill] sm:$0xff] }
 0x5d8   : > { %v3284_v37 = vld [vmem:[#allocation13 + $0x8] sm:$0xff]  }
 0x5d9   : > { %3072 = vmatprep.subr.bf16.mxu0 %v3284_v37 }
 0x5da   : > { %v1789_v25 = vpop.permute.xlu1 %1788  ;;  %3073 = vmatpush3.bf16.msra.mxu0 %v3284_v37 }
 0x5db   : > { %v1894_v14 = vmul.f32 %v1789_v25, %v998_v56  ;;  %v1004_v56 = vadd.f32 %v5715_v8, %v5092_v49  ;;  %v1008_v25 = vadd.f32 %v5716_v46, %v5092_v49  ;;  %v3286_v49 = vld [vmem:[#allocation13 + $0x18] sm:$0xff]   ;;  %v5766_v46 = vld [vmem:[#allocation70_spill] sm:$0xff] }
 0x5dd   : > { %v1983_v44 = vpack.c.bf16 %v1894_v14, %v1893_v61 }
 0x5de   : > { %v1869_v58 = vpop.permute.xlu1 %1868 }
 0x5df   : > { %v1910_v2 = vmul.f32 %v1869_v58, %v1078_v42  ;;  %v3285_v58 = vld [vmem:[#allocation13 + $0x10] sm:$0xff]  }
 0x5e0   : > { %3074 = vmatprep.subr.bf16.mxu0 %v3285_v58 }
 0x5e1   : > { %v1991_v43 = vpack.c.bf16 %v1910_v2, %v1909_v33  ;;  %v5717_v33 = vpack.c.bf16 %v4903_v50, %v4895_v17  ;;  %v5718_v2 = vpack.c.bf16 %v4723_v60, %v4721_v57  ;;  %3075 = vmatpush3.bf16.msra.mxu0 %v3285_v58  ;;  %v5721_v17 = vpack.c.bf16 %v4932_v30, %v4926_v7  ;;  %v5739_v30 = vld [vmem:[#allocation74_spill] sm:$0xff]  ;;  %v5742_v7 = vld [vmem:[#allocation57_spill] sm:$0xff] }
 0x5e2   : > { %v1794_v54 = vpop.permute.xlu1 %1793  ;;  %3076 = vmatprep.subr.bf16.mxu0 %v3286_v49  ;;  %v5722_v50 = vpack.c.bf16 %v4733_v38, %v4730_v47  ;;  %v5723_v57 = vpack.c.bf16 %v4946_v19, %v4940_v40  ;;  %v5724_v60 = vpack.c.bf16 %v4741_v1, %v4735_v36  ;;  %v5727_v47 = vpack.c.bf16 %v4974_v51, %v4968_v11  ;;  %v5738_v19 = vld [vmem:[#allocation76_spill] sm:$0xff]  ;;  %v5748_v51 = vld [vmem:[#allocation59_spill] sm:$0xff] }
 0x5e3   : > { %2898 = vmatprep.subr.bf16.mxu1 %v1991_v43  ;;  %v1895_v12 = vmul.f32 %v1794_v54, %v1004_v56  ;;  %v5719_v43 = vpack.c.bf16 %v4918_v4, %v4911_v28  ;;  %v5720_v54 = vpack.c.bf16 %v4728_v6, %v4725_v24  ;;  %v5725_v24 = vpack.c.bf16 %v4960_v35, %v4954_v41  ;;  %v3287_v28 = vld [vmem:[#allocation13 + $0x20] sm:$0xff]   ;;  %v5747_v41 = vld [vmem:[#allocation60_spill] sm:$0xff] }
 0x5e4   : > { %2899 = vmatpush3.bf16.msra.mxu1 %v1983_v44  ;;  %v5726_v6 = vpack.c.bf16 %v4758_v52, %v4749_v29  ;;  %v5728_v38 = vpack.c.bf16 %v4771_v15, %v4764_v9  ;;  %v5729_v36 = vpack.c.bf16 %v4988_v34, %v4982_v16  ;;  %v5730_v1 = vpack.c.bf16 %v4786_v32, %v4778_v45  ;;  %v5736_v45 = vld [vmem:[#allocation56_spill] sm:$0xff] }
 0x5e5   : > { %3077 = vmatpush3.bf16.msra.mxu0 %v3286_v49  ;;  %v5731_v29 = vpack.c.bf16 %v5002_v10, %v4996_v13  ;;  %v5732_v52 = vpack.c.bf16 %v4799_v23, %v4791_v62  ;;  %v5733_v9 = vpack.c.bf16 %v5016_v5, %v5010_v20  ;;  %v5734_v15 = vpack.c.bf16 %v4812_v39, %v4804_v3  ;;  %v5741_v23 = vld [vmem:[#allocation58_spill] sm:$0xff]  ;;  %v5744_v3 = vld [vmem:[#allocation80_spill] sm:$0xff] }
 0x5e6   : > { %v1874_v22 = vpop.permute.xlu1 %1873  ;;  %v5735_v35 = vpack.c.bf16 %v5024_v63, %v5018_v18  ;;  %v5737_v32 = vpack.c.bf16 %v4825_v0, %v5736_v45  ;;  %v5740_v62 = vpack.c.bf16 %v5738_v19, %v5739_v30  ;;  %v5743_v4 = vpack.c.bf16 %v5741_v23, %v5742_v7  ;;  %3078 = vmatprep.subr.bf16.mxu0 %v3287_v28  ;;  %v5745_v39 = vld [vmem:[#allocation78_spill] sm:$0xff]  ;;  %v3289_v34 = vld [vmem:[#allocation13 + $0x30] sm:$0xff]   ;;  %v3290_v63 = vld [vmem:[#allocation13 + $0x38] sm:$0xff]  }
 0x5e7   : > { %v1911_v21 = vmul.f32 %v1874_v22, %v1084_v59  ;;  %v5746_v40 = vpack.c.bf16 %v5744_v3, %v5745_v39  ;;  %v5749_v11 = vpack.c.bf16 %v5747_v41, %v5748_v51  ;;  %v3288_v0 = vld [vmem:[#allocation13 + $0x28] sm:$0xff]   ;;  %v5750_v16 = vld [vmem:[#allocation84_spill] sm:$0xff] }
 0x5e8   : > { %v5751_v10 = vld [vmem:[#allocation82_spill] sm:$0xff]  ;;  %v5753_v5 = vld [vmem:[#allocation64_spill] sm:$0xff] }
 0x5e9   : > { %3079 = vmatpush3.bf16.msra.mxu0 %v3287_v28  ;;  %v5752_v13 = vpack.c.bf16 %v5750_v16, %v5751_v10  ;;  %v5754_v20 = vld [vmem:[#allocation62_spill] sm:$0xff]  ;;  %v5756_v22 = vld [vmem:[#allocation88_spill] sm:$0xff] }
 0x5ea   : > { %v1879_v27 = vpop.permute.xlu1 %1878  ;;  %3080 = vmatprep.subr.bf16.mxu0 %v3288_v0  ;;  %v5755_v18 = vpack.c.bf16 %v5753_v5, %v5754_v20  ;;  %v5758_v59 = vpack.c.bf16 %v5756_v22, %v5757_v55  ;;  %v5765_v56 = vld [vmem:[#allocation72_spill] sm:$0xff] }
 0x5eb   : > { %v1912_v26 = vmul.f32 %v1879_v27, %v1088_v53  ;;  %v5760_v53 = vld [vmem:[#allocation66_spill] sm:$0xff] }
 0x5ec   : > { %v5761_v27 = vpack.c.bf16 %v5759_v31, %v5760_v53 }
 0x5ed   : > { %v1992_v61 = vpack.c.bf16 %v1912_v26, %v1911_v21  ;;  %3081 = vmatpush3.bf16.msra.mxu0 %v3288_v0  ;;  %v5762_v21 = vld [vmem:[#allocation63_spill] sm:$0xff]  ;;  %v5763_v26 = vld [vmem:[#allocation61_spill] sm:$0xff] }
 0x5ee   : > { %v1799_v14 = vpop.permute.xlu1 %1798  ;;  %3082 = vmatprep.subr.bf16.mxu0 %v3289_v34  ;;  %v5764_v8 = vpack.c.bf16 %v5762_v21, %v5763_v26 }
 0x5ef   : > { %v1896_v42 = vmul.f32 %v1799_v14, %v1008_v25  ;;  %2900 = vmatprep.subr.bf16.mxu1 %v1992_v61  ;;  %v5767_v25 = vpack.c.bf16 %v5765_v56, %v5766_v46  ;;  %v5768_v61 = vld [vmem:[#allocation55_spill] sm:$0xff]  ;;  %v5769_v14 = vld [vmem:[#allocation65_spill] sm:$0xff] }
 0x5f0   : > { %v5770_v48 = vpack.c.bf16 %v5768_v61, %v5769_v14 }
 0x5f1   : > { %v1984_v44 = vpack.c.bf16 %v1896_v42, %v1895_v12  ;;  %3083 = vmatpush3.bf16.msra.mxu0 %v3289_v34 }
 0x5f2   : > { %3084 = vmatprep.subr.bf16.mxu0 %v3290_v63 }
 0x5f3   : > { %2901 = vmatpush3.bf16.msra.mxu1 %v1984_v44 }
 0x5f5   : > { %3085 = vmatpush3.bf16.msra.mxu0 %v3290_v63 }
 0x5f6   : > { %2026 = vmatmul.mubr.bf16.vlgmr.msra.gmra.mrb[64].mxu1 %v5717_v33 }
 0x5f7   : > { %2033 = vmatprep.mubr.bf16.mxu1 %v5718_v2 }
 0x5fe   : > { %2034 = vmatmul.mubr.bf16.gmra.mrb[68].mxu1 %v5719_v43 }
 0x5ff   : > { %2041 = vmatprep.mubr.bf16.mxu1 %v5720_v54 }
 0x606   : > { %2042 = vmatmul.mubr.bf16.gmra.mrb[72].mxu1 %v5721_v17 }
 0x607   : > { %2049 = vmatprep.mubr.bf16.mxu1 %v5722_v50 }
 0x60e   : > { %2050 = vmatmul.mubr.bf16.gmra.mrb[76].mxu1 %v5723_v57 }
 0x60f   : > { %2057 = vmatprep.mubr.bf16.mxu1 %v5724_v60 }
 0x616   : > { %2058 = vmatmul.mubr.bf16.gmra.mrb[80].mxu1 %v5725_v24 }
 0x617   : > { %2065 = vmatprep.mubr.bf16.mxu1 %v5726_v6 }
 0x61e   : > { %2066 = vmatmul.mubr.bf16.gmra.mrb[84].mxu1 %v5727_v47 }
 0x61f   : > { %2073 = vmatprep.mubr.bf16.mxu1 %v5728_v38 }
 0x626   : > { %2074 = vmatmul.mubr.bf16.gmra.mrb[88].mxu1 %v5729_v36 }
 0x627   : > { %2081 = vmatprep.mubr.bf16.mxu1 %v5730_v1 }
 0x62e   : > { %2082 = vmatmul.mubr.bf16.gmra.mrb[92].mxu1 %v5731_v29 }
 0x62f   : > { %2089 = vmatprep.mubr.bf16.mxu1 %v5732_v52 }
 0x636   : > { %2090 = vmatmul.mubr.bf16.gmra.mrb[96].mxu1 %v5733_v9 }
 0x637   : > { %2097 = vmatprep.mubr.bf16.mxu1 %v5734_v15 }
 0x63e   : > { %2098 = vmatmul.mubr.bf16.gmra.mrb[100].mxu1 %v5735_v35 }
 0x63f   : > { %2105 = vmatprep.mubr.bf16.mxu1 %v5737_v32 }
 0x646   : > { %2106 = vmatmul.mubr.bf16.gmra.mrb[104].mxu1 %v5740_v62 }
 0x647   : > { %2113 = vmatprep.mubr.bf16.mxu1 %v5743_v4 }
 0x64e   : > { %2114 = vmatmul.mubr.bf16.gmra.mrb[108].mxu1 %v5746_v40 }
 0x64f   : > { %2121 = vmatprep.mubr.bf16.mxu1 %v5749_v11 }
 0x656   : > { %2122 = vmatmul.mubr.bf16.gmra.mrb[112].mxu1 %v5752_v13 }
 0x657   : > { %2129 = vmatprep.mubr.bf16.mxu1 %v5755_v18 }
 0x65e   : > { %2130 = vmatmul.mubr.bf16.gmra.mrb[116].mxu1 %v5758_v59 }
 0x65f   : > { %2137 = vmatprep.mubr.bf16.mxu1 %v5761_v27 }
 0x666   : > { %2138 = vmatmul.mubr.bf16.gmra.mrb[120].mxu1 %v5764_v8 }
 0x667   : > { %2145 = vmatprep.mubr.bf16.mxu1 %v5767_v25 }
 0x66e   : > { %2146 = vmatmul.mubr.bf16.gmra.mrb[124].mxu1 %v5770_v48 }
 0x6c9   : > { %v2902_v37 = vpop.f32.mrb[64].mxu1 }
 0x6ca   : > { %v2903_v12 = vpop.f32.mrb[65].mxu1 }
 0x6cb   : > { %v2904_v42 = vadd.f32 %v2903_v12, %v2902_v37  ;;  %v2905_v44 = vpop.f32.mrb[66].mxu1 }
 0x6cc   : > { %v2906_v58 = vpop.f32.mrb[67].mxu1 }
 0x6cd   : > { %v2907_v33 = vadd.f32 %v2906_v58, %v2905_v44 }
 0x6cf   : > { %v2253_v49 = vpack.c.bf16 %v2907_v33, %v2904_v42 }
 0x6d1   : > { %v2908_v2 = vpop.f32.mrb[68].mxu1  ;;  %3086 = vmatprep.mubr.bf16.mxu0 %v2253_v49 }
 0x6d2   : > { %v2909_v43 = vpop.f32.mrb[69].mxu1 }
 0x6d3   : > { %v2910_v54 = vadd.f32 %v2909_v43, %v2908_v2  ;;  %v2911_v17 = vpop.f32.mrb[70].mxu1 }
 0x6d4   : > { %v2912_v50 = vpop.f32.mrb[71].mxu1 }
 0x6d5   : > { %v2913_v57 = vadd.f32 %v2912_v50, %v2911_v17 }
 0x6d7   : > { %v2254_v60 = vpack.c.bf16 %v2913_v57, %v2910_v54 }
 0x6d9   : > { %v2914_v24 = vpop.f32.mrb[72].mxu1  ;;  %3087 = vmatmul.mubr.bf16.vlgmr.msra.gmra.mrb[96].mxu0 %v2254_v60 }
 0x6da   : > { %v2915_v6 = vpop.f32.mrb[73].mxu1 }
 0x6db   : > { %v2916_v47 = vadd.f32 %v2915_v6, %v2914_v24  ;;  %v2917_v38 = vpop.f32.mrb[74].mxu1 }
 0x6dc   : > { %v2918_v36 = vpop.f32.mrb[75].mxu1 }
 0x6dd   : > { %v2919_v1 = vadd.f32 %v2918_v36, %v2917_v38 }
 0x6df   : > { %v2255_v29 = vpack.c.bf16 %v2919_v1, %v2916_v47 }
 0x6e1   : > { %v2920_v52 = vpop.f32.mrb[76].mxu1  ;;  %3090 = vmatprep.mubr.bf16.mxu0 %v2255_v29 }
 0x6e2   : > { %v2921_v9 = vpop.f32.mrb[77].mxu1 }
 0x6e3   : > { %v2922_v15 = vadd.f32 %v2921_v9, %v2920_v52  ;;  %v2923_v35 = vpop.f32.mrb[78].mxu1 }
 0x6e4   : > { %v2924_v45 = vpop.f32.mrb[79].mxu1 }
 0x6e5   : > { %v2925_v32 = vadd.f32 %v2924_v45, %v2923_v35 }
 0x6e7   : > { %v2256_v19 = vpack.c.bf16 %v2925_v32, %v2922_v15 }
 0x6e9   : > { %v2926_v30 = vpop.f32.mrb[80].mxu1  ;;  %3091 = vmatmul.mubr.bf16.gmra.mrb[100].mxu0 %v2256_v19 }
 0x6ea   : > { %v2927_v62 = vpop.f32.mrb[81].mxu1 }
 0x6eb   : > { %v2928_v23 = vadd.f32 %v2927_v62, %v2926_v30  ;;  %v2929_v7 = vpop.f32.mrb[82].mxu1 }
 0x6ec   : > { %v2930_v4 = vpop.f32.mrb[83].mxu1 }
 0x6ed   : > { %v2931_v28 = vadd.f32 %v2930_v4, %v2929_v7 }
 0x6ef   : > { %v2257_v3 = vpack.c.bf16 %v2931_v28, %v2928_v23 }
 0x6f1   : > { %v2932_v39 = vpop.f32.mrb[84].mxu1  ;;  %3094 = vmatprep.mubr.bf16.mxu0 %v2257_v3 }
 0x6f2   : > { %v2933_v40 = vpop.f32.mrb[85].mxu1 }
 0x6f3   : > { %v2934_v41 = vadd.f32 %v2933_v40, %v2932_v39  ;;  %v2935_v51 = vpop.f32.mrb[86].mxu1 }
 0x6f4   : > { %v2936_v11 = vpop.f32.mrb[87].mxu1 }
 0x6f5   : > { %v2937_v0 = vadd.f32 %v2936_v11, %v2935_v51 }
 0x6f7   : > { %v2258_v34 = vpack.c.bf16 %v2937_v0, %v2934_v41 }
 0x6f9   : > { %v2938_v16 = vpop.f32.mrb[88].mxu1  ;;  %3095 = vmatmul.mubr.bf16.gmra.mrb[104].mxu0 %v2258_v34 }
 0x6fa   : > { %v2939_v10 = vpop.f32.mrb[89].mxu1 }
 0x6fb   : > { %v2940_v13 = vadd.f32 %v2939_v10, %v2938_v16  ;;  %v2941_v5 = vpop.f32.mrb[90].mxu1 }
 0x6fc   : > { %v2942_v20 = vpop.f32.mrb[91].mxu1 }
 0x6fd   : > { %v2943_v18 = vadd.f32 %v2942_v20, %v2941_v5 }
 0x6ff   : > { %v2259_v63 = vpack.c.bf16 %v2943_v18, %v2940_v13 }
 0x701   : > { %v2944_v22 = vpop.f32.mrb[92].mxu1  ;;  %3098 = vmatprep.mubr.bf16.mxu0 %v2259_v63  ;;  %v5251_v63 = vld [vmem:[#allocation15] ss:$0 sm:$0xff] }
 0x702   : > { %v2945_v55 = vpop.f32.mrb[93].mxu1 }
 0x703   : > { %v2946_v59 = vadd.f32 %v2945_v55, %v2944_v22  ;;  %v2947_v31 = vpop.f32.mrb[94].mxu1  ;;  %v2503_v55 = vld [vmem:[%s4069_s11 + $0x10] sm:$0xff] }
 0x704   : > { %v2948_v53 = vpop.f32.mrb[95].mxu1 }
 0x705   : > { %v2949_v27 = vadd.f32 %v2948_v53, %v2947_v31  ;;  %v2501_v53 = vld [vmem:[%s4069_s11] sm:$0xff] }
 0x707   : > { %v2260_v21 = vpack.c.bf16 %v2949_v27, %v2946_v59 }
 0x709   : > { %v2950_v26 = vpop.f32.mrb[96].mxu1  ;;  %3099 = vmatmul.mubr.bf16.gmra.mrb[108].mxu0 %v2260_v21 }
 0x70a   : > { %v2951_v8 = vpop.f32.mrb[97].mxu1 }
 0x70b   : > { %v2952_v56 = vadd.f32 %v2951_v8, %v2950_v26  ;;  %v2953_v46 = vpop.f32.mrb[98].mxu1  ;;  %v2504_v26 = vld [vmem:[%s4069_s11 + $0x18] sm:$0xff] }
 0x70c   : > { %v2954_v25 = vpop.f32.mrb[99].mxu1 }
 0x70d   : > { %v2955_v61 = vadd.f32 %v2954_v25, %v2953_v46  ;;  %v2502_v25 = vld [vmem:[%s4069_s11 + $0x8] sm:$0xff] }
 0x70f   : > { %v2261_v14 = vpack.c.bf16 %v2955_v61, %v2952_v56 }
 0x711   : > { %v2956_v48 = vpop.f32.mrb[100].mxu1  ;;  %3102 = vmatprep.mubr.bf16.mxu0 %v2261_v14 }
 0x712   : > { %v2957_v37 = vpop.f32.mrb[101].mxu1 }
 0x713   : > { %v2958_v12 = vadd.f32 %v2957_v37, %v2956_v48  ;;  %v2959_v42 = vpop.f32.mrb[102].mxu1 }
 0x714   : > { %v2960_v44 = vpop.f32.mrb[103].mxu1 }
 0x715   : > { %v2961_v58 = vadd.f32 %v2960_v44, %v2959_v42  ;;  %v2507_v42 = vld [vmem:[%s4069_s11 + $0x30] sm:$0xff] }
 0x717   : > { %v2262_v33 = vpack.c.bf16 %v2961_v58, %v2958_v12 }
 0x719   : > { %v2962_v49 = vpop.f32.mrb[104].mxu1  ;;  %3103 = vmatmul.mubr.bf16.gmra.mrb[112].mxu0 %v2262_v33  ;;  %v2505_v33 = vld [vmem:[%s4069_s11 + $0x20] sm:$0xff] }
 0x71a   : > { %v2963_v2 = vpop.f32.mrb[105].mxu1 }
 0x71b   : > { %v2964_v43 = vadd.f32 %v2963_v2, %v2962_v49  ;;  %v2965_v54 = vpop.f32.mrb[106].mxu1 }
 0x71c   : > { %v2966_v17 = vpop.f32.mrb[107].mxu1 }
 0x71d   : > { %v2967_v50 = vadd.f32 %v2966_v17, %v2965_v54 }
 0x71f   : > { %v2263_v57 = vpack.c.bf16 %v2967_v50, %v2964_v43  ;;  %v2508_v43 = vld [vmem:[%s4069_s11 + $0x38] sm:$0xff] }
 0x721   : > { %v2968_v60 = vpop.f32.mrb[108].mxu1  ;;  %3106 = vmatprep.mubr.bf16.mxu0 %v2263_v57  ;;  %v2506_v57 = vld [vmem:[%s4069_s11 + $0x28] sm:$0xff] }
 0x722   : > { %v2969_v24 = vpop.f32.mrb[109].mxu1 }
 0x723   : > { %v2970_v6 = vadd.f32 %v2969_v24, %v2968_v60  ;;  %v2971_v47 = vpop.f32.mrb[110].mxu1 }
 0x724   : > { %v2972_v38 = vpop.f32.mrb[111].mxu1 }
 0x725   : > { %v2973_v36 = vadd.f32 %v2972_v38, %v2971_v47 }
 0x727   : > { %v2264_v1 = vpack.c.bf16 %v2973_v36, %v2970_v6  ;;  %v2511_v36 = vld [vmem:[%s4069_s11 + $0x50] sm:$0xff] }
 0x729   : > { %v2974_v29 = vpop.f32.mrb[112].mxu1  ;;  %3107 = vmatmul.mubr.bf16.gmra.mrb[116].mxu0 %v2264_v1 }
 0x72a   : > { %v2975_v52 = vpop.f32.mrb[113].mxu1 }
 0x72b   : > { %v2976_v9 = vadd.f32 %v2975_v52, %v2974_v29  ;;  %v2977_v15 = vpop.f32.mrb[114].mxu1  ;;  %v2509_v52 = vld [vmem:[%s4069_s11 + $0x40] sm:$0xff] }
 0x72c   : > { %v2978_v35 = vpop.f32.mrb[115].mxu1 }
 0x72d   : > { %v2979_v45 = vadd.f32 %v2978_v35, %v2977_v15  ;;  %v2512_v35 = vld [vmem:[%s4069_s11 + $0x58] sm:$0xff] }
 0x72f   : > { %v2265_v32 = vpack.c.bf16 %v2979_v45, %v2976_v9 }
 0x731   : > { %v2980_v19 = vpop.f32.mrb[116].mxu1  ;;  %3110 = vmatprep.mubr.bf16.mxu0 %v2265_v32 }
 0x732   : > { %v2981_v30 = vpop.f32.mrb[117].mxu1 }
 0x733   : > { %v2982_v62 = vadd.f32 %v2981_v30, %v2980_v19  ;;  %v2983_v23 = vpop.f32.mrb[118].mxu1  ;;  %v2510_v30 = vld [vmem:[%s4069_s11 + $0x48] sm:$0xff] }
 0x734   : > { %v2984_v7 = vpop.f32.mrb[119].mxu1 }
 0x735   : > { %v2985_v4 = vadd.f32 %v2984_v7, %v2983_v23 }
 0x737   : > { %v2266_v28 = vpack.c.bf16 %v2985_v4, %v2982_v62 }
 0x739   : > { %v2986_v3 = vpop.f32.mrb[120].mxu1  ;;  %3111 = vmatmul.mubr.bf16.gmra.mrb[120].mxu0 %v2266_v28 }
 0x73a   : > { %v2987_v39 = vpop.f32.mrb[121].mxu1 }
 0x73b   : > { %v2988_v40 = vadd.f32 %v2987_v39, %v2986_v3  ;;  %v2989_v41 = vpop.f32.mrb[122].mxu1  ;;  %v2515_v3 = vld [vmem:[%s4069_s11 + $0x70] sm:$0xff] }
 0x73c   : > { %v2990_v51 = vpop.f32.mrb[123].mxu1 }
 0x73d   : > { %v2991_v11 = vadd.f32 %v2990_v51, %v2989_v41  ;;  %v2513_v41 = vld [vmem:[%s4069_s11 + $0x60] sm:$0xff] }
 0x73f   : > { %v2267_v0 = vpack.c.bf16 %v2991_v11, %v2988_v40 }
 0x741   : > { %v2992_v34 = vpop.f32.mrb[124].mxu1  ;;  %3114 = vmatprep.mubr.bf16.mxu0 %v2267_v0  ;;  %v2516_v0 = vld [vmem:[%s4069_s11 + $0x78] sm:$0xff] }
 0x742   : > { %v2993_v16 = vpop.f32.mrb[125].mxu1 }
 0x743   : > { %v2994_v10 = vadd.f32 %v2993_v16, %v2992_v34  ;;  %v2995_v13 = vpop.f32.mrb[126].mxu1 }
 0x744   : > { %v2996_v5 = vpop.f32.mrb[127].mxu1 }
 0x745   : > { %v2997_v20 = vadd.f32 %v2996_v5, %v2995_v13  ;;  %v2514_v13 = vld [vmem:[%s4069_s11 + $0x68] sm:$0xff] }
 0x747   : > { %v2268_v18 = vpack.c.bf16 %v2997_v20, %v2994_v10 }
 0x749   : > { %3115 = vmatmul.mubr.bf16.gmra.mrb[124].mxu0 %v2268_v18 }
 0x7ac   : > { %v3088_v22 = vpop.f32.mrb[96].mxu0 }
 0x7ad   : > { %v2383_v59 = vadd.f32 %v3088_v22, %v5251_v63  ;;  %v2374_v31 = vpop.f32.mrb[97].mxu0 }
 0x7ae   : > { %v2375_v27 = vadd.f32 %v5251_v63, %v2374_v31  ;;  %v3089_v21 = vpop.f32.mrb[98].mxu0 }
 0x7af   : > { %v2535_v8 = vadd.f32 %v2503_v55, %v2383_v59  ;;  %v2386_v56 = vadd.f32 %v3089_v21, %v5251_v63  ;;  %v2377_v46 = vpop.f32.mrb[99].mxu0  ;;  %v2519_v59 = vld [vmem:[%s4069_s11 + $0x90] sm:$0xff] }
 0x7b0   : > { %v2533_v61 = vadd.f32 %v2501_v53, %v2375_v27  ;;  %v2378_v14 = vadd.f32 %v5251_v63, %v2377_v46  ;;  %v2517_v27 = vld [vmem:[%s4069_s11 + $0x80] sm:$0xff] }
 0x7b1   : > { %2567 = vst [vmem:[%s5263_s8 + $0x10] sm:$0xff] %v2535_v8  ;;  %v2536_v48 = vadd.f32 %v2504_v26, %v2386_v56  ;;  %v2520_v8 = vld [vmem:[%s4069_s11 + $0x98] sm:$0xff] }
 0x7b2   : > { %2565 = vst [vmem:[%s5263_s8] sm:$0xff] %v2533_v61  ;;  %v2534_v37 = vadd.f32 %v2502_v25, %v2378_v14  ;;  %v2518_v61 = vld [vmem:[%s4069_s11 + $0x88] sm:$0xff] }
 0x7b3   : > { %2568 = vst [vmem:[%s5263_s8 + $0x18] sm:$0xff] %v2536_v48 }
 0x7b4   : > { %2566 = vst [vmem:[%s5263_s8 + $0x8] sm:$0xff] %v2534_v37 }
 0x7bc   : > { %v3092_v12 = vpop.f32.mrb[100].mxu0 }
 0x7bd   : > { %v2399_v44 = vadd.f32 %v3092_v12, %v5251_v63  ;;  %v2390_v58 = vpop.f32.mrb[101].mxu0 }
 0x7be   : > { %v2391_v49 = vadd.f32 %v5251_v63, %v2390_v58  ;;  %v3093_v2 = vpop.f32.mrb[102].mxu0 }
 0x7bf   : > { %v2539_v54 = vadd.f32 %v2507_v42, %v2399_v44  ;;  %v2402_v17 = vadd.f32 %v3093_v2, %v5251_v63  ;;  %v2393_v50 = vpop.f32.mrb[103].mxu0  ;;  %v2523_v44 = vld [vmem:[%s4069_s11 + $0xb0] sm:$0xff] }
 0x7c0   : > { %v2537_v60 = vadd.f32 %v2505_v33, %v2391_v49  ;;  %v2394_v24 = vadd.f32 %v5251_v63, %v2393_v50  ;;  %v2521_v49 = vld [vmem:[%s4069_s11 + $0xa0] sm:$0xff] }
 0x7c1   : > { %2571 = vst [vmem:[%s5263_s8 + $0x30] sm:$0xff] %v2539_v54  ;;  %v2540_v6 = vadd.f32 %v2508_v43, %v2402_v17  ;;  %v2524_v54 = vld [vmem:[%s4069_s11 + $0xb8] sm:$0xff] }
 0x7c2   : > { %2569 = vst [vmem:[%s5263_s8 + $0x20] sm:$0xff] %v2537_v60  ;;  %v2538_v47 = vadd.f32 %v2506_v57, %v2394_v24  ;;  %v2522_v60 = vld [vmem:[%s4069_s11 + $0xa8] sm:$0xff] }
 0x7c3   : > { %2572 = vst [vmem:[%s5263_s8 + $0x38] sm:$0xff] %v2540_v6 }
 0x7c4   : > { %2570 = vst [vmem:[%s5263_s8 + $0x28] sm:$0xff] %v2538_v47 }
 0x7cc   : > { %v3096_v38 = vpop.f32.mrb[104].mxu0 }
 0x7cd   : > { %v2415_v1 = vadd.f32 %v3096_v38, %v5251_v63  ;;  %v2406_v29 = vpop.f32.mrb[105].mxu0 }
 0x7ce   : > { %v2407_v9 = vadd.f32 %v5251_v63, %v2406_v29  ;;  %v3097_v15 = vpop.f32.mrb[106].mxu0 }
 0x7cf   : > { %v2543_v45 = vadd.f32 %v2511_v36, %v2415_v1  ;;  %v2418_v32 = vadd.f32 %v3097_v15, %v5251_v63  ;;  %v2409_v19 = vpop.f32.mrb[107].mxu0  ;;  %v2527_v1 = vld [vmem:[%s4069_s11 + $0xd0] sm:$0xff] }
 0x7d0   : > { %v2541_v62 = vadd.f32 %v2509_v52, %v2407_v9  ;;  %v2410_v23 = vadd.f32 %v5251_v63, %v2409_v19  ;;  %v2525_v9 = vld [vmem:[%s4069_s11 + $0xc0] sm:$0xff] }
 0x7d1   : > { %2575 = vst [vmem:[%s5263_s8 + $0x50] sm:$0xff] %v2543_v45  ;;  %v2544_v7 = vadd.f32 %v2512_v35, %v2418_v32  ;;  %v2528_v45 = vld [vmem:[%s4069_s11 + $0xd8] sm:$0xff] }
 0x7d2   : > { %2573 = vst [vmem:[%s5263_s8 + $0x40] sm:$0xff] %v2541_v62  ;;  %v2542_v4 = vadd.f32 %v2510_v30, %v2410_v23  ;;  %v2526_v62 = vld [vmem:[%s4069_s11 + $0xc8] sm:$0xff] }
 0x7d3   : > { %2576 = vst [vmem:[%s5263_s8 + $0x58] sm:$0xff] %v2544_v7 }
 0x7d4   : > { %2574 = vst [vmem:[%s5263_s8 + $0x48] sm:$0xff] %v2542_v4 }
 0x7dc   : > { %v3100_v28 = vpop.f32.mrb[108].mxu0 }
 0x7dd   : > { %v2431_v39 = vadd.f32 %v3100_v28, %v5251_v63  ;;  %v2422_v40 = vpop.f32.mrb[109].mxu0 }
 0x7de   : > { %v2423_v51 = vadd.f32 %v5251_v63, %v2422_v40  ;;  %v3101_v11 = vpop.f32.mrb[110].mxu0 }
 0x7df   : > { %v2547_v34 = vadd.f32 %v2515_v3, %v2431_v39  ;;  %v2434_v16 = vadd.f32 %v3101_v11, %v5251_v63  ;;  %v2425_v10 = vpop.f32.mrb[111].mxu0  ;;  %v2531_v39 = vld [vmem:[%s4069_s11 + $0xf0] sm:$0xff] }
 0x7e0   : > { %v2545_v5 = vadd.f32 %v2513_v41, %v2423_v51  ;;  %v2426_v20 = vadd.f32 %v5251_v63, %v2425_v10  ;;  %v2529_v51 = vld [vmem:[%s4069_s11 + $0xe0] sm:$0xff] }
 0x7e1   : > { %2579 = vst [vmem:[%s5263_s8 + $0x70] sm:$0xff] %v2547_v34  ;;  %v2548_v18 = vadd.f32 %v2516_v0, %v2434_v16  ;;  %v2532_v34 = vld [vmem:[%s4069_s11 + $0xf8] sm:$0xff] }
 0x7e2   : > { %2577 = vst [vmem:[%s5263_s8 + $0x60] sm:$0xff] %v2545_v5  ;;  %v2546_v22 = vadd.f32 %v2514_v13, %v2426_v20  ;;  %v2530_v5 = vld [vmem:[%s4069_s11 + $0xe8] sm:$0xff] }
 0x7e3   : > { %2580 = vst [vmem:[%s5263_s8 + $0x78] sm:$0xff] %v2548_v18 }
 0x7e4   : > { %2578 = vst [vmem:[%s5263_s8 + $0x68] sm:$0xff] %v2546_v22 }
 0x7ec   : > { %v3104_v55 = vpop.f32.mrb[112].mxu0 }
 0x7ed   : > { %v2447_v31 = vadd.f32 %v3104_v55, %v5251_v63  ;;  %v2438_v53 = vpop.f32.mrb[113].mxu0 }
 0x7ee   : > { %v2439_v21 = vadd.f32 %v5251_v63, %v2438_v53  ;;  %v3105_v26 = vpop.f32.mrb[114].mxu0 }
 0x7ef   : > { %v2551_v56 = vadd.f32 %v2519_v59, %v2447_v31  ;;  %v2450_v46 = vadd.f32 %v3105_v26, %v5251_v63  ;;  %v2441_v25 = vpop.f32.mrb[115].mxu0 }
 0x7f0   : > { %v2549_v14 = vadd.f32 %v2517_v27, %v2439_v21  ;;  %v2442_v48 = vadd.f32 %v5251_v63, %v2441_v25 }
 0x7f1   : > { %2583 = vst [vmem:[%s5263_s8 + $0x90] sm:$0xff] %v2551_v56  ;;  %v2552_v37 = vadd.f32 %v2520_v8, %v2450_v46 }
 0x7f2   : > { %2581 = vst [vmem:[%s5263_s8 + $0x80] sm:$0xff] %v2549_v14  ;;  %v2550_v12 = vadd.f32 %v2518_v61, %v2442_v48 }
 0x7f3   : > { %2584 = vst [vmem:[%s5263_s8 + $0x98] sm:$0xff] %v2552_v37 }
 0x7f4   : > { %2582 = vst [vmem:[%s5263_s8 + $0x88] sm:$0xff] %v2550_v12 }
 0x7fc   : > { %v3108_v42 = vpop.f32.mrb[116].mxu0 }
 0x7fd   : > { %v2463_v58 = vadd.f32 %v3108_v42, %v5251_v63  ;;  %v2454_v33 = vpop.f32.mrb[117].mxu0 }
 0x7fe   : > { %v2455_v2 = vadd.f32 %v5251_v63, %v2454_v33  ;;  %v3109_v43 = vpop.f32.mrb[118].mxu0 }
 0x7ff   : > { %v2555_v17 = vadd.f32 %v2523_v44, %v2463_v58  ;;  %v2466_v50 = vadd.f32 %v3109_v43, %v5251_v63  ;;  %v2457_v57 = vpop.f32.mrb[119].mxu0 }
 0x800   : > { %v2553_v24 = vadd.f32 %v2521_v49, %v2455_v2  ;;  %v2458_v6 = vadd.f32 %v5251_v63, %v2457_v57 }
 0x801   : > { %2587 = vst [vmem:[%s5263_s8 + $0xb0] sm:$0xff] %v2555_v17  ;;  %v2556_v47 = vadd.f32 %v2524_v54, %v2466_v50 }
 0x802   : > { %2585 = vst [vmem:[%s5263_s8 + $0xa0] sm:$0xff] %v2553_v24  ;;  %v2554_v38 = vadd.f32 %v2522_v60, %v2458_v6 }
 0x803   : > { %2588 = vst [vmem:[%s5263_s8 + $0xb8] sm:$0xff] %v2556_v47 }
 0x804   : > { %2586 = vst [vmem:[%s5263_s8 + $0xa8] sm:$0xff] %v2554_v38 }
 0x80c   : > { %v3112_v36 = vpop.f32.mrb[120].mxu0 }
 0x80d   : > { %v2479_v29 = vadd.f32 %v3112_v36, %v5251_v63  ;;  %v2470_v52 = vpop.f32.mrb[121].mxu0 }
 0x80e   : > { %v2471_v15 = vadd.f32 %v5251_v63, %v2470_v52  ;;  %v3113_v35 = vpop.f32.mrb[122].mxu0 }
 0x80f   : > { %v2559_v32 = vadd.f32 %v2527_v1, %v2479_v29  ;;  %v2482_v19 = vadd.f32 %v3113_v35, %v5251_v63  ;;  %v2473_v30 = vpop.f32.mrb[123].mxu0 }
 0x810   : > { %v2557_v23 = vadd.f32 %v2525_v9, %v2471_v15  ;;  %v2474_v7 = vadd.f32 %v5251_v63, %v2473_v30 }
 0x811   : > { %2591 = vst [vmem:[%s5263_s8 + $0xd0] sm:$0xff] %v2559_v32  ;;  %v2560_v4 = vadd.f32 %v2528_v45, %v2482_v19 }
 0x812   : > { %2589 = vst [vmem:[%s5263_s8 + $0xc0] sm:$0xff] %v2557_v23  ;;  %v2558_v28 = vadd.f32 %v2526_v62, %v2474_v7 }
 0x813   : > { %2592 = vst [vmem:[%s5263_s8 + $0xd8] sm:$0xff] %v2560_v4 }
 0x814   : > { %2590 = vst [vmem:[%s5263_s8 + $0xc8] sm:$0xff] %v2558_v28 }
 0x81c   : > { %v3116_v3 = vpop.f32.mrb[124].mxu0 }
 0x81d   : > { %v2495_v40 = vadd.f32 %v3116_v3, %v5251_v63  ;;  %v2486_v41 = vpop.f32.mrb[125].mxu0 }
 0x81e   : > { %v2487_v11 = vadd.f32 %v5251_v63, %v2486_v41  ;;  %v3117_v0 = vpop.f32.mrb[126].mxu0 }
 0x81f   : > { %v2563_v16 = vadd.f32 %v2531_v39, %v2495_v40  ;;  %v2498_v10 = vadd.f32 %v3117_v0, %v5251_v63  ;;  %v2489_v13 = vpop.f32.mrb[127].mxu0 }
 0x820   : > { %v2561_v20 = vadd.f32 %v2529_v51, %v2487_v11  ;;  %v2490_v18 = vadd.f32 %v5251_v63, %v2489_v13 }
 0x821   : > { %2595 = vst [vmem:[%s5263_s8 + $0xf0] sm:$0xff] %v2563_v16  ;;  %v2564_v22 = vadd.f32 %v2532_v34, %v2498_v10 }
 0x822   : > { %2593 = vst [vmem:[%s5263_s8 + $0xe0] sm:$0xff] %v2561_v20  ;;  %v2562_v55 = vadd.f32 %v2530_v5, %v2490_v18 }
 0x823   : > { %2596 = vst [vmem:[%s5263_s8 + $0xf8] sm:$0xff] %v2564_v22 }
 0x824   : > { %2594 = vst [vmem:[%s5263_s8 + $0xe8] sm:$0xff] %v2562_v55 }
 0x825   : > { %3635 = shalt.err (!%p3632_p8)
}
 0x826   : > { %s3636_s1 = scalar_lea.hbm %s5355_s12, 4096  ;;  %s3640_s8 = scalar_lea.hbm %s5416_s7, 8192 }
 0x827   : > { %p3637_p1 = scmp.ne.s32.totalorder %s5355_s12, %s3636_s1  ;;  %p3641_p13 = scmp.lt.u32.totalorder %s5355_s12, %s5416_s7 }
 0x828   : > { %p3642_p11 = scmp.lt.u32.totalorder %s3640_s8, %s3636_s1  ;;  %p3644_p2 = scmp.lt.u32.totalorder %s3636_s1, %s5355_s12 }
 0x829   : > { %p3638_p3 = pnand %p3637_p1, %p5771_p9 }
 0x82a   : > { %p3643_p4 = por %p3642_p11, %p3641_p13 }
 0x82b   : > { %p3639_p6 = pneg %p3638_p3 }
 0x82c   : > { %p3645_p10 = por %p3644_p2, %p3643_p4 }
 0x82e   : > { %p3646_p12 = pnand %p3645_p10, %p3639_p6 }
 0x830   : > { %3649 = shalt.err (!%p3646_p12)
}
 0x831   : > { %s3731_s23 = smov 128   ;;  %s3732_s21 = smov 8  }
 0x832   : > { %3144 = dma.vmem_to_hbm [thread:$0]  (%p5771_p9), %s5357_s30, 4096, %s5355_s12, %s2598_s27, %s3731_s23, %s3731_s23, %s3732_s21  }
 0x833 PF: > { %s2626_s13 = sand.u32 1, %s3696_s24   ;;  %p5772_p0 = scmp.ne.s32.totalorder %s5507_s19, 0 }
 0x834   : > { %p5773_p7 = scmp.ge.s32.totalorder %s3716_s29, 2  ;;  %s2627_s15 = scalar_lea.sflag [#allocation6], %s2626_s13 }
 0x836   : > { %p3170_p5 = pnand %p5773_p7, %p5772_p0 }
 0x838   : > { %3691 = dma.done.wait (!%p3170_p5), %s2627_s15, 4096  }
 0x839   : > { %3693 = vsyncadd (!%p3170_p5), %s2627_s15, 4294963200  ;;  %s26_s29 = sadd.s32 1, %s3716_s29   ;;  %s5774_s24 = smov %s3700_s25 }
 0x83a   : > { %p23_p8 = scmp.ge.s32.totalorder %s26_s29, 4   ;;  %s5775_s25 = smov %s3704_s26 }
 0x83b   : > { %s5776_s26 = smov %s4007_s17  ;;  %s5777_s27 = smov %s3712_s28 }
 0x83c   : > { %s5778_s28 = smov %s5780_s18  ;;  %25 = sbr.rel (!%p23_p8) target bundleno = 11 (0xb), region = 126 }
 0x843   :  { %2632 = vsyncpa [#allocation5], 1 }
 0x844   :  { %2634 = vsyncpa [#allocation5 + $0x1], 1 }
 0x845   :  { %2635 = vsyncpa [#allocation8], 1 }
 0x846   :  { %2636 = vsyncpa [#allocation11], 1 }
 0x847   :  { %2637 = vsyncpa [#allocation14], 1 }
 0x848   :  { %2638 = vsyncpa [#allocation6], 1 }
 0x849   :  { %2640 = vsyncpa [#allocation6 + $0x1], 1 }

</bundles_post_ra>
